<compile_context>
chip_gen: v5e
topology: v5e:2x2
jax: 0.10.0
libtpu: 0.0.40
codegen_flags: <defaults>
</compile_context>

<pallas_src>
import functools

import jax
import jax.numpy as jnp
from jax import lax
from jax.experimental import pallas as pl
from jax.experimental.pallas import tpu as pltpu

INPUT_SIZE = 82
PAD_IN = 128          # 82 zero-padded up to one full lane tile
HIDDEN = 128
OUT_DIM = 2


def _aligned(off, align=8):
    # Alignment hint for dynamic slice starts; pass through concrete ints
    # (a fully-unrolled fori_loop may hand us Python ints).
    if isinstance(off, int):
        return off
    return pl.multiple_of(off, align)


def lstm_fc_kernel(
    x_ref,       # (T*B, PAD_IN)  bf16   time-major, feature-padded input
    wih0_ref,    # (PAD_IN, 4H)   bf16   layer-0 input weights (zero rows for pad)
    whh0_ref,    # (H, 4H)        bf16   layer-0 recurrent weights
    b0_ref,      # (1, 4H)        f32    b_ih_l0 + b_hh_l0
    wih1_ref,    # (H, 4H)        bf16   layer-1 input weights
    whh1_ref,    # (H, 4H)        bf16   layer-1 recurrent weights
    b1_ref,      # (1, 4H)        f32    b_ih_l1 + b_hh_l1
    fcw_ref,     # (H, OUT)       bf16
    fcb_ref,     # (1, OUT)       f32
    out_ref,     # (B, OUT)       f32
    xproj0_sc,   # (T*B, 4H) f32  hoisted layer-0 input projection (+ bias)
    h0all_sc,    # (T*B, H)  f32  layer-0 hidden state for every timestep
    xproj1_sc,   # (T*B, 4H) f32  hoisted layer-1 input projection (+ bias)
    *,
    batch,
    seq_len,
    unroll,
):
    H = HIDDEN

    # Gate columns are pre-permuted to (i, f, o, g): one wide sigmoid slab,
    # one tanh slab.
    def gates_to_hc(gates, c):
        sig = jax.nn.sigmoid(gates[:, : 3 * H])     # (B, 3H) single EUP slab
        g = jnp.tanh(gates[:, 3 * H:])              # (B, H)
        i = sig[:, 0 * H:1 * H]
        f = sig[:, 1 * H:2 * H]
        o = sig[:, 2 * H:3 * H]
        c_new = f * c + i * g
        h_new = o * jnp.tanh(c_new)
        return h_new, c_new                          # both f32

    # ---- Hoisted layer-0 input projection (one big batched matmul). ----
    xproj0_sc[...] = (
        jnp.dot(x_ref[...], wih0_ref[...], preferred_element_type=jnp.float32)
        + b0_ref[...]
    )

    zeros_h = jnp.zeros((batch, H), jnp.bfloat16)
    zeros_c = jnp.zeros((batch, H), jnp.float32)

    # ---- Loop A: layer-0 recurrence (only h0 @ W_hh0 on the serial path). ----
    def step0(t, carry):
        h, c = carry
        off = _aligned(t * batch)
        g = xproj0_sc[pl.ds(off, batch), :] + jnp.dot(
            h, whh0_ref[...], preferred_element_type=jnp.float32)
        h_new, c_new = gates_to_hc(g, c)
        h0all_sc[pl.ds(off, batch), :] = h_new
        return h_new.astype(jnp.bfloat16), c_new

    lax.fori_loop(0, seq_len, step0, (zeros_h, zeros_c), unroll=unroll)

    # ---- Hoisted layer-1 input projection (bias folded in). ----
    xproj1_sc[...] = (
        jnp.dot(h0all_sc[...].astype(jnp.bfloat16), wih1_ref[...],
                preferred_element_type=jnp.float32)
        + b1_ref[...]
    )

    # ---- Loop B: layer-1 recurrence (only h1 @ W_hh1 on the serial path). ----
    def step1(t, carry):
        h, c = carry
        off = _aligned(t * batch)
        g = xproj1_sc[pl.ds(off, batch), :] + jnp.dot(
            h, whh1_ref[...], preferred_element_type=jnp.float32)
        h_new, c_new = gates_to_hc(g, c)
        return h_new.astype(jnp.bfloat16), c_new

    h1, _ = lax.fori_loop(0, seq_len, step1, (zeros_h, zeros_c), unroll=unroll)

    # fc head on the last timestep's top-layer hidden state.
    out_ref[...] = (
        jnp.dot(h1, fcw_ref[...], preferred_element_type=jnp.float32)
        + fcb_ref[...]
    )


def _reorder_gate_cols(a):
    """Permute the last axis from PyTorch's (i, f, g, o) to (i, f, o, g)."""
    H = HIDDEN
    return jnp.concatenate(
        [a[..., : 2 * H], a[..., 3 * H:], a[..., 2 * H: 3 * H]], axis=-1)


def betting_model_forward(x_btf, params):
    """x_btf: (B, T, INPUT_SIZE) float32, batch_first like the PyTorch module.

    params: PyTorch-shaped LSTM/Linear weights (see init_params)."""
    (w_ih0, w_hh0, b_ih0, b_hh0,
     w_ih1, w_hh1, b_ih1, b_hh1, fc_w, fc_b) = params
    B, T, In = x_btf.shape
    assert In == INPUT_SIZE
    assert B % 8 == 0, "batch must be a multiple of 8 (sublane tile)"

    # time-major, flattened to (T*B, In), feature dim zero-padded to 128 lanes,
    # cast to bf16 (halves x DMA; zero pad rows are matched in W_ih0).
    x_flat = jnp.transpose(x_btf, (1, 0, 2)).reshape(T * B, In)
    x_pad = jnp.pad(x_flat, ((0, 0), (0, PAD_IN - In))).astype(jnp.bfloat16)

    # Kernel weight layout (built once): transpose, permute gate columns to
    # (i, f, o, g), zero-pad W_ih0 rows, cast matmul operands to bf16.
    wih0_T = _reorder_gate_cols(
        jnp.pad(w_ih0.T, ((0, PAD_IN - In), (0, 0)))).astype(jnp.bfloat16)
    whh0_T = _reorder_gate_cols(w_hh0.T).astype(jnp.bfloat16)
    wih1_T = _reorder_gate_cols(w_ih1.T).astype(jnp.bfloat16)
    whh1_T = _reorder_gate_cols(w_hh1.T).astype(jnp.bfloat16)
    b0 = _reorder_gate_cols(b_ih0 + b_hh0)[None, :]           # (1, 4H) f32
    b1 = _reorder_gate_cols(b_ih1 + b_hh1)[None, :]           # (1, 4H) f32
    fcw_T = fc_w.T.astype(jnp.bfloat16)                       # (128, 2)
    fcb = fc_b[None, :]                                       # (1, 2)  f32

    # Full unroll for short sequences; partial unroll keeps code size and
    # vreg pressure bounded for long ones.
    unroll = True if T <= 16 else 4

    kernel = functools.partial(lstm_fc_kernel, batch=B, seq_len=T, unroll=unroll)

    out = pl.pallas_call(
        kernel,
        out_shape=jax.ShapeDtypeStruct((B, OUT_DIM), jnp.float32),
        # Single invocation (no grid): everything resident in VMEM, DMA'd once.
        in_specs=[pl.BlockSpec(memory_space=pltpu.MemorySpace.VMEM)] * 9,
        out_specs=pl.BlockSpec(memory_space=pltpu.MemorySpace.VMEM),
        scratch_shapes=[
            pltpu.VMEM((T * B, 4 * HIDDEN), jnp.float32),   # xproj0
            pltpu.VMEM((T * B, HIDDEN), jnp.float32),       # h0 for all t
            pltpu.VMEM((T * B, 4 * HIDDEN), jnp.float32),   # xproj1
        ],
        compiler_params=pltpu.CompilerParams(
            vmem_limit_bytes=32 * 1024 * 1024),
    )(x_pad, wih0_T, whh0_T, b0, wih1_T, whh1_T, b1, fcw_T, fcb)
    return out


def init_params(key):
    """Deterministic synthetic parameters with PyTorch-shaped tensors."""
    k = 1.0 / jnp.sqrt(jnp.float32(HIDDEN))
    keys = jax.random.split(key, 10)

    def u(kk, shape):
        return jax.random.uniform(kk, shape, jnp.float32, -k, k)

    w_ih0 = u(keys[0], (4 * HIDDEN, INPUT_SIZE))
    w_hh0 = u(keys[1], (4 * HIDDEN, HIDDEN))
    b_ih0 = u(keys[2], (4 * HIDDEN,))
    b_hh0 = u(keys[3], (4 * HIDDEN,))
    w_ih1 = u(keys[4], (4 * HIDDEN, HIDDEN))
    w_hh1 = u(keys[5], (4 * HIDDEN, HIDDEN))
    b_ih1 = u(keys[6], (4 * HIDDEN,))
    b_hh1 = u(keys[7], (4 * HIDDEN,))
    fc_w = u(keys[8], (OUT_DIM, HIDDEN))
    fc_b = u(keys[9], (OUT_DIM,))
    return (w_ih0, w_hh0, b_ih0, b_hh0,
            w_ih1, w_hh1, b_ih1, b_hh1, fc_w, fc_b)


def reference_forward(x_btf, params):
    """Pure-JAX f32 reference (same math as torch.nn.LSTM + Linear, eval)."""
    (w_ih0, w_hh0, b_ih0, b_hh0,
     w_ih1, w_hh1, b_ih1, b_hh1, fc_w, fc_b) = params
    B, T, _ = x_btf.shape
    H = HIDDEN

    def cell(inp, h, c, w_ih, w_hh, b_ih, b_hh):
        g = inp @ w_ih.T + h @ w_hh.T + b_ih + b_hh
        i = jax.nn.sigmoid(g[:, 0 * H:1 * H])
        f = jax.nn.sigmoid(g[:, 1 * H:2 * H])
        gg = jnp.tanh(g[:, 2 * H:3 * H])
        o = jax.nn.sigmoid(g[:, 3 * H:4 * H])
        c_new = f * c + i * gg
        return o * jnp.tanh(c_new), c_new

    def step(carry, x_t):
        h0, c0, h1, c1 = carry
        h0, c0 = cell(x_t, h0, c0, w_ih0, w_hh0, b_ih0, b_hh0)
        h1, c1 = cell(h0, h1, c1, w_ih1, w_hh1, b_ih1, b_hh1)
        return (h0, c0, h1, c1), None

    z = jnp.zeros((B, H), jnp.float32)
    (_, _, h1, _), _ = jax.lax.scan(step, (z, z, z, z),
                                    jnp.transpose(x_btf, (1, 0, 2)))
    return h1 @ fc_w.T + fc_b


if __name__ == "__main__":
    key = jax.random.PRNGKey(0)
    pkey, xkey = jax.random.split(key)

    B, T = 8, 8
    x = jax.random.normal(xkey, (B, T, INPUT_SIZE), jnp.float32)
    params = init_params(pkey)

    out = jax.block_until_ready(betting_model_forward(x, params))
    ref = jax.block_until_ready(reference_forward(x, params))

    assert out.shape == (B, OUT_DIM)
    # bf16 MXU operands with f32 accumulation: loosened tolerance vs f32 ref.
    assert jnp.allclose(out, ref, atol=3e-2, rtol=3e-2), (out, ref)

    print("KERNEL_OK")
</pallas_src>

<mosaic_0001>
module attributes {stable_mosaic.version = 11 : i64} {
  func.func @lstm_fc_kernel(%arg0: memref<64x128xbf16, #tpu.memory_space<vmem>>, %arg1: memref<128x512xbf16, #tpu.memory_space<vmem>>, %arg2: memref<128x512xbf16, #tpu.memory_space<vmem>>, %arg3: memref<1x512xf32, #tpu.memory_space<vmem>>, %arg4: memref<128x512xbf16, #tpu.memory_space<vmem>>, %arg5: memref<128x512xbf16, #tpu.memory_space<vmem>>, %arg6: memref<1x512xf32, #tpu.memory_space<vmem>>, %arg7: memref<128x2xbf16, #tpu.memory_space<vmem>>, %arg8: memref<1x2xf32, #tpu.memory_space<vmem>>, %arg9: memref<8x2xf32, #tpu.memory_space<vmem>>, %arg10: memref<64x512xf32, #tpu.memory_space<vmem>>, %arg11: memref<64x128xf32, #tpu.memory_space<vmem>>, %arg12: memref<64x512xf32, #tpu.memory_space<vmem>>) attributes {dimension_semantics = [], scalar_prefetch = 0 : i64, scratch_operands = 3 : i64, tpu.core_type = #tpu.core_type<tc>} {
    %c0 = arith.constant 0 : index
    %c0_0 = arith.constant 0 : index
    %0 = vector.load %arg0[%c0, %c0_0] : memref<64x128xbf16, #tpu.memory_space<vmem>>, vector<64x128xbf16>
    %c0_1 = arith.constant 0 : index
    %c0_2 = arith.constant 0 : index
    %1 = vector.load %arg1[%c0_1, %c0_2] : memref<128x512xbf16, #tpu.memory_space<vmem>>, vector<128x512xbf16>
    %cst = arith.constant dense<0.000000e+00> : vector<64x512xf32>
    %2 = tpu.matmul %0, %1, %cst {dimension_numbers = #tpu.dot_dimension_numbers<[1], [0], [0], [1], [0, 0, 1, 1], [], []>} : vector<64x128xbf16>, vector<128x512xbf16>, vector<64x512xf32> -> vector<64x512xf32>
    %c0_3 = arith.constant 0 : index
    %c0_4 = arith.constant 0 : index
    %3 = vector.load %arg3[%c0_3, %c0_4] : memref<1x512xf32, #tpu.memory_space<vmem>>, vector<1x512xf32>
    %4 = vector.broadcast %3 : vector<1x512xf32> to vector<64x512xf32>
    %5 = arith.addf %2, %4 : vector<64x512xf32>
    %c0_5 = arith.constant 0 : index
    %c0_6 = arith.constant 0 : index
    %6 = vector.load %arg10[%c0_5, %c0_6] : memref<64x512xf32, #tpu.memory_space<vmem>>, vector<64x512xf32>
    tpu.vector_store %arg10[%c0_5, %c0_6], %5 {strides = array<i32>} : memref<64x512xf32, #tpu.memory_space<vmem>>, vector<64x512xf32>,
    %cst_7 = arith.constant 0.000000e+00 : bf16
    %7 = vector.broadcast %cst_7 : bf16 to vector<8x128xbf16>
    %cst_8 = arith.constant 0.000000e+00 : f32
    %8 = vector.broadcast %cst_8 : f32 to vector<8x128xf32>
    %c0_i32 = arith.constant 0 : i32
    %c8_i32 = arith.constant 8 : i32
    %9 = arith.muli %c0_i32, %c8_i32 : i32
    %10 = tpu.assume_multiple %9, 8 : i32
    %11 = arith.index_cast %10 : i32 to index
    %c0_9 = arith.constant 0 : index
    %12 = vector.load %arg10[%11, %c0_9] : memref<64x512xf32, #tpu.memory_space<vmem>>, vector<8x512xf32>
    %c0_10 = arith.constant 0 : index
    %c0_11 = arith.constant 0 : index
    %13 = vector.load %arg2[%c0_10, %c0_11] : memref<128x512xbf16, #tpu.memory_space<vmem>>, vector<128x512xbf16>
    %cst_12 = arith.constant dense<0.000000e+00> : vector<8x512xf32>
    %14 = tpu.matmul %7, %13, %cst_12 {dimension_numbers = #tpu.dot_dimension_numbers<[1], [0], [0], [1], [0, 0, 1, 1], [], []>} : vector<8x128xbf16>, vector<128x512xbf16>, vector<8x512xf32> -> vector<8x512xf32>
    %15 = arith.addf %12, %14 : vector<8x512xf32>
    %16 = vector.extract_strided_slice %15 {offsets = [0, 0], sizes = [8, 384], strides = [1, 1]} : vector<8x512xf32> to vector<8x384xf32>
    %17 = arith.negf %16 : vector<8x384xf32>
    %18 = math.exp %17 : vector<8x384xf32>
    %cst_13 = arith.constant 1.000000e+00 : f32
    %19 = vector.broadcast %cst_13 : f32 to vector<8x384xf32>
    %20 = arith.addf %19, %18 : vector<8x384xf32>
    %21 = arith.divf %19, %20 : vector<8x384xf32>
    %22 = vector.extract_strided_slice %15 {offsets = [0, 384], sizes = [8, 128], strides = [1, 1]} : vector<8x512xf32> to vector<8x128xf32>
    %23 = math.tanh %22 : vector<8x128xf32>
    %24 = vector.extract_strided_slice %21 {offsets = [0, 0], sizes = [8, 128], strides = [1, 1]} : vector<8x384xf32> to vector<8x128xf32>
    %25 = vector.extract_strided_slice %21 {offsets = [0, 128], sizes = [8, 128], strides = [1, 1]} : vector<8x384xf32> to vector<8x128xf32>
    %26 = vector.extract_strided_slice %21 {offsets = [0, 256], sizes = [8, 128], strides = [1, 1]} : vector<8x384xf32> to vector<8x128xf32>
    %27 = arith.mulf %25, %8 : vector<8x128xf32>
    %28 = arith.mulf %24, %23 : vector<8x128xf32>
    %29 = arith.addf %27, %28 : vector<8x128xf32>
    %30 = math.tanh %29 : vector<8x128xf32>
    %31 = arith.mulf %26, %30 : vector<8x128xf32>
    %32 = arith.index_cast %10 : i32 to index
    %c0_14 = arith.constant 0 : index
    %33 = vector.load %arg11[%32, %c0_14] : memref<64x128xf32, #tpu.memory_space<vmem>>, vector<8x128xf32>
    tpu.vector_store %arg11[%32, %c0_14], %31 {strides = array<i32>} : memref<64x128xf32, #tpu.memory_space<vmem>>, vector<8x128xf32>,
    %34 = arith.truncf %31 : vector<8x128xf32> to vector<8x128xbf16>
    %c1_i32 = arith.constant 1 : i32
    %c8_i32_15 = arith.constant 8 : i32
    %35 = arith.muli %c1_i32, %c8_i32_15 : i32
    %36 = tpu.assume_multiple %35, 8 : i32
    %37 = arith.index_cast %36 : i32 to index
    %c0_16 = arith.constant 0 : index
    %38 = vector.load %arg10[%37, %c0_16] : memref<64x512xf32, #tpu.memory_space<vmem>>, vector<8x512xf32>
    %c0_17 = arith.constant 0 : index
    %c0_18 = arith.constant 0 : index
    %39 = vector.load %arg2[%c0_17, %c0_18] : memref<128x512xbf16, #tpu.memory_space<vmem>>, vector<128x512xbf16>
    %cst_19 = arith.constant dense<0.000000e+00> : vector<8x512xf32>
    %40 = tpu.matmul %34, %39, %cst_19 {dimension_numbers = #tpu.dot_dimension_numbers<[1], [0], [0], [1], [0, 0, 1, 1], [], []>} : vector<8x128xbf16>, vector<128x512xbf16>, vector<8x512xf32> -> vector<8x512xf32>
    %41 = arith.addf %38, %40 : vector<8x512xf32>
    %42 = vector.extract_strided_slice %41 {offsets = [0, 0], sizes = [8, 384], strides = [1, 1]} : vector<8x512xf32> to vector<8x384xf32>
    %43 = arith.negf %42 : vector<8x384xf32>
    %44 = math.exp %43 : vector<8x384xf32>
    %cst_20 = arith.constant 1.000000e+00 : f32
    %45 = vector.broadcast %cst_20 : f32 to vector<8x384xf32>
    %46 = arith.addf %45, %44 : vector<8x384xf32>
    %47 = arith.divf %45, %46 : vector<8x384xf32>
    %48 = vector.extract_strided_slice %41 {offsets = [0, 384], sizes = [8, 128], strides = [1, 1]} : vector<8x512xf32> to vector<8x128xf32>
    %49 = math.tanh %48 : vector<8x128xf32>
    %50 = vector.extract_strided_slice %47 {offsets = [0, 0], sizes = [8, 128], strides = [1, 1]} : vector<8x384xf32> to vector<8x128xf32>
    %51 = vector.extract_strided_slice %47 {offsets = [0, 128], sizes = [8, 128], strides = [1, 1]} : vector<8x384xf32> to vector<8x128xf32>
    %52 = vector.extract_strided_slice %47 {offsets = [0, 256], sizes = [8, 128], strides = [1, 1]} : vector<8x384xf32> to vector<8x128xf32>
    %53 = arith.mulf %51, %29 : vector<8x128xf32>
    %54 = arith.mulf %50, %49 : vector<8x128xf32>
    %55 = arith.addf %53, %54 : vector<8x128xf32>
    %56 = math.tanh %55 : vector<8x128xf32>
    %57 = arith.mulf %52, %56 : vector<8x128xf32>
    %58 = arith.index_cast %36 : i32 to index
    %c0_21 = arith.constant 0 : index
    %59 = vector.load %arg11[%58, %c0_21] : memref<64x128xf32, #tpu.memory_space<vmem>>, vector<8x128xf32>
    tpu.vector_store %arg11[%58, %c0_21], %57 {strides = array<i32>} : memref<64x128xf32, #tpu.memory_space<vmem>>, vector<8x128xf32>,
    %60 = arith.truncf %57 : vector<8x128xf32> to vector<8x128xbf16>
    %c2_i32 = arith.constant 2 : i32
    %c8_i32_22 = arith.constant 8 : i32
    %61 = arith.muli %c2_i32, %c8_i32_22 : i32
    %62 = tpu.assume_multiple %61, 8 : i32
    %63 = arith.index_cast %62 : i32 to index
    %c0_23 = arith.constant 0 : index
    %64 = vector.load %arg10[%63, %c0_23] : memref<64x512xf32, #tpu.memory_space<vmem>>, vector<8x512xf32>
    %c0_24 = arith.constant 0 : index
    %c0_25 = arith.constant 0 : index
    %65 = vector.load %arg2[%c0_24, %c0_25] : memref<128x512xbf16, #tpu.memory_space<vmem>>, vector<128x512xbf16>
    %cst_26 = arith.constant dense<0.000000e+00> : vector<8x512xf32>
    %66 = tpu.matmul %60, %65, %cst_26 {dimension_numbers = #tpu.dot_dimension_numbers<[1], [0], [0], [1], [0, 0, 1, 1], [], []>} : vector<8x128xbf16>, vector<128x512xbf16>, vector<8x512xf32> -> vector<8x512xf32>
    %67 = arith.addf %64, %66 : vector<8x512xf32>
    %68 = vector.extract_strided_slice %67 {offsets = [0, 0], sizes = [8, 384], strides = [1, 1]} : vector<8x512xf32> to vector<8x384xf32>
    %69 = arith.negf %68 : vector<8x384xf32>
    %70 = math.exp %69 : vector<8x384xf32>
    %cst_27 = arith.constant 1.000000e+00 : f32
    %71 = vector.broadcast %cst_27 : f32 to vector<8x384xf32>
    %72 = arith.addf %71, %70 : vector<8x384xf32>
    %73 = arith.divf %71, %72 : vector<8x384xf32>
    %74 = vector.extract_strided_slice %67 {offsets = [0, 384], sizes = [8, 128], strides = [1, 1]} : vector<8x512xf32> to vector<8x128xf32>
    %75 = math.tanh %74 : vector<8x128xf32>
    %76 = vector.extract_strided_slice %73 {offsets = [0, 0], sizes = [8, 128], strides = [1, 1]} : vector<8x384xf32> to vector<8x128xf32>
    %77 = vector.extract_strided_slice %73 {offsets = [0, 128], sizes = [8, 128], strides = [1, 1]} : vector<8x384xf32> to vector<8x128xf32>
    %78 = vector.extract_strided_slice %73 {offsets = [0, 256], sizes = [8, 128], strides = [1, 1]} : vector<8x384xf32> to vector<8x128xf32>
    %79 = arith.mulf %77, %55 : vector<8x128xf32>
    %80 = arith.mulf %76, %75 : vector<8x128xf32>
    %81 = arith.addf %79, %80 : vector<8x128xf32>
    %82 = math.tanh %81 : vector<8x128xf32>
    %83 = arith.mulf %78, %82 : vector<8x128xf32>
    %84 = arith.index_cast %62 : i32 to index
    %c0_28 = arith.constant 0 : index
    %85 = vector.load %arg11[%84, %c0_28] : memref<64x128xf32, #tpu.memory_space<vmem>>, vector<8x128xf32>
    tpu.vector_store %arg11[%84, %c0_28], %83 {strides = array<i32>} : memref<64x128xf32, #tpu.memory_space<vmem>>, vector<8x128xf32>,
    %86 = arith.truncf %83 : vector<8x128xf32> to vector<8x128xbf16>
    %c3_i32 = arith.constant 3 : i32
    %c8_i32_29 = arith.constant 8 : i32
    %87 = arith.muli %c3_i32, %c8_i32_29 : i32
    %88 = tpu.assume_multiple %87, 8 : i32
    %89 = arith.index_cast %88 : i32 to index
    %c0_30 = arith.constant 0 : index
    %90 = vector.load %arg10[%89, %c0_30] : memref<64x512xf32, #tpu.memory_space<vmem>>, vector<8x512xf32>
    %c0_31 = arith.constant 0 : index
    %c0_32 = arith.constant 0 : index
    %91 = vector.load %arg2[%c0_31, %c0_32] : memref<128x512xbf16, #tpu.memory_space<vmem>>, vector<128x512xbf16>
    %cst_33 = arith.constant dense<0.000000e+00> : vector<8x512xf32>
    %92 = tpu.matmul %86, %91, %cst_33 {dimension_numbers = #tpu.dot_dimension_numbers<[1], [0], [0], [1], [0, 0, 1, 1], [], []>} : vector<8x128xbf16>, vector<128x512xbf16>, vector<8x512xf32> -> vector<8x512xf32>
    %93 = arith.addf %90, %92 : vector<8x512xf32>
    %94 = vector.extract_strided_slice %93 {offsets = [0, 0], sizes = [8, 384], strides = [1, 1]} : vector<8x512xf32> to vector<8x384xf32>
    %95 = arith.negf %94 : vector<8x384xf32>
    %96 = math.exp %95 : vector<8x384xf32>
    %cst_34 = arith.constant 1.000000e+00 : f32
    %97 = vector.broadcast %cst_34 : f32 to vector<8x384xf32>
    %98 = arith.addf %97, %96 : vector<8x384xf32>
    %99 = arith.divf %97, %98 : vector<8x384xf32>
    %100 = vector.extract_strided_slice %93 {offsets = [0, 384], sizes = [8, 128], strides = [1, 1]} : vector<8x512xf32> to vector<8x128xf32>
    %101 = math.tanh %100 : vector<8x128xf32>
    %102 = vector.extract_strided_slice %99 {offsets = [0, 0], sizes = [8, 128], strides = [1, 1]} : vector<8x384xf32> to vector<8x128xf32>
    %103 = vector.extract_strided_slice %99 {offsets = [0, 128], sizes = [8, 128], strides = [1, 1]} : vector<8x384xf32> to vector<8x128xf32>
    %104 = vector.extract_strided_slice %99 {offsets = [0, 256], sizes = [8, 128], strides = [1, 1]} : vector<8x384xf32> to vector<8x128xf32>
    %105 = arith.mulf %103, %81 : vector<8x128xf32>
    %106 = arith.mulf %102, %101 : vector<8x128xf32>
    %107 = arith.addf %105, %106 : vector<8x128xf32>
    %108 = math.tanh %107 : vector<8x128xf32>
    %109 = arith.mulf %104, %108 : vector<8x128xf32>
    %110 = arith.index_cast %88 : i32 to index
    %c0_35 = arith.constant 0 : index
    %111 = vector.load %arg11[%110, %c0_35] : memref<64x128xf32, #tpu.memory_space<vmem>>, vector<8x128xf32>
    tpu.vector_store %arg11[%110, %c0_35], %109 {strides = array<i32>} : memref<64x128xf32, #tpu.memory_space<vmem>>, vector<8x128xf32>,
    %112 = arith.truncf %109 : vector<8x128xf32> to vector<8x128xbf16>
    %c4_i32 = arith.constant 4 : i32
    %c8_i32_36 = arith.constant 8 : i32
    %113 = arith.muli %c4_i32, %c8_i32_36 : i32
    %114 = tpu.assume_multiple %113, 8 : i32
    %115 = arith.index_cast %114 : i32 to index
    %c0_37 = arith.constant 0 : index
    %116 = vector.load %arg10[%115, %c0_37] : memref<64x512xf32, #tpu.memory_space<vmem>>, vector<8x512xf32>
    %c0_38 = arith.constant 0 : index
    %c0_39 = arith.constant 0 : index
    %117 = vector.load %arg2[%c0_38, %c0_39] : memref<128x512xbf16, #tpu.memory_space<vmem>>, vector<128x512xbf16>
    %cst_40 = arith.constant dense<0.000000e+00> : vector<8x512xf32>
    %118 = tpu.matmul %112, %117, %cst_40 {dimension_numbers = #tpu.dot_dimension_numbers<[1], [0], [0], [1], [0, 0, 1, 1], [], []>} : vector<8x128xbf16>, vector<128x512xbf16>, vector<8x512xf32> -> vector<8x512xf32>
    %119 = arith.addf %116, %118 : vector<8x512xf32>
    %120 = vector.extract_strided_slice %119 {offsets = [0, 0], sizes = [8, 384], strides = [1, 1]} : vector<8x512xf32> to vector<8x384xf32>
    %121 = arith.negf %120 : vector<8x384xf32>
    %122 = math.exp %121 : vector<8x384xf32>
    %cst_41 = arith.constant 1.000000e+00 : f32
    %123 = vector.broadcast %cst_41 : f32 to vector<8x384xf32>
    %124 = arith.addf %123, %122 : vector<8x384xf32>
    %125 = arith.divf %123, %124 : vector<8x384xf32>
    %126 = vector.extract_strided_slice %119 {offsets = [0, 384], sizes = [8, 128], strides = [1, 1]} : vector<8x512xf32> to vector<8x128xf32>
    %127 = math.tanh %126 : vector<8x128xf32>
    %128 = vector.extract_strided_slice %125 {offsets = [0, 0], sizes = [8, 128], strides = [1, 1]} : vector<8x384xf32> to vector<8x128xf32>
    %129 = vector.extract_strided_slice %125 {offsets = [0, 128], sizes = [8, 128], strides = [1, 1]} : vector<8x384xf32> to vector<8x128xf32>
    %130 = vector.extract_strided_slice %125 {offsets = [0, 256], sizes = [8, 128], strides = [1, 1]} : vector<8x384xf32> to vector<8x128xf32>
    %131 = arith.mulf %129, %107 : vector<8x128xf32>
    %132 = arith.mulf %128, %127 : vector<8x128xf32>
    %133 = arith.addf %131, %132 : vector<8x128xf32>
    %134 = math.tanh %133 : vector<8x128xf32>
    %135 = arith.mulf %130, %134 : vector<8x128xf32>
    %136 = arith.index_cast %114 : i32 to index
    %c0_42 = arith.constant 0 : index
    %137 = vector.load %arg11[%136, %c0_42] : memref<64x128xf32, #tpu.memory_space<vmem>>, vector<8x128xf32>
    tpu.vector_store %arg11[%136, %c0_42], %135 {strides = array<i32>} : memref<64x128xf32, #tpu.memory_space<vmem>>, vector<8x128xf32>,
    %138 = arith.truncf %135 : vector<8x128xf32> to vector<8x128xbf16>
    %c5_i32 = arith.constant 5 : i32
    %c8_i32_43 = arith.constant 8 : i32
    %139 = arith.muli %c5_i32, %c8_i32_43 : i32
    %140 = tpu.assume_multiple %139, 8 : i32
    %141 = arith.index_cast %140 : i32 to index
    %c0_44 = arith.constant 0 : index
    %142 = vector.load %arg10[%141, %c0_44] : memref<64x512xf32, #tpu.memory_space<vmem>>, vector<8x512xf32>
    %c0_45 = arith.constant 0 : index
    %c0_46 = arith.constant 0 : index
    %143 = vector.load %arg2[%c0_45, %c0_46] : memref<128x512xbf16, #tpu.memory_space<vmem>>, vector<128x512xbf16>
    %cst_47 = arith.constant dense<0.000000e+00> : vector<8x512xf32>
    %144 = tpu.matmul %138, %143, %cst_47 {dimension_numbers = #tpu.dot_dimension_numbers<[1], [0], [0], [1], [0, 0, 1, 1], [], []>} : vector<8x128xbf16>, vector<128x512xbf16>, vector<8x512xf32> -> vector<8x512xf32>
    %145 = arith.addf %142, %144 : vector<8x512xf32>
    %146 = vector.extract_strided_slice %145 {offsets = [0, 0], sizes = [8, 384], strides = [1, 1]} : vector<8x512xf32> to vector<8x384xf32>
    %147 = arith.negf %146 : vector<8x384xf32>
    %148 = math.exp %147 : vector<8x384xf32>
    %cst_48 = arith.constant 1.000000e+00 : f32
    %149 = vector.broadcast %cst_48 : f32 to vector<8x384xf32>
    %150 = arith.addf %149, %148 : vector<8x384xf32>
    %151 = arith.divf %149, %150 : vector<8x384xf32>
    %152 = vector.extract_strided_slice %145 {offsets = [0, 384], sizes = [8, 128], strides = [1, 1]} : vector<8x512xf32> to vector<8x128xf32>
    %153 = math.tanh %152 : vector<8x128xf32>
    %154 = vector.extract_strided_slice %151 {offsets = [0, 0], sizes = [8, 128], strides = [1, 1]} : vector<8x384xf32> to vector<8x128xf32>
    %155 = vector.extract_strided_slice %151 {offsets = [0, 128], sizes = [8, 128], strides = [1, 1]} : vector<8x384xf32> to vector<8x128xf32>
    %156 = vector.extract_strided_slice %151 {offsets = [0, 256], sizes = [8, 128], strides = [1, 1]} : vector<8x384xf32> to vector<8x128xf32>
    %157 = arith.mulf %155, %133 : vector<8x128xf32>
    %158 = arith.mulf %154, %153 : vector<8x128xf32>
    %159 = arith.addf %157, %158 : vector<8x128xf32>
    %160 = math.tanh %159 : vector<8x128xf32>
    %161 = arith.mulf %156, %160 : vector<8x128xf32>
    %162 = arith.index_cast %140 : i32 to index
    %c0_49 = arith.constant 0 : index
    %163 = vector.load %arg11[%162, %c0_49] : memref<64x128xf32, #tpu.memory_space<vmem>>, vector<8x128xf32>
    tpu.vector_store %arg11[%162, %c0_49], %161 {strides = array<i32>} : memref<64x128xf32, #tpu.memory_space<vmem>>, vector<8x128xf32>,
    %164 = arith.truncf %161 : vector<8x128xf32> to vector<8x128xbf16>
    %c6_i32 = arith.constant 6 : i32
    %c8_i32_50 = arith.constant 8 : i32
    %165 = arith.muli %c6_i32, %c8_i32_50 : i32
    %166 = tpu.assume_multiple %165, 8 : i32
    %167 = arith.index_cast %166 : i32 to index
    %c0_51 = arith.constant 0 : index
    %168 = vector.load %arg10[%167, %c0_51] : memref<64x512xf32, #tpu.memory_space<vmem>>, vector<8x512xf32>
    %c0_52 = arith.constant 0 : index
    %c0_53 = arith.constant 0 : index
    %169 = vector.load %arg2[%c0_52, %c0_53] : memref<128x512xbf16, #tpu.memory_space<vmem>>, vector<128x512xbf16>
    %cst_54 = arith.constant dense<0.000000e+00> : vector<8x512xf32>
    %170 = tpu.matmul %164, %169, %cst_54 {dimension_numbers = #tpu.dot_dimension_numbers<[1], [0], [0], [1], [0, 0, 1, 1], [], []>} : vector<8x128xbf16>, vector<128x512xbf16>, vector<8x512xf32> -> vector<8x512xf32>
    %171 = arith.addf %168, %170 : vector<8x512xf32>
    %172 = vector.extract_strided_slice %171 {offsets = [0, 0], sizes = [8, 384], strides = [1, 1]} : vector<8x512xf32> to vector<8x384xf32>
    %173 = arith.negf %172 : vector<8x384xf32>
    %174 = math.exp %173 : vector<8x384xf32>
    %cst_55 = arith.constant 1.000000e+00 : f32
    %175 = vector.broadcast %cst_55 : f32 to vector<8x384xf32>
    %176 = arith.addf %175, %174 : vector<8x384xf32>
    %177 = arith.divf %175, %176 : vector<8x384xf32>
    %178 = vector.extract_strided_slice %171 {offsets = [0, 384], sizes = [8, 128], strides = [1, 1]} : vector<8x512xf32> to vector<8x128xf32>
    %179 = math.tanh %178 : vector<8x128xf32>
    %180 = vector.extract_strided_slice %177 {offsets = [0, 0], sizes = [8, 128], strides = [1, 1]} : vector<8x384xf32> to vector<8x128xf32>
    %181 = vector.extract_strided_slice %177 {offsets = [0, 128], sizes = [8, 128], strides = [1, 1]} : vector<8x384xf32> to vector<8x128xf32>
    %182 = vector.extract_strided_slice %177 {offsets = [0, 256], sizes = [8, 128], strides = [1, 1]} : vector<8x384xf32> to vector<8x128xf32>
    %183 = arith.mulf %181, %159 : vector<8x128xf32>
    %184 = arith.mulf %180, %179 : vector<8x128xf32>
    %185 = arith.addf %183, %184 : vector<8x128xf32>
    %186 = math.tanh %185 : vector<8x128xf32>
    %187 = arith.mulf %182, %186 : vector<8x128xf32>
    %188 = arith.index_cast %166 : i32 to index
    %c0_56 = arith.constant 0 : index
    %189 = vector.load %arg11[%188, %c0_56] : memref<64x128xf32, #tpu.memory_space<vmem>>, vector<8x128xf32>
    tpu.vector_store %arg11[%188, %c0_56], %187 {strides = array<i32>} : memref<64x128xf32, #tpu.memory_space<vmem>>, vector<8x128xf32>,
    %190 = arith.truncf %187 : vector<8x128xf32> to vector<8x128xbf16>
    %c7_i32 = arith.constant 7 : i32
    %c8_i32_57 = arith.constant 8 : i32
    %191 = arith.muli %c7_i32, %c8_i32_57 : i32
    %192 = tpu.assume_multiple %191, 8 : i32
    %193 = arith.index_cast %192 : i32 to index
    %c0_58 = arith.constant 0 : index
    %194 = vector.load %arg10[%193, %c0_58] : memref<64x512xf32, #tpu.memory_space<vmem>>, vector<8x512xf32>
    %c0_59 = arith.constant 0 : index
    %c0_60 = arith.constant 0 : index
    %195 = vector.load %arg2[%c0_59, %c0_60] : memref<128x512xbf16, #tpu.memory_space<vmem>>, vector<128x512xbf16>
    %cst_61 = arith.constant dense<0.000000e+00> : vector<8x512xf32>
    %196 = tpu.matmul %190, %195, %cst_61 {dimension_numbers = #tpu.dot_dimension_numbers<[1], [0], [0], [1], [0, 0, 1, 1], [], []>} : vector<8x128xbf16>, vector<128x512xbf16>, vector<8x512xf32> -> vector<8x512xf32>
    %197 = arith.addf %194, %196 : vector<8x512xf32>
    %198 = vector.extract_strided_slice %197 {offsets = [0, 0], sizes = [8, 384], strides = [1, 1]} : vector<8x512xf32> to vector<8x384xf32>
    %199 = arith.negf %198 : vector<8x384xf32>
    %200 = math.exp %199 : vector<8x384xf32>
    %cst_62 = arith.constant 1.000000e+00 : f32
    %201 = vector.broadcast %cst_62 : f32 to vector<8x384xf32>
    %202 = arith.addf %201, %200 : vector<8x384xf32>
    %203 = arith.divf %201, %202 : vector<8x384xf32>
    %204 = vector.extract_strided_slice %197 {offsets = [0, 384], sizes = [8, 128], strides = [1, 1]} : vector<8x512xf32> to vector<8x128xf32>
    %205 = math.tanh %204 : vector<8x128xf32>
    %206 = vector.extract_strided_slice %203 {offsets = [0, 0], sizes = [8, 128], strides = [1, 1]} : vector<8x384xf32> to vector<8x128xf32>
    %207 = vector.extract_strided_slice %203 {offsets = [0, 128], sizes = [8, 128], strides = [1, 1]} : vector<8x384xf32> to vector<8x128xf32>
    %208 = vector.extract_strided_slice %203 {offsets = [0, 256], sizes = [8, 128], strides = [1, 1]} : vector<8x384xf32> to vector<8x128xf32>
    %209 = arith.mulf %207, %185 : vector<8x128xf32>
    %210 = arith.mulf %206, %205 : vector<8x128xf32>
    %211 = arith.addf %209, %210 : vector<8x128xf32>
    %212 = math.tanh %211 : vector<8x128xf32>
    %213 = arith.mulf %208, %212 : vector<8x128xf32>
    %214 = arith.index_cast %192 : i32 to index
    %c0_63 = arith.constant 0 : index
    %215 = vector.load %arg11[%214, %c0_63] : memref<64x128xf32, #tpu.memory_space<vmem>>, vector<8x128xf32>
    tpu.vector_store %arg11[%214, %c0_63], %213 {strides = array<i32>} : memref<64x128xf32, #tpu.memory_space<vmem>>, vector<8x128xf32>,
    %216 = arith.truncf %213 : vector<8x128xf32> to vector<8x128xbf16>
    %c8_i32_64 = arith.constant 8 : i32
    %c0_65 = arith.constant 0 : index
    %c0_66 = arith.constant 0 : index
    %217 = vector.load %arg11[%c0_65, %c0_66] : memref<64x128xf32, #tpu.memory_space<vmem>>, vector<64x128xf32>
    %218 = arith.truncf %217 : vector<64x128xf32> to vector<64x128xbf16>
    %c0_67 = arith.constant 0 : index
    %c0_68 = arith.constant 0 : index
    %219 = vector.load %arg4[%c0_67, %c0_68] : memref<128x512xbf16, #tpu.memory_space<vmem>>, vector<128x512xbf16>
    %cst_69 = arith.constant dense<0.000000e+00> : vector<64x512xf32>
    %220 = tpu.matmul %218, %219, %cst_69 {dimension_numbers = #tpu.dot_dimension_numbers<[1], [0], [0], [1], [0, 0, 1, 1], [], []>} : vector<64x128xbf16>, vector<128x512xbf16>, vector<64x512xf32> -> vector<64x512xf32>
    %c0_70 = arith.constant 0 : index
    %c0_71 = arith.constant 0 : index
    %221 = vector.load %arg6[%c0_70, %c0_71] : memref<1x512xf32, #tpu.memory_space<vmem>>, vector<1x512xf32>
    %222 = vector.broadcast %221 : vector<1x512xf32> to vector<64x512xf32>
    %223 = arith.addf %220, %222 : vector<64x512xf32>
    %c0_72 = arith.constant 0 : index
    %c0_73 = arith.constant 0 : index
    %224 = vector.load %arg12[%c0_72, %c0_73] : memref<64x512xf32, #tpu.memory_space<vmem>>, vector<64x512xf32>
    tpu.vector_store %arg12[%c0_72, %c0_73], %223 {strides = array<i32>} : memref<64x512xf32, #tpu.memory_space<vmem>>, vector<64x512xf32>,
    %c0_i32_74 = arith.constant 0 : i32
    %c8_i32_75 = arith.constant 8 : i32
    %225 = arith.muli %c0_i32_74, %c8_i32_75 : i32
    %226 = tpu.assume_multiple %225, 8 : i32
    %227 = arith.index_cast %226 : i32 to index
    %c0_76 = arith.constant 0 : index
    %228 = vector.load %arg12[%227, %c0_76] : memref<64x512xf32, #tpu.memory_space<vmem>>, vector<8x512xf32>
    %c0_77 = arith.constant 0 : index
    %c0_78 = arith.constant 0 : index
    %229 = vector.load %arg5[%c0_77, %c0_78] : memref<128x512xbf16, #tpu.memory_space<vmem>>, vector<128x512xbf16>
    %cst_79 = arith.constant dense<0.000000e+00> : vector<8x512xf32>
    %230 = tpu.matmul %7, %229, %cst_79 {dimension_numbers = #tpu.dot_dimension_numbers<[1], [0], [0], [1], [0, 0, 1, 1], [], []>} : vector<8x128xbf16>, vector<128x512xbf16>, vector<8x512xf32> -> vector<8x512xf32>
    %231 = arith.addf %228, %230 : vector<8x512xf32>
    %232 = vector.extract_strided_slice %231 {offsets = [0, 0], sizes = [8, 384], strides = [1, 1]} : vector<8x512xf32> to vector<8x384xf32>
    %233 = arith.negf %232 : vector<8x384xf32>
    %234 = math.exp %233 : vector<8x384xf32>
    %cst_80 = arith.constant 1.000000e+00 : f32
    %235 = vector.broadcast %cst_80 : f32 to vector<8x384xf32>
    %236 = arith.addf %235, %234 : vector<8x384xf32>
    %237 = arith.divf %235, %236 : vector<8x384xf32>
    %238 = vector.extract_strided_slice %231 {offsets = [0, 384], sizes = [8, 128], strides = [1, 1]} : vector<8x512xf32> to vector<8x128xf32>
    %239 = math.tanh %238 : vector<8x128xf32>
    %240 = vector.extract_strided_slice %237 {offsets = [0, 0], sizes = [8, 128], strides = [1, 1]} : vector<8x384xf32> to vector<8x128xf32>
    %241 = vector.extract_strided_slice %237 {offsets = [0, 128], sizes = [8, 128], strides = [1, 1]} : vector<8x384xf32> to vector<8x128xf32>
    %242 = vector.extract_strided_slice %237 {offsets = [0, 256], sizes = [8, 128], strides = [1, 1]} : vector<8x384xf32> to vector<8x128xf32>
    %243 = arith.mulf %241, %8 : vector<8x128xf32>
    %244 = arith.mulf %240, %239 : vector<8x128xf32>
    %245 = arith.addf %243, %244 : vector<8x128xf32>
    %246 = math.tanh %245 : vector<8x128xf32>
    %247 = arith.mulf %242, %246 : vector<8x128xf32>
    %248 = arith.truncf %247 : vector<8x128xf32> to vector<8x128xbf16>
    %c1_i32_81 = arith.constant 1 : i32
    %c8_i32_82 = arith.constant 8 : i32
    %249 = arith.muli %c1_i32_81, %c8_i32_82 : i32
    %250 = tpu.assume_multiple %249, 8 : i32
    %251 = arith.index_cast %250 : i32 to index
    %c0_83 = arith.constant 0 : index
    %252 = vector.load %arg12[%251, %c0_83] : memref<64x512xf32, #tpu.memory_space<vmem>>, vector<8x512xf32>
    %c0_84 = arith.constant 0 : index
    %c0_85 = arith.constant 0 : index
    %253 = vector.load %arg5[%c0_84, %c0_85] : memref<128x512xbf16, #tpu.memory_space<vmem>>, vector<128x512xbf16>
    %cst_86 = arith.constant dense<0.000000e+00> : vector<8x512xf32>
    %254 = tpu.matmul %248, %253, %cst_86 {dimension_numbers = #tpu.dot_dimension_numbers<[1], [0], [0], [1], [0, 0, 1, 1], [], []>} : vector<8x128xbf16>, vector<128x512xbf16>, vector<8x512xf32> -> vector<8x512xf32>
    %255 = arith.addf %252, %254 : vector<8x512xf32>
    %256 = vector.extract_strided_slice %255 {offsets = [0, 0], sizes = [8, 384], strides = [1, 1]} : vector<8x512xf32> to vector<8x384xf32>
    %257 = arith.negf %256 : vector<8x384xf32>
    %258 = math.exp %257 : vector<8x384xf32>
    %cst_87 = arith.constant 1.000000e+00 : f32
    %259 = vector.broadcast %cst_87 : f32 to vector<8x384xf32>
    %260 = arith.addf %259, %258 : vector<8x384xf32>
    %261 = arith.divf %259, %260 : vector<8x384xf32>
    %262 = vector.extract_strided_slice %255 {offsets = [0, 384], sizes = [8, 128], strides = [1, 1]} : vector<8x512xf32> to vector<8x128xf32>
    %263 = math.tanh %262 : vector<8x128xf32>
    %264 = vector.extract_strided_slice %261 {offsets = [0, 0], sizes = [8, 128], strides = [1, 1]} : vector<8x384xf32> to vector<8x128xf32>
    %265 = vector.extract_strided_slice %261 {offsets = [0, 128], sizes = [8, 128], strides = [1, 1]} : vector<8x384xf32> to vector<8x128xf32>
    %266 = vector.extract_strided_slice %261 {offsets = [0, 256], sizes = [8, 128], strides = [1, 1]} : vector<8x384xf32> to vector<8x128xf32>
    %267 = arith.mulf %265, %245 : vector<8x128xf32>
    %268 = arith.mulf %264, %263 : vector<8x128xf32>
    %269 = arith.addf %267, %268 : vector<8x128xf32>
    %270 = math.tanh %269 : vector<8x128xf32>
    %271 = arith.mulf %266, %270 : vector<8x128xf32>
    %272 = arith.truncf %271 : vector<8x128xf32> to vector<8x128xbf16>
    %c2_i32_88 = arith.constant 2 : i32
    %c8_i32_89 = arith.constant 8 : i32
    %273 = arith.muli %c2_i32_88, %c8_i32_89 : i32
    %274 = tpu.assume_multiple %273, 8 : i32
    %275 = arith.index_cast %274 : i32 to index
    %c0_90 = arith.constant 0 : index
    %276 = vector.load %arg12[%275, %c0_90] : memref<64x512xf32, #tpu.memory_space<vmem>>, vector<8x512xf32>
    %c0_91 = arith.constant 0 : index
    %c0_92 = arith.constant 0 : index
    %277 = vector.load %arg5[%c0_91, %c0_92] : memref<128x512xbf16, #tpu.memory_space<vmem>>, vector<128x512xbf16>
    %cst_93 = arith.constant dense<0.000000e+00> : vector<8x512xf32>
    %278 = tpu.matmul %272, %277, %cst_93 {dimension_numbers = #tpu.dot_dimension_numbers<[1], [0], [0], [1], [0, 0, 1, 1], [], []>} : vector<8x128xbf16>, vector<128x512xbf16>, vector<8x512xf32> -> vector<8x512xf32>
    %279 = arith.addf %276, %278 : vector<8x512xf32>
    %280 = vector.extract_strided_slice %279 {offsets = [0, 0], sizes = [8, 384], strides = [1, 1]} : vector<8x512xf32> to vector<8x384xf32>
    %281 = arith.negf %280 : vector<8x384xf32>
    %282 = math.exp %281 : vector<8x384xf32>
    %cst_94 = arith.constant 1.000000e+00 : f32
    %283 = vector.broadcast %cst_94 : f32 to vector<8x384xf32>
    %284 = arith.addf %283, %282 : vector<8x384xf32>
    %285 = arith.divf %283, %284 : vector<8x384xf32>
    %286 = vector.extract_strided_slice %279 {offsets = [0, 384], sizes = [8, 128], strides = [1, 1]} : vector<8x512xf32> to vector<8x128xf32>
    %287 = math.tanh %286 : vector<8x128xf32>
    %288 = vector.extract_strided_slice %285 {offsets = [0, 0], sizes = [8, 128], strides = [1, 1]} : vector<8x384xf32> to vector<8x128xf32>
    %289 = vector.extract_strided_slice %285 {offsets = [0, 128], sizes = [8, 128], strides = [1, 1]} : vector<8x384xf32> to vector<8x128xf32>
    %290 = vector.extract_strided_slice %285 {offsets = [0, 256], sizes = [8, 128], strides = [1, 1]} : vector<8x384xf32> to vector<8x128xf32>
    %291 = arith.mulf %289, %269 : vector<8x128xf32>
    %292 = arith.mulf %288, %287 : vector<8x128xf32>
    %293 = arith.addf %291, %292 : vector<8x128xf32>
    %294 = math.tanh %293 : vector<8x128xf32>
    %295 = arith.mulf %290, %294 : vector<8x128xf32>
    %296 = arith.truncf %295 : vector<8x128xf32> to vector<8x128xbf16>
    %c3_i32_95 = arith.constant 3 : i32
    %c8_i32_96 = arith.constant 8 : i32
    %297 = arith.muli %c3_i32_95, %c8_i32_96 : i32
    %298 = tpu.assume_multiple %297, 8 : i32
    %299 = arith.index_cast %298 : i32 to index
    %c0_97 = arith.constant 0 : index
    %300 = vector.load %arg12[%299, %c0_97] : memref<64x512xf32, #tpu.memory_space<vmem>>, vector<8x512xf32>
    %c0_98 = arith.constant 0 : index
    %c0_99 = arith.constant 0 : index
    %301 = vector.load %arg5[%c0_98, %c0_99] : memref<128x512xbf16, #tpu.memory_space<vmem>>, vector<128x512xbf16>
    %cst_100 = arith.constant dense<0.000000e+00> : vector<8x512xf32>
    %302 = tpu.matmul %296, %301, %cst_100 {dimension_numbers = #tpu.dot_dimension_numbers<[1], [0], [0], [1], [0, 0, 1, 1], [], []>} : vector<8x128xbf16>, vector<128x512xbf16>, vector<8x512xf32> -> vector<8x512xf32>
    %303 = arith.addf %300, %302 : vector<8x512xf32>
    %304 = vector.extract_strided_slice %303 {offsets = [0, 0], sizes = [8, 384], strides = [1, 1]} : vector<8x512xf32> to vector<8x384xf32>
    %305 = arith.negf %304 : vector<8x384xf32>
    %306 = math.exp %305 : vector<8x384xf32>
    %cst_101 = arith.constant 1.000000e+00 : f32
    %307 = vector.broadcast %cst_101 : f32 to vector<8x384xf32>
    %308 = arith.addf %307, %306 : vector<8x384xf32>
    %309 = arith.divf %307, %308 : vector<8x384xf32>
    %310 = vector.extract_strided_slice %303 {offsets = [0, 384], sizes = [8, 128], strides = [1, 1]} : vector<8x512xf32> to vector<8x128xf32>
    %311 = math.tanh %310 : vector<8x128xf32>
    %312 = vector.extract_strided_slice %309 {offsets = [0, 0], sizes = [8, 128], strides = [1, 1]} : vector<8x384xf32> to vector<8x128xf32>
    %313 = vector.extract_strided_slice %309 {offsets = [0, 128], sizes = [8, 128], strides = [1, 1]} : vector<8x384xf32> to vector<8x128xf32>
    %314 = vector.extract_strided_slice %309 {offsets = [0, 256], sizes = [8, 128], strides = [1, 1]} : vector<8x384xf32> to vector<8x128xf32>
    %315 = arith.mulf %313, %293 : vector<8x128xf32>
    %316 = arith.mulf %312, %311 : vector<8x128xf32>
    %317 = arith.addf %315, %316 : vector<8x128xf32>
    %318 = math.tanh %317 : vector<8x128xf32>
    %319 = arith.mulf %314, %318 : vector<8x128xf32>
    %320 = arith.truncf %319 : vector<8x128xf32> to vector<8x128xbf16>
    %c4_i32_102 = arith.constant 4 : i32
    %c8_i32_103 = arith.constant 8 : i32
    %321 = arith.muli %c4_i32_102, %c8_i32_103 : i32
    %322 = tpu.assume_multiple %321, 8 : i32
    %323 = arith.index_cast %322 : i32 to index
    %c0_104 = arith.constant 0 : index
    %324 = vector.load %arg12[%323, %c0_104] : memref<64x512xf32, #tpu.memory_space<vmem>>, vector<8x512xf32>
    %c0_105 = arith.constant 0 : index
    %c0_106 = arith.constant 0 : index
    %325 = vector.load %arg5[%c0_105, %c0_106] : memref<128x512xbf16, #tpu.memory_space<vmem>>, vector<128x512xbf16>
    %cst_107 = arith.constant dense<0.000000e+00> : vector<8x512xf32>
    %326 = tpu.matmul %320, %325, %cst_107 {dimension_numbers = #tpu.dot_dimension_numbers<[1], [0], [0], [1], [0, 0, 1, 1], [], []>} : vector<8x128xbf16>, vector<128x512xbf16>, vector<8x512xf32> -> vector<8x512xf32>
    %327 = arith.addf %324, %326 : vector<8x512xf32>
    %328 = vector.extract_strided_slice %327 {offsets = [0, 0], sizes = [8, 384], strides = [1, 1]} : vector<8x512xf32> to vector<8x384xf32>
    %329 = arith.negf %328 : vector<8x384xf32>
    %330 = math.exp %329 : vector<8x384xf32>
    %cst_108 = arith.constant 1.000000e+00 : f32
    %331 = vector.broadcast %cst_108 : f32 to vector<8x384xf32>
    %332 = arith.addf %331, %330 : vector<8x384xf32>
    %333 = arith.divf %331, %332 : vector<8x384xf32>
    %334 = vector.extract_strided_slice %327 {offsets = [0, 384], sizes = [8, 128], strides = [1, 1]} : vector<8x512xf32> to vector<8x128xf32>
    %335 = math.tanh %334 : vector<8x128xf32>
    %336 = vector.extract_strided_slice %333 {offsets = [0, 0], sizes = [8, 128], strides = [1, 1]} : vector<8x384xf32> to vector<8x128xf32>
    %337 = vector.extract_strided_slice %333 {offsets = [0, 128], sizes = [8, 128], strides = [1, 1]} : vector<8x384xf32> to vector<8x128xf32>
    %338 = vector.extract_strided_slice %333 {offsets = [0, 256], sizes = [8, 128], strides = [1, 1]} : vector<8x384xf32> to vector<8x128xf32>
    %339 = arith.mulf %337, %317 : vector<8x128xf32>
    %340 = arith.mulf %336, %335 : vector<8x128xf32>
    %341 = arith.addf %339, %340 : vector<8x128xf32>
    %342 = math.tanh %341 : vector<8x128xf32>
    %343 = arith.mulf %338, %342 : vector<8x128xf32>
    %344 = arith.truncf %343 : vector<8x128xf32> to vector<8x128xbf16>
    %c5_i32_109 = arith.constant 5 : i32
    %c8_i32_110 = arith.constant 8 : i32
    %345 = arith.muli %c5_i32_109, %c8_i32_110 : i32
    %346 = tpu.assume_multiple %345, 8 : i32
    %347 = arith.index_cast %346 : i32 to index
    %c0_111 = arith.constant 0 : index
    %348 = vector.load %arg12[%347, %c0_111] : memref<64x512xf32, #tpu.memory_space<vmem>>, vector<8x512xf32>
    %c0_112 = arith.constant 0 : index
    %c0_113 = arith.constant 0 : index
    %349 = vector.load %arg5[%c0_112, %c0_113] : memref<128x512xbf16, #tpu.memory_space<vmem>>, vector<128x512xbf16>
    %cst_114 = arith.constant dense<0.000000e+00> : vector<8x512xf32>
    %350 = tpu.matmul %344, %349, %cst_114 {dimension_numbers = #tpu.dot_dimension_numbers<[1], [0], [0], [1], [0, 0, 1, 1], [], []>} : vector<8x128xbf16>, vector<128x512xbf16>, vector<8x512xf32> -> vector<8x512xf32>
    %351 = arith.addf %348, %350 : vector<8x512xf32>
    %352 = vector.extract_strided_slice %351 {offsets = [0, 0], sizes = [8, 384], strides = [1, 1]} : vector<8x512xf32> to vector<8x384xf32>
    %353 = arith.negf %352 : vector<8x384xf32>
    %354 = math.exp %353 : vector<8x384xf32>
    %cst_115 = arith.constant 1.000000e+00 : f32
    %355 = vector.broadcast %cst_115 : f32 to vector<8x384xf32>
    %356 = arith.addf %355, %354 : vector<8x384xf32>
    %357 = arith.divf %355, %356 : vector<8x384xf32>
    %358 = vector.extract_strided_slice %351 {offsets = [0, 384], sizes = [8, 128], strides = [1, 1]} : vector<8x512xf32> to vector<8x128xf32>
    %359 = math.tanh %358 : vector<8x128xf32>
    %360 = vector.extract_strided_slice %357 {offsets = [0, 0], sizes = [8, 128], strides = [1, 1]} : vector<8x384xf32> to vector<8x128xf32>
    %361 = vector.extract_strided_slice %357 {offsets = [0, 128], sizes = [8, 128], strides = [1, 1]} : vector<8x384xf32> to vector<8x128xf32>
    %362 = vector.extract_strided_slice %357 {offsets = [0, 256], sizes = [8, 128], strides = [1, 1]} : vector<8x384xf32> to vector<8x128xf32>
    %363 = arith.mulf %361, %341 : vector<8x128xf32>
    %364 = arith.mulf %360, %359 : vector<8x128xf32>
    %365 = arith.addf %363, %364 : vector<8x128xf32>
    %366 = math.tanh %365 : vector<8x128xf32>
    %367 = arith.mulf %362, %366 : vector<8x128xf32>
    %368 = arith.truncf %367 : vector<8x128xf32> to vector<8x128xbf16>
    %c6_i32_116 = arith.constant 6 : i32
    %c8_i32_117 = arith.constant 8 : i32
    %369 = arith.muli %c6_i32_116, %c8_i32_117 : i32
    %370 = tpu.assume_multiple %369, 8 : i32
    %371 = arith.index_cast %370 : i32 to index
    %c0_118 = arith.constant 0 : index
    %372 = vector.load %arg12[%371, %c0_118] : memref<64x512xf32, #tpu.memory_space<vmem>>, vector<8x512xf32>
    %c0_119 = arith.constant 0 : index
    %c0_120 = arith.constant 0 : index
    %373 = vector.load %arg5[%c0_119, %c0_120] : memref<128x512xbf16, #tpu.memory_space<vmem>>, vector<128x512xbf16>
    %cst_121 = arith.constant dense<0.000000e+00> : vector<8x512xf32>
    %374 = tpu.matmul %368, %373, %cst_121 {dimension_numbers = #tpu.dot_dimension_numbers<[1], [0], [0], [1], [0, 0, 1, 1], [], []>} : vector<8x128xbf16>, vector<128x512xbf16>, vector<8x512xf32> -> vector<8x512xf32>
    %375 = arith.addf %372, %374 : vector<8x512xf32>
    %376 = vector.extract_strided_slice %375 {offsets = [0, 0], sizes = [8, 384], strides = [1, 1]} : vector<8x512xf32> to vector<8x384xf32>
    %377 = arith.negf %376 : vector<8x384xf32>
    %378 = math.exp %377 : vector<8x384xf32>
    %cst_122 = arith.constant 1.000000e+00 : f32
    %379 = vector.broadcast %cst_122 : f32 to vector<8x384xf32>
    %380 = arith.addf %379, %378 : vector<8x384xf32>
    %381 = arith.divf %379, %380 : vector<8x384xf32>
    %382 = vector.extract_strided_slice %375 {offsets = [0, 384], sizes = [8, 128], strides = [1, 1]} : vector<8x512xf32> to vector<8x128xf32>
    %383 = math.tanh %382 : vector<8x128xf32>
    %384 = vector.extract_strided_slice %381 {offsets = [0, 0], sizes = [8, 128], strides = [1, 1]} : vector<8x384xf32> to vector<8x128xf32>
    %385 = vector.extract_strided_slice %381 {offsets = [0, 128], sizes = [8, 128], strides = [1, 1]} : vector<8x384xf32> to vector<8x128xf32>
    %386 = vector.extract_strided_slice %381 {offsets = [0, 256], sizes = [8, 128], strides = [1, 1]} : vector<8x384xf32> to vector<8x128xf32>
    %387 = arith.mulf %385, %365 : vector<8x128xf32>
    %388 = arith.mulf %384, %383 : vector<8x128xf32>
    %389 = arith.addf %387, %388 : vector<8x128xf32>
    %390 = math.tanh %389 : vector<8x128xf32>
    %391 = arith.mulf %386, %390 : vector<8x128xf32>
    %392 = arith.truncf %391 : vector<8x128xf32> to vector<8x128xbf16>
    %c7_i32_123 = arith.constant 7 : i32
    %c8_i32_124 = arith.constant 8 : i32
    %393 = arith.muli %c7_i32_123, %c8_i32_124 : i32
    %394 = tpu.assume_multiple %393, 8 : i32
    %395 = arith.index_cast %394 : i32 to index
    %c0_125 = arith.constant 0 : index
    %396 = vector.load %arg12[%395, %c0_125] : memref<64x512xf32, #tpu.memory_space<vmem>>, vector<8x512xf32>
    %c0_126 = arith.constant 0 : index
    %c0_127 = arith.constant 0 : index
    %397 = vector.load %arg5[%c0_126, %c0_127] : memref<128x512xbf16, #tpu.memory_space<vmem>>, vector<128x512xbf16>
    %cst_128 = arith.constant dense<0.000000e+00> : vector<8x512xf32>
    %398 = tpu.matmul %392, %397, %cst_128 {dimension_numbers = #tpu.dot_dimension_numbers<[1], [0], [0], [1], [0, 0, 1, 1], [], []>} : vector<8x128xbf16>, vector<128x512xbf16>, vector<8x512xf32> -> vector<8x512xf32>
    %399 = arith.addf %396, %398 : vector<8x512xf32>
    %400 = vector.extract_strided_slice %399 {offsets = [0, 0], sizes = [8, 384], strides = [1, 1]} : vector<8x512xf32> to vector<8x384xf32>
    %401 = arith.negf %400 : vector<8x384xf32>
    %402 = math.exp %401 : vector<8x384xf32>
    %cst_129 = arith.constant 1.000000e+00 : f32
    %403 = vector.broadcast %cst_129 : f32 to vector<8x384xf32>
    %404 = arith.addf %403, %402 : vector<8x384xf32>
    %405 = arith.divf %403, %404 : vector<8x384xf32>
    %406 = vector.extract_strided_slice %399 {offsets = [0, 384], sizes = [8, 128], strides = [1, 1]} : vector<8x512xf32> to vector<8x128xf32>
    %407 = math.tanh %406 : vector<8x128xf32>
    %408 = vector.extract_strided_slice %405 {offsets = [0, 0], sizes = [8, 128], strides = [1, 1]} : vector<8x384xf32> to vector<8x128xf32>
    %409 = vector.extract_strided_slice %405 {offsets = [0, 128], sizes = [8, 128], strides = [1, 1]} : vector<8x384xf32> to vector<8x128xf32>
    %410 = vector.extract_strided_slice %405 {offsets = [0, 256], sizes = [8, 128], strides = [1, 1]} : vector<8x384xf32> to vector<8x128xf32>
    %411 = arith.mulf %409, %389 : vector<8x128xf32>
    %412 = arith.mulf %408, %407 : vector<8x128xf32>
    %413 = arith.addf %411, %412 : vector<8x128xf32>
    %414 = math.tanh %413 : vector<8x128xf32>
    %415 = arith.mulf %410, %414 : vector<8x128xf32>
    %416 = arith.truncf %415 : vector<8x128xf32> to vector<8x128xbf16>
    %c8_i32_130 = arith.constant 8 : i32
    %c0_131 = arith.constant 0 : index
    %c0_132 = arith.constant 0 : index
    %417 = vector.load %arg7[%c0_131, %c0_132] : memref<128x2xbf16, #tpu.memory_space<vmem>>, vector<128x2xbf16>
    %cst_133 = arith.constant dense<0.000000e+00> : vector<8x2xf32>
    %418 = tpu.matmul %416, %417, %cst_133 {dimension_numbers = #tpu.dot_dimension_numbers<[1], [0], [0], [1], [0, 0, 1, 1], [], []>} : vector<8x128xbf16>, vector<128x2xbf16>, vector<8x2xf32> -> vector<8x2xf32>
    %c0_134 = arith.constant 0 : index
    %c0_135 = arith.constant 0 : index
    %419 = vector.load %arg8[%c0_134, %c0_135] : memref<1x2xf32, #tpu.memory_space<vmem>>, vector<1x2xf32>
    %420 = vector.broadcast %419 : vector<1x2xf32> to vector<8x2xf32>
    %421 = arith.addf %418, %420 : vector<8x2xf32>
    %c0_136 = arith.constant 0 : index
    %c0_137 = arith.constant 0 : index
    %422 = vector.load %arg9[%c0_136, %c0_137] : memref<8x2xf32, #tpu.memory_space<vmem>>, vector<8x2xf32>
    tpu.vector_store %arg9[%c0_136, %c0_137], %421 {strides = array<i32>} : memref<8x2xf32, #tpu.memory_space<vmem>>, vector<8x2xf32>,
    return
  }
}

</mosaic_0001>

<bundles_post_ra>
// kernel: tpu_custom_call.1
= control target key start
LH: loop header
LB: loop body
LE: loop exit
PB: predicated region body
PF: predicated region fallthrough
CT: control target
= control target key end

     0   :  { %14 = vsyncpa [#allocation6], 0  ;;  %s7829_s0 = inlined_call_operand.vmem [shape: bf16[64,128], index: 0, kind: input, shape index: {}]   ;;  %s7830_s1 = inlined_call_operand.hbm [shape: bf16[128,512], index: 1, kind: input, shape index: {}]   ;;  %s7831_s2 = inlined_call_operand.hbm [shape: bf16[128,512], index: 2, kind: input, shape index: {}]   ;;  %s7832_s3 = inlined_call_operand.vmem [shape: f32[1,512], index: 3, kind: input, shape index: {}]   ;;  %s7833_s4 = inlined_call_operand.hbm [shape: bf16[128,512], index: 4, kind: input, shape index: {}]   ;;  %s7834_s5 = inlined_call_operand.hbm [shape: bf16[128,512], index: 5, kind: input, shape index: {}]   ;;  %s7835_s6 = inlined_call_operand.vmem [shape: f32[1,512], index: 6, kind: input, shape index: {}]   ;;  %s7836_s7 = inlined_call_operand.vmem [shape: bf16[128,2], index: 7, kind: input, shape index: {}]   ;;  %s7837_s8 = inlined_call_operand.vmem [shape: f32[1,2], index: 8, kind: input, shape index: {}]   ;;  %s7838_s9 = inlined_call_operand.vmem [shape: f32[8,2], index: 9, kind: output, shape index: {}]  }
   0x1   :  { %15 = vsyncpa [#allocation8], 0 }
   0x2   :  { %16 = vsyncpa [#allocation11], 0  ;;  %s36_s11 = sshll.u32 %s7831_s2, 4  ;;  %s6944_s12 = smov [#allocation7]   ;;  %s37_s11 = int_to_ptr.hbm [resolvable:$true] %s36_s11 }
   0x3   :  { %s38_s13 = sshll.u32 %s6944_s12, 4  ;;  %s23_s16 = sshll.u32 %s7830_s1, 4  ;;  %s39_s13 = int_to_ptr.vmem [resolvable:$true] %s38_s13  ;;  %s24_s16 = int_to_ptr.hbm [resolvable:$true] %s23_s16 }
   0x4   :  { %s6945_s17 = smov 256   ;;  %s6946_s18 = smov 16  }
   0x5   :  { %44 = dma.hbm_to_vmem [thread:$0]  %s37_s11, 4096, %s39_s13, [#allocation8], %s6945_s17, %s6945_s17, %s6946_s18  }
   0x6   :  { %s6947_s19 = smov [#allocation5]   ;;  %s51_s23 = sshll.u32 %s7833_s4, 4  ;;  %s52_s23 = int_to_ptr.hbm [resolvable:$true] %s51_s23 }
   0x7   :  { %s25_s20 = sshll.u32 %s6947_s19, 4  ;;  %s64_s25 = sshll.u32 %s7834_s5, 4  ;;  %s26_s20 = int_to_ptr.vmem [resolvable:$true] %s25_s20  ;;  %s65_s25 = int_to_ptr.hbm [resolvable:$true] %s64_s25 }
   0x8   :  { %31 = dma.hbm_to_vmem [thread:$0]  %s24_s16, 4096, %s26_s20, [#allocation6], %s6945_s17, %s6945_s17, %s6946_s18  }
   0x9   :  { %s6948_s26 = smov [#allocation9]   ;;  %s6949_s1 = smov [#allocation10]  }
   0xa   :  { %s53_s27 = sshll.u32 %s6948_s26, 4  ;;  %s66_s28 = sshll.u32 %s6949_s1, 4  ;;  %s54_s27 = int_to_ptr.vmem [resolvable:$true] %s53_s27  ;;  %s67_s28 = int_to_ptr.vmem [resolvable:$true] %s66_s28 }
   0xb   :  { %59 = dma.hbm_to_vmem [thread:$0]  %s52_s23, 4096, %s54_s27, [#allocation8], %s6945_s17, %s6945_s17, %s6946_s18  }
   0xc   :  { %72 = dma.hbm_to_vmem [thread:$0]  %s65_s25, 4096, %s67_s28, [#allocation11], %s6945_s17, %s6945_s17, %s6946_s18  }
   0xd   :  { %6938 = dma.done.wait [#allocation6], 4096  }
   0xe   :  { %6939 = vsyncadd [#allocation6], 4294963200 }
   0xf   :  { %6940 = dma.done.wait [#allocation8], 8192  }
  0x10   :  { %6941 = vsyncadd [#allocation8], 4294959104 }
  0x11   :  { %6942 = dma.done.wait [#allocation11], 4096  }
  0x12   :  { %6943 = vsyncadd [#allocation11], 4294963200  ;;  %v4840_v0 = vld [vmem:[#allocation5 + $0xe0] sm:$0xf]  ;;  %v6248_v1 = vld [vmem:[#allocation5 + $0xec] sm:$0xf0] }
  0x13   :  { %v6246_v2 = vld [vmem:[#allocation5 + $0xe4] sm:$0xf]  ;;  %v4841_v3 = vor.u32 %v6248_v1, %v4840_v0  ;;  %v4842_v4 = vld [vmem:[#allocation5 + $0xf0] sm:$0xf0]  ;;  %v4848_v5 = vld [vmem:[#allocation5 + $0xe8] sm:$0xf] }
  0x14   :  { %v6249_v6 = vld [vmem:[#allocation5 + $0xf4] sm:$0xf0]  ;;  %v4845_v7 = vor.u32 %v6246_v2, %v4842_v4  ;;  %v6247_v9 = vld [vmem:[#allocation5 + $0xec] sm:$0xf]  ;;  %v4850_v10 = vld [vmem:[#allocation5 + $0xf8] sm:$0xf0] }
  0x15   :  { %v4849_v8 = vor.u32 %v6249_v6, %v4848_v5  ;;  %v4824_v11 = vld [vmem:[#allocation5 + $0xc0] sm:$0xf]  ;;  %330 = vmatpush.bf16.msra.mxu0 %v4841_v3  ;;  %v4853_v12 = vor.u32 %v6247_v9, %v4850_v10  ;;  %v6244_v13 = vld [vmem:[#allocation5 + $0xcc] sm:$0xf0]  ;;  %v6242_v14 = vld [vmem:[#allocation5 + $0xc4] sm:$0xf] }
  0x16   :  { %v4826_v15 = vld [vmem:[#allocation5 + $0xd0] sm:$0xf0]  ;;  %359 = vmatpush.bf16.msra.mxu1 %v4845_v7  ;;  %v4825_v16 = vor.u32 %v6244_v13, %v4824_v11  ;;  %v4832_v18 = vld [vmem:[#allocation5 + $0xc8] sm:$0xf]  ;;  %v6245_v19 = vld [vmem:[#allocation5 + $0xd4] sm:$0xf0] }
  0x17   :  { %388 = vmatpush.bf16.msra.mxu2 %v4849_v8  ;;  %v4829_v17 = vor.u32 %v6242_v14, %v4826_v15  ;;  %v6243_v20 = vld [vmem:[#allocation5 + $0xcc] sm:$0xf]  ;;  %417 = vmatpush.bf16.msra.mxu3 %v4853_v12  ;;  %v4833_v21 = vor.u32 %v6245_v19, %v4832_v18  ;;  %v4834_v22 = vld [vmem:[#allocation5 + $0xd8] sm:$0xf0]  ;;  %v4808_v23 = vld [vmem:[#allocation5 + $0xa0] sm:$0xf] }
  0x18   :  { %v6240_v24 = vld [vmem:[#allocation5 + $0xac] sm:$0xf0]  ;;  %v4837_v25 = vor.u32 %v6243_v20, %v4834_v22  ;;  %v6238_v26 = vld [vmem:[#allocation5 + $0xa4] sm:$0xf]  ;;  %v4810_v27 = vld [vmem:[#allocation5 + $0xb0] sm:$0xf0] }
  0x19   :  { %v4816_v28 = vld [vmem:[#allocation5 + $0xa8] sm:$0xf]  ;;  %331 = vmatpush.bf16.msra.mxu0 %v4825_v16  ;;  %v4809_v29 = vor.u32 %v6240_v24, %v4808_v23  ;;  %v6241_v30 = vld [vmem:[#allocation5 + $0xb4] sm:$0xf0]  ;;  %v6239_v31 = vld [vmem:[#allocation5 + $0xac] sm:$0xf]  ;;  %v4813_v33 = vor.u32 %v6238_v26, %v4810_v27 }
  0x1a   :  { %v4818_v32 = vld [vmem:[#allocation5 + $0xb8] sm:$0xf0]  ;;  %360 = vmatpush.bf16.msra.mxu1 %v4829_v17  ;;  %v4817_v34 = vor.u32 %v6241_v30, %v4816_v28  ;;  %v4792_v35 = vld [vmem:[#allocation5 + $0x80] sm:$0xf]  ;;  %v6236_v36 = vld [vmem:[#allocation5 + $0x8c] sm:$0xf0] }
  0x1b   :  { %389 = vmatpush.bf16.msra.mxu2 %v4833_v21  ;;  %v6234_v37 = vld [vmem:[#allocation5 + $0x84] sm:$0xf]  ;;  %418 = vmatpush.bf16.msra.mxu3 %v4837_v25  ;;  %v4821_v38 = vor.u32 %v6239_v31, %v4818_v32  ;;  %v4794_v39 = vld [vmem:[#allocation5 + $0x90] sm:$0xf0]  ;;  %v4800_v40 = vld [vmem:[#allocation5 + $0x88] sm:$0xf]  ;;  %v4793_v44 = vor.u32 %v6236_v36, %v4792_v35 }
  0x1c   :  { %v6237_v41 = vld [vmem:[#allocation5 + $0x94] sm:$0xf0]  ;;  %v6235_v42 = vld [vmem:[#allocation5 + $0x8c] sm:$0xf]  ;;  %v4802_v43 = vld [vmem:[#allocation5 + $0x98] sm:$0xf0]  ;;  %v4797_v45 = vor.u32 %v6234_v37, %v4794_v39 }
  0x1d   :  { %332 = vmatpush.bf16.msra.mxu0 %v4809_v29  ;;  %v4801_v46 = vor.u32 %v6237_v41, %v4800_v40  ;;  %v4776_v47 = vld [vmem:[#allocation5 + $0x60] sm:$0xf]  ;;  %v6232_v48 = vld [vmem:[#allocation5 + $0x6c] sm:$0xf0]  ;;  %v6230_v49 = vld [vmem:[#allocation5 + $0x64] sm:$0xf]  ;;  %v4805_v50 = vor.u32 %v6235_v42, %v4802_v43 }
  0x1e   :  { %361 = vmatpush.bf16.msra.mxu1 %v4813_v33  ;;  %v4778_v51 = vld [vmem:[#allocation5 + $0x70] sm:$0xf0]  ;;  %v4784_v52 = vld [vmem:[#allocation5 + $0x68] sm:$0xf]  ;;  %v6233_v53 = vld [vmem:[#allocation5 + $0x74] sm:$0xf0]  ;;  %v4777_v56 = vor.u32 %v6232_v48, %v4776_v47 }
  0x1f   :  { %390 = vmatpush.bf16.msra.mxu2 %v4817_v34  ;;  %419 = vmatpush.bf16.msra.mxu3 %v4821_v38  ;;  %v6231_v54 = vld [vmem:[#allocation5 + $0x6c] sm:$0xf]  ;;  %v4786_v55 = vld [vmem:[#allocation5 + $0x78] sm:$0xf0]  ;;  %v4781_v57 = vor.u32 %v6230_v49, %v4778_v51  ;;  %v4785_v58 = vor.u32 %v6233_v53, %v4784_v52  ;;  %v4760_v59 = vld [vmem:[#allocation5 + $0x40] sm:$0xf] }
  0x20   :  { %v6228_v60 = vld [vmem:[#allocation5 + $0x4c] sm:$0xf0]  ;;  %v6226_v61 = vld [vmem:[#allocation5 + $0x44] sm:$0xf]  ;;  %v4789_v62 = vor.u32 %v6231_v54, %v4786_v55  ;;  %v4762_v63 = vld [vmem:[#allocation5 + $0x50] sm:$0xf0] }
  0x21   :  { %333 = vmatpush.bf16.msra.mxu0 %v4793_v44  ;;  %v4768_v0 = vld [vmem:[#allocation5 + $0x48] sm:$0xf]  ;;  %v6229_v1 = vld [vmem:[#allocation5 + $0x54] sm:$0xf0]  ;;  %v6227_v2 = vld [vmem:[#allocation5 + $0x4c] sm:$0xf]  ;;  %v4761_v4 = vor.u32 %v6228_v60, %v4760_v59  ;;  %v4765_v5 = vor.u32 %v6226_v61, %v4762_v63 }
  0x22   :  { %362 = vmatpush.bf16.msra.mxu1 %v4797_v45  ;;  %v4770_v3 = vld [vmem:[#allocation5 + $0x58] sm:$0xf0]  ;;  %v4769_v6 = vor.u32 %v6229_v1, %v4768_v0  ;;  %v4744_v7 = vld [vmem:[#allocation5 + $0x20] sm:$0xf]  ;;  %v6224_v8 = vld [vmem:[#allocation5 + $0x2c] sm:$0xf0] }
  0x23   :  { %391 = vmatpush.bf16.msra.mxu2 %v4801_v46  ;;  %420 = vmatpush.bf16.msra.mxu3 %v4805_v50  ;;  %v6222_v9 = vld [vmem:[#allocation5 + $0x24] sm:$0xf]  ;;  %v4773_v10 = vor.u32 %v6227_v2, %v4770_v3  ;;  %v4746_v11 = vld [vmem:[#allocation5 + $0x30] sm:$0xf0]  ;;  %v4752_v12 = vld [vmem:[#allocation5 + $0x28] sm:$0xf]  ;;  %v4745_v16 = vor.u32 %v6224_v8, %v4744_v7 }
  0x24   :  { %v6225_v13 = vld [vmem:[#allocation5 + $0x34] sm:$0xf0]  ;;  %v6223_v14 = vld [vmem:[#allocation5 + $0x2c] sm:$0xf]  ;;  %v4754_v15 = vld [vmem:[#allocation5 + $0x38] sm:$0xf0]  ;;  %v4749_v18 = vor.u32 %v6222_v9, %v4746_v11 }
  0x25   :  { %334 = vmatpush.bf16.msra.mxu0 %v4777_v56  ;;  %v4728_v17 = vld [vmem:[#allocation5] sm:$0xf]  ;;  %v4753_v19 = vor.u32 %v6225_v13, %v4752_v12  ;;  %v6220_v20 = vld [vmem:[#allocation5 + $0xc] sm:$0xf0]  ;;  %v6218_v21 = vld [vmem:[#allocation5 + $0x4] sm:$0xf]  ;;  %v4757_v23 = vor.u32 %v6223_v14, %v4754_v15 }
  0x26   :  { %363 = vmatpush.bf16.msra.mxu1 %v4781_v57  ;;  %v4730_v22 = vld [vmem:[#allocation5 + $0x10] sm:$0xf0]  ;;  %v4736_v24 = vld [vmem:[#allocation5 + $0x8] sm:$0xf]  ;;  %v6221_v25 = vld [vmem:[#allocation5 + $0x14] sm:$0xf0]  ;;  %v4729_v30 = vor.u32 %v6220_v20, %v4728_v17 }
  0x27   :  { %392 = vmatpush.bf16.msra.mxu2 %v4785_v58  ;;  %421 = vmatpush.bf16.msra.mxu3 %v4789_v62  ;;  %v6219_v26 = vld [vmem:[#allocation5 + $0xc] sm:$0xf]  ;;  %v4738_v27 = vld [vmem:[#allocation5 + $0x18] sm:$0xf0]  ;;  %v4968_v28 = vld [vmem:[#allocation7 + $0xe0] sm:$0xf]  ;;  %v4733_v33 = vor.u32 %v6218_v21, %v4730_v22  ;;  %v4737_v34 = vor.u32 %v6221_v25, %v4736_v24 }
  0x28   :  { %v6280_v29 = vld [vmem:[#allocation7 + $0xec] sm:$0xf0]  ;;  %v6278_v31 = vld [vmem:[#allocation7 + $0xe4] sm:$0xf]  ;;  %v4970_v32 = vld [vmem:[#allocation7 + $0xf0] sm:$0xf0]  ;;  %v4741_v36 = vor.u32 %v6219_v26, %v4738_v27 }
  0x29   :  { %335 = vmatpush.bf16.msra.mxu0 %v4761_v4  ;;  %v6214_v35 = vld [vmem:[%s7829_s0] sm:$0xff]  ;;  %v4969_v37 = vor.u32 %v6280_v29, %v4968_v28  ;;  %v4976_v38 = vld [vmem:[#allocation7 + $0xe8] sm:$0xf]  ;;  %v6281_v39 = vld [vmem:[#allocation7 + $0xf4] sm:$0xf0]  ;;  %v4973_v41 = vor.u32 %v6278_v31, %v4970_v32 }
  0x2a   :  { %364 = vmatpush.bf16.msra.mxu1 %v4765_v5  ;;  %v4952_v40 = vld [vmem:[#allocation7 + $0xc0] sm:$0xf]  ;;  %v6276_v42 = vld [vmem:[#allocation7 + $0xcc] sm:$0xf0]  ;;  %v6279_v43 = vld [vmem:[#allocation7 + $0xec] sm:$0xf]  ;;  %v4977_v47 = vor.u32 %v6281_v39, %v4976_v38 }
  0x2b   :  { %393 = vmatpush.bf16.msra.mxu2 %v4769_v6  ;;  %422 = vmatpush.bf16.msra.mxu3 %v4773_v10  ;;  %v4978_v44 = vld [vmem:[#allocation7 + $0xf8] sm:$0xf0]  ;;  %v6274_v45 = vld [vmem:[#allocation7 + $0xc4] sm:$0xf]  ;;  %v4954_v46 = vld [vmem:[#allocation7 + $0xd0] sm:$0xf0]  ;;  %v4953_v48 = vor.u32 %v6276_v42, %v4952_v40 }
  0x2c   :  { %v4960_v49 = vld [vmem:[#allocation7 + $0xc8] sm:$0xf]  ;;  %v6277_v50 = vld [vmem:[#allocation7 + $0xd4] sm:$0xf0]  ;;  %v4981_v51 = vor.u32 %v6279_v43, %v4978_v44  ;;  %v4936_v52 = vld [vmem:[#allocation7 + $0xa0] sm:$0xf]  ;;  %v4957_v53 = vor.u32 %v6274_v45, %v4954_v46 }
  0x2d   :  { %336 = vmatpush.bf16.msra.mxu0 %v4745_v16  ;;  %v6272_v54 = vld [vmem:[#allocation7 + $0xac] sm:$0xf0]  ;;  %v6275_v55 = vld [vmem:[#allocation7 + $0xcc] sm:$0xf]  ;;  %v4962_v56 = vld [vmem:[#allocation7 + $0xd8] sm:$0xf0]  ;;  %v4961_v59 = vor.u32 %v6277_v50, %v4960_v49 }
  0x2e   :  { %365 = vmatpush.bf16.msra.mxu1 %v4749_v18  ;;  %v6270_v57 = vld [vmem:[#allocation7 + $0xa4] sm:$0xf]  ;;  %v4938_v58 = vld [vmem:[#allocation7 + $0xb0] sm:$0xf0]  ;;  %v4937_v60 = vor.u32 %v6272_v54, %v4936_v52  ;;  %v4944_v61 = vld [vmem:[#allocation7 + $0xa8] sm:$0xf]  ;;  %v4965_v63 = vor.u32 %v6275_v55, %v4962_v56 }
  0x2f   :  { %394 = vmatpush.bf16.msra.mxu2 %v4753_v19  ;;  %423 = vmatpush.bf16.msra.mxu3 %v4757_v23  ;;  %v6273_v62 = vld [vmem:[#allocation7 + $0xb4] sm:$0xf0]  ;;  %v4920_v0 = vld [vmem:[#allocation7 + $0x80] sm:$0xf]  ;;  %v4941_v1 = vor.u32 %v6270_v57, %v4938_v58  ;;  %v6268_v2 = vld [vmem:[#allocation7 + $0x8c] sm:$0xf0] }
  0x30   :  { %v6271_v3 = vld [vmem:[#allocation7 + $0xac] sm:$0xf]  ;;  %v4946_v4 = vld [vmem:[#allocation7 + $0xb8] sm:$0xf0]  ;;  %v6266_v5 = vld [vmem:[#allocation7 + $0x84] sm:$0xf]  ;;  %v4945_v7 = vor.u32 %v6273_v62, %v4944_v61  ;;  %v4921_v8 = vor.u32 %v6268_v2, %v4920_v0 }
  0x31   :  { %337 = vmatpush.bf16.msra.mxu0 %v4729_v30  ;;  %v4922_v6 = vld [vmem:[#allocation7 + $0x90] sm:$0xf0]  ;;  %v4928_v9 = vld [vmem:[#allocation7 + $0x88] sm:$0xf]  ;;  %v6269_v10 = vld [vmem:[#allocation7 + $0x94] sm:$0xf0]  ;;  %v4949_v11 = vor.u32 %v6271_v3, %v4946_v4 }
  0x32   :  { %366 = vmatpush.bf16.msra.mxu1 %v4733_v33  ;;  %v4904_v12 = vld [vmem:[#allocation7 + $0x60] sm:$0xf]  ;;  %v4925_v13 = vor.u32 %v6266_v5, %v4922_v6  ;;  %v6264_v14 = vld [vmem:[#allocation7 + $0x6c] sm:$0xf0]  ;;  %v6267_v15 = vld [vmem:[#allocation7 + $0x8c] sm:$0xf]  ;;  %v4929_v20 = vor.u32 %v6269_v10, %v4928_v9 }
  0x33   :  { %395 = vmatpush.bf16.msra.mxu2 %v4737_v34  ;;  %424 = vmatpush.bf16.msra.mxu3 %v4741_v36  ;;  %v4930_v16 = vld [vmem:[#allocation7 + $0x98] sm:$0xf0]  ;;  %v6262_v17 = vld [vmem:[#allocation7 + $0x64] sm:$0xf]  ;;  %v4906_v18 = vld [vmem:[#allocation7 + $0x70] sm:$0xf0]  ;;  %v4905_v21 = vor.u32 %v6264_v14, %v4904_v12 }
  0x34   :  { %338 = vmatmul.bf16.vlgmr.msra.gmra.mxu0 %v6214_v35  ;;  %v6215_v19 = vld [vmem:[%s7829_s0 + $0x8] sm:$0xff]  ;;  %v6265_v23 = vld [vmem:[#allocation7 + $0x74] sm:$0xf0]  ;;  %v4933_v24 = vor.u32 %v6267_v15, %v4930_v16  ;;  %v4888_v25 = vld [vmem:[#allocation7 + $0x40] sm:$0xf]  ;;  %v4909_v26 = vor.u32 %v6262_v17, %v4906_v18  ;;  %v6950_v4 = vmov 0  }
  0x35   :  { %677 = vmatpush.bf16.msrb.mxu0 %v4969_v37  ;;  %367 = vmatmul.bf16.vlgmr.msra.gmra.mxu1 %v6214_v35  ;;  %v4912_v22 = vld [vmem:[#allocation7 + $0x68] sm:$0xf]  ;;  %v6260_v27 = vld [vmem:[#allocation7 + $0x4c] sm:$0xf0]  ;;  %v6263_v28 = vld [vmem:[#allocation7 + $0x6c] sm:$0xf] }
  0x36   :  { %690 = vmatpush.bf16.msrb.mxu1 %v4973_v41  ;;  %396 = vmatmul.bf16.vlgmr.msra.gmra.mxu2 %v6214_v35  ;;  %v4914_v29 = vld [vmem:[#allocation7 + $0x78] sm:$0xf0]  ;;  %v6258_v30 = vld [vmem:[#allocation7 + $0x44] sm:$0xf]  ;;  %v4890_v31 = vld [vmem:[#allocation7 + $0x50] sm:$0xf0]  ;;  %v4913_v32 = vor.u32 %v6265_v23, %v4912_v22  ;;  %v4889_v33 = vor.u32 %v6260_v27, %v4888_v25 }
  0x37   :  { %425 = vmatmul.bf16.vlgmr.msra.gmra.mxu3 %v6214_v35  ;;  %703 = vmatpush.bf16.msrb.mxu2 %v4977_v47  ;;  %v4896_v34 = vld [vmem:[#allocation7 + $0x48] sm:$0xf]  ;;  %v6261_v35 = vld [vmem:[#allocation7 + $0x54] sm:$0xf0]  ;;  %v4917_v36 = vor.u32 %v6263_v28, %v4914_v29  ;;  %v4893_v37 = vor.u32 %v6258_v30, %v4890_v31  ;;  %v4872_v39 = vld [vmem:[#allocation7 + $0x20] sm:$0xf] }
  0x38   :  { %716 = vmatpush.bf16.msrb.mxu3 %v4981_v51  ;;  %v4897_v38 = vor.u32 %v6261_v35, %v4896_v34  ;;  %v6256_v40 = vld [vmem:[#allocation7 + $0x2c] sm:$0xf0]  ;;  %v6254_v41 = vld [vmem:[#allocation7 + $0x24] sm:$0xf]  ;;  %v4874_v43 = vld [vmem:[#allocation7 + $0x30] sm:$0xf0] }
  0x39   :  { %678 = vmatpush.bf16.msrb.mxu0 %v4953_v48  ;;  %v4873_v42 = vor.u32 %v6256_v40, %v4872_v39  ;;  %v4880_v44 = vld [vmem:[#allocation7 + $0x28] sm:$0xf]  ;;  %v6257_v45 = vld [vmem:[#allocation7 + $0x34] sm:$0xf0]  ;;  %v4877_v46 = vor.u32 %v6254_v41, %v4874_v43  ;;  %v6259_v47 = vld [vmem:[#allocation7 + $0x4c] sm:$0xf] }
  0x3a   :  { %691 = vmatpush.bf16.msrb.mxu1 %v4957_v53  ;;  %v4898_v48 = vld [vmem:[#allocation7 + $0x58] sm:$0xf0]  ;;  %v4856_v49 = vld [vmem:[#allocation7] sm:$0xf]  ;;  %v6252_v51 = vld [vmem:[#allocation7 + $0xc] sm:$0xf0]  ;;  %v4881_v54 = vor.u32 %v6257_v45, %v4880_v44 }
  0x3b   :  { %704 = vmatpush.bf16.msrb.mxu2 %v4961_v59  ;;  %v4901_v50 = vor.u32 %v6259_v47, %v4898_v48  ;;  %v6250_v52 = vld [vmem:[#allocation7 + $0x4] sm:$0xf]  ;;  %v4858_v53 = vld [vmem:[#allocation7 + $0x10] sm:$0xf0]  ;;  %v6255_v55 = vld [vmem:[#allocation7 + $0x2c] sm:$0xf]  ;;  %v4857_v57 = vor.u32 %v6252_v51, %v4856_v49 }
  0x3c   :  { %717 = vmatpush.bf16.msrb.mxu3 %v4965_v63  ;;  %v4882_v56 = vld [vmem:[#allocation7 + $0x38] sm:$0xf0]  ;;  %v4864_v59 = vld [vmem:[#allocation7 + $0x8] sm:$0xf]  ;;  %v4861_v61 = vor.u32 %v6250_v52, %v4858_v53  ;;  %v6251_v62 = vld [vmem:[#allocation7 + $0xc] sm:$0xf] }
  0x3d   :  { %679 = vmatpush.bf16.msrb.mxu0 %v4937_v60  ;;  %v4885_v58 = vor.u32 %v6255_v55, %v4882_v56  ;;  %v6253_v60 = vld [vmem:[#allocation7 + $0x14] sm:$0xf0]  ;;  %v4866_v63 = vld [vmem:[#allocation7 + $0x18] sm:$0xf0]  ;;  %v6216_v2 = vld [vmem:[%s7829_s0 + $0x10] sm:$0xff] }
  0x3e   :  { %692 = vmatpush.bf16.msrb.mxu1 %v4941_v1  ;;  %v4865_v0 = vor.u32 %v6253_v60, %v4864_v59  ;;  %v4869_v1 = vor.u32 %v6251_v62, %v4866_v63  ;;  %v6217_v3 = vld [vmem:[%s7829_s0 + $0x18] sm:$0xff]  ;;  %v5099_v40 = vld [vmem:[#allocation7 + $0xe0] sm:$0xf]  ;;  %v6312_v41 = vld [vmem:[#allocation7 + $0xec] sm:$0xf0] }
  0x3f   :  { %705 = vmatpush.bf16.msrb.mxu2 %v4945_v7  ;;  %v5100_v44 = vor.u32 %v6312_v41, %v5099_v40  ;;  %v5101_v45 = vld [vmem:[#allocation7 + $0xf0] sm:$0xf0]  ;;  %v6313_v47 = vld [vmem:[#allocation7 + $0xf4] sm:$0xf0]  ;;  %v6311_v52 = vld [vmem:[#allocation7 + $0xec] sm:$0xf] }
  0x40   :  { %718 = vmatpush.bf16.msrb.mxu3 %v4949_v11  ;;  %v136_v11 = vld [vmem:[%s7832_s3] sm:$0xf]  ;;  %v5109_v53 = vld [vmem:[#allocation7 + $0xf8] sm:$0xf0]  ;;  %v6308_v59 = vld [vmem:[#allocation7 + $0xcc] sm:$0xf0] }
  0x41   :  { %680 = vmatpush.bf16.msrb.mxu0 %v4921_v8  ;;  %v7044_v12 = vperm.slane %v136_v11, 0  ;;  %v7048_v14 = vperm.slane %v136_v11, 1  ;;  %v5112_v56 = vor.u32 %v6311_v52, %v5109_v53  ;;  %v6306_v60 = vld [vmem:[#allocation7 + $0xc4] sm:$0xf]  ;;  %v5085_v62 = vld [vmem:[#allocation7 + $0xd0] sm:$0xf0] }
  0x42   :  { %693 = vmatpush.bf16.msrb.mxu1 %v4925_v13  ;;  %v5091_v63 = vld [vmem:[#allocation7 + $0xc8] sm:$0xf]  ;;  %v6305_v40 = vld [vmem:[#allocation7 + $0xb4] sm:$0xf0]  ;;  %v5051_v53 = vld [vmem:[#allocation7 + $0x80] sm:$0xf] }
  0x43   :  { %706 = vmatpush.bf16.msrb.mxu2 %v4929_v20  ;;  %v7058_v20 = vperm.slane %v136_v11, 2 }
  0x44   :  { %719 = vmatpush.bf16.msrb.mxu3 %v4933_v24  ;;  %343 = vmatmul.bf16.gmra.mxu0 %v6215_v19 }
  0x45   :  { %681 = vmatpush.bf16.msrb.mxu0 %v4905_v21  ;;  %372 = vmatmul.bf16.gmra.mxu1 %v6215_v19  ;;  %v7060_v21 = vperm.slane %v136_v11, 3  ;;  %v5093_v11 = vld [vmem:[#allocation7 + $0xd8] sm:$0xf0] }
  0x46   :  { %694 = vmatpush.bf16.msrb.mxu1 %v4909_v26  ;;  %401 = vmatmul.bf16.gmra.mxu2 %v6215_v19 }
  0x47   :  { %430 = vmatmul.bf16.gmra.mxu3 %v6215_v19  ;;  %707 = vmatpush.bf16.msrb.mxu2 %v4913_v32 }
  0x48   :  { %720 = vmatpush.bf16.msrb.mxu3 %v4917_v36 }
  0x49   :  { %682 = vmatpush.bf16.msrb.mxu0 %v4889_v33 }
  0x4a   :  { %695 = vmatpush.bf16.msrb.mxu1 %v4893_v37 }
  0x4b   :  { %708 = vmatpush.bf16.msrb.mxu2 %v4897_v38 }
  0x4c   :  { %721 = vmatpush.bf16.msrb.mxu3 %v4901_v50 }
  0x4d   :  { %683 = vmatpush.bf16.msrb.mxu0 %v4873_v42  ;;  %v6310_v42 = vld [vmem:[#allocation7 + $0xe4] sm:$0xf] }
  0x4e   :  { %696 = vmatpush.bf16.msrb.mxu1 %v4877_v46  ;;  %v5107_v46 = vld [vmem:[#allocation7 + $0xe8] sm:$0xf]  ;;  %v5104_v50 = vor.u32 %v6310_v42, %v5101_v45 }
  0x4f   :  { %709 = vmatpush.bf16.msrb.mxu2 %v4881_v54  ;;  %v5108_v51 = vor.u32 %v6313_v47, %v5107_v46  ;;  %v6303_v47 = vld [vmem:[#allocation7 + $0xac] sm:$0xf] }
  0x50   :  { %722 = vmatpush.bf16.msrb.mxu3 %v4885_v58  ;;  %v5083_v58 = vld [vmem:[#allocation7 + $0xc0] sm:$0xf] }
  0x51   :  { %684 = vmatpush.bf16.msrb.mxu0 %v4857_v57 }
  0x52   :  { %697 = vmatpush.bf16.msrb.mxu1 %v4861_v61  ;;  %v5084_v61 = vor.u32 %v6308_v59, %v5083_v58  ;;  %v5053_v59 = vld [vmem:[#allocation7 + $0x90] sm:$0xf0] }
  0x53   :  { %710 = vmatpush.bf16.msrb.mxu2 %v4865_v0  ;;  %v6309_v0 = vld [vmem:[#allocation7 + $0xd4] sm:$0xf0] }
  0x54   :  { %723 = vmatpush.bf16.msrb.mxu3 %v4869_v1  ;;  %348 = vmatmul.bf16.gmra.mxu0 %v6216_v2  ;;  %v5088_v1 = vor.u32 %v6306_v60, %v5085_v62  ;;  %v5059_v60 = vld [vmem:[#allocation7 + $0x88] sm:$0xf] }
  0x55   :  { %377 = vmatmul.bf16.gmra.mxu1 %v6216_v2  ;;  %997 = vmatpush.bf16.msra.mxu0 %v5100_v44 }
  0x56   :  { %406 = vmatmul.bf16.gmra.mxu2 %v6216_v2  ;;  %1010 = vmatpush.bf16.msra.mxu1 %v5104_v50 }
  0x57   :  { %435 = vmatmul.bf16.gmra.mxu3 %v6216_v2  ;;  %1023 = vmatpush.bf16.msra.mxu2 %v5108_v51  ;;  %v5092_v2 = vor.u32 %v6309_v0, %v5091_v63  ;;  %v6299_v0 = vld [vmem:[#allocation7 + $0x8c] sm:$0xf] }
  0x58   :  { %1036 = vmatpush.bf16.msra.mxu3 %v5112_v56  ;;  %v6298_v56 = vld [vmem:[#allocation7 + $0x84] sm:$0xf] }
  0x59   :  { %998 = vmatpush.bf16.msra.mxu0 %v5084_v61  ;;  %v6301_v61 = vld [vmem:[#allocation7 + $0x94] sm:$0xf0]  ;;  %v5056_v62 = vor.u32 %v6298_v56, %v5053_v59  ;;  %v5019_v56 = vld [vmem:[#allocation7 + $0x40] sm:$0xf]  ;;  %v6290_v59 = vld [vmem:[#allocation7 + $0x44] sm:$0xf] }
  0x5a   :  { %1011 = vmatpush.bf16.msra.mxu1 %v5088_v1  ;;  %v5060_v63 = vor.u32 %v6301_v61, %v5059_v60  ;;  %v5061_v1 = vld [vmem:[#allocation7 + $0x98] sm:$0xf0]  ;;  %v5021_v61 = vld [vmem:[#allocation7 + $0x50] sm:$0xf0] }
  0x5b   :  { %1024 = vmatpush.bf16.msra.mxu2 %v5092_v2  ;;  %v5064_v2 = vor.u32 %v6299_v0, %v5061_v1  ;;  %v5024_v0 = vor.u32 %v6290_v59, %v5021_v61  ;;  %v6293_v1 = vld [vmem:[#allocation7 + $0x54] sm:$0xf0]  ;;  %v6284_v59 = vld [vmem:[#allocation7 + $0xc] sm:$0xf0] }
  0x64   :  { %353 = vmatmul.bf16.gmra.mxu0 %v6217_v3 }
  0x65   :  { %382 = vmatmul.bf16.gmra.mxu1 %v6217_v3 }
  0x66   :  { %411 = vmatmul.bf16.gmra.mxu2 %v6217_v3 }
  0x67   :  { %440 = vmatmul.bf16.gmra.mxu3 %v6217_v3  ;;  %v6307_v3 = vld [vmem:[#allocation7 + $0xcc] sm:$0xf] }
  0x74   :  { %685 = vmatmul.bf16.vlgmr.msrb.gmra.mxu0 %v6950_v4 }
  0x75   :  { %698 = vmatmul.bf16.vlgmr.msrb.gmra.mxu1 %v6950_v4 }
  0x76   :  { %711 = vmatmul.bf16.vlgmr.msrb.gmra.mxu2 %v6950_v4 }
  0x77   :  { %724 = vmatmul.bf16.vlgmr.msrb.gmra.mxu3 %v6950_v4 }
  0xb1   :  { %v7029_v5 = vpop.f32.mrf.mxu0 }
  0xb2   :  { %v7031_v6 = vpop.f32.mrf.mxu1 }
  0xb9   :  { %v7033_v7 = vpop.f32.mrf.mxu2  ;;  %v7037_v9 = vpop.f32.mrf.mxu0 }
  0xba   :  { %v7035_v8 = vpop.f32.mrf.mxu3  ;;  %v7039_v10 = vpop.f32.mrf.mxu1 }
  0xc1   :  { %v7046_v13 = vpop.f32.mrf.mxu2  ;;  %v344_v16 = vpop.f32.mrf.mxu0 }
  0xc2   :  { %v7050_v15 = vpop.f32.mrf.mxu3  ;;  %v7053_v17 = vadd.f32 %v344_v16, %v7044_v12  ;;  %v373_v18 = vpop.f32.mrf.mxu1  ;;  %v5096_v16 = vor.u32 %v6307_v3, %v5093_v11  ;;  %v5035_v3 = vld [vmem:[#allocation7 + $0x60] sm:$0xf]  ;;  %v6296_v11 = vld [vmem:[#allocation7 + $0x6c] sm:$0xf0] }
  0xc3   :  { %v7056_v19 = vadd.f32 %v373_v18, %v7048_v14  ;;  %v5067_v18 = vld [vmem:[#allocation7 + $0xa0] sm:$0xf] }
  0xc4   :  { %1037 = vmatpush.bf16.msra.mxu3 %v5096_v16  ;;  %v6294_v16 = vld [vmem:[#allocation7 + $0x64] sm:$0xf] }
  0xc9   :  { %v402_v22 = vpop.f32.mrf.mxu2  ;;  %v7065_v25 = vpop.f32.mrf.mxu0 }
  0xca   :  { %v7063_v23 = vadd.f32 %v402_v22, %v7058_v20  ;;  %v431_v24 = vpop.f32.mrf.mxu3  ;;  %v7070_v27 = vpop.f32.mrf.mxu1  ;;  %v6304_v22 = vld [vmem:[#allocation7 + $0xac] sm:$0xf0] }
  0xcb   :  { %v7068_v26 = vadd.f32 %v431_v24, %v7060_v21  ;;  %v6302_v24 = vld [vmem:[#allocation7 + $0xa4] sm:$0xf] }
  0xd1   :  { %v7072_v28 = vpop.f32.mrf.mxu2  ;;  %v349_v30 = vpop.f32.mrf.mxu0 }
  0xd2   :  { %v7074_v29 = vpop.f32.mrf.mxu3  ;;  %v7077_v31 = vadd.f32 %v349_v30, %v7044_v12  ;;  %v378_v32 = vpop.f32.mrf.mxu1 }
  0xd3   :  { %v7080_v33 = vadd.f32 %v378_v32, %v7048_v14  ;;  %v5068_v32 = vor.u32 %v6304_v22, %v5067_v18  ;;  %v340_v18 = vadd.f32 %v7029_v5, %v7044_v12 }
  0xd5   :  { %999 = vmatpush.bf16.msra.mxu0 %v5068_v32  ;;  %v5043_v32 = vld [vmem:[#allocation7 + $0x68] sm:$0xf] }
  0xd9   :  { %v407_v34 = vpop.f32.mrf.mxu2  ;;  %v7085_v37 = vpop.f32.mrf.mxu0 }
  0xda   :  { %v7083_v35 = vadd.f32 %v407_v34, %v7058_v20  ;;  %v436_v36 = vpop.f32.mrf.mxu3  ;;  %v7090_v39 = vpop.f32.mrf.mxu1  ;;  %v5069_v34 = vld [vmem:[#allocation7 + $0xb0] sm:$0xf0] }
  0xdb   :  { %v7088_v38 = vadd.f32 %v436_v36, %v7060_v21  ;;  %v5075_v36 = vld [vmem:[#allocation7 + $0xa8] sm:$0xf]  ;;  %v5072_v45 = vor.u32 %v6302_v24, %v5069_v34  ;;  %v5036_v24 = vor.u32 %v6296_v11, %v5035_v3  ;;  %v6297_v34 = vld [vmem:[#allocation7 + $0x74] sm:$0xf0]  ;;  %v5029_v11 = vld [vmem:[#allocation7 + $0x58] sm:$0xf0] }
  0xdc   :  { %v5076_v46 = vor.u32 %v6305_v40, %v5075_v36  ;;  %v369_v36 = vadd.f32 %v7031_v6, %v7048_v14 }
  0xdd   :  { %1012 = vmatpush.bf16.msra.mxu1 %v5072_v45 }
  0xde   :  { %1025 = vmatpush.bf16.msra.mxu2 %v5076_v46  ;;  %v5044_v46 = vor.u32 %v6297_v34, %v5043_v32  ;;  %v6286_v34 = vld [vmem:[#allocation7 + $0x24] sm:$0xf] }
  0xe1   :  { %v7092_v43 = vpop.f32.mrf.mxu2  ;;  %v354_v49 = vpop.f32.mrf.mxu0  ;;  %1013 = vmatpush.bf16.msra.mxu1 %v5056_v62  ;;  %v5027_v62 = vld [vmem:[#allocation7 + $0x48] sm:$0xf] }
  0xe2   :  { %v7094_v48 = vpop.f32.mrf.mxu3  ;;  %v7097_v54 = vadd.f32 %v354_v49, %v7044_v12  ;;  %v383_v55 = vpop.f32.mrf.mxu1  ;;  %v5077_v49 = vld [vmem:[#allocation7 + $0xb8] sm:$0xf0]  ;;  %1026 = vmatpush.bf16.msra.mxu2 %v5060_v63  ;;  %v5028_v3 = vor.u32 %v6293_v1, %v5027_v62  ;;  %v4989_v62 = vld [vmem:[#allocation7 + $0x10] sm:$0xf0] }
  0xe3   :  { %v7100_v57 = vadd.f32 %v383_v55, %v7048_v14  ;;  %v5080_v52 = vor.u32 %v6303_v47, %v5077_v49  ;;  %v6300_v55 = vld [vmem:[#allocation7 + $0x8c] sm:$0xf0]  ;;  %v6295_v47 = vld [vmem:[#allocation7 + $0x6c] sm:$0xf]  ;;  %v5045_v49 = vld [vmem:[#allocation7 + $0x78] sm:$0xf0] }
  0xe4   :  { %v5052_v58 = vor.u32 %v6300_v55, %v5051_v53  ;;  %v5048_v5 = vor.u32 %v6295_v47, %v5045_v49  ;;  %v6289_v47 = vld [vmem:[#allocation7 + $0x34] sm:$0xf0]  ;;  %v6287_v49 = vld [vmem:[#allocation7 + $0x2c] sm:$0xf] }
  0xe5   :  { %1038 = vmatpush.bf16.msra.mxu3 %v5080_v52 }
  0xe6   :  { %1000 = vmatpush.bf16.msra.mxu0 %v5052_v58  ;;  %1027 = vmatpush.bf16.msra.mxu2 %v5044_v46  ;;  %v6292_v58 = vld [vmem:[#allocation7 + $0x4c] sm:$0xf0] }
  0xe7   :  { %v5020_v6 = vor.u32 %v6292_v58, %v5019_v56 }
  0xe9   :  { %v412_v30 = vpop.f32.mrf.mxu2  ;;  %v7105_v44 = vpop.f32.mrf.mxu0  ;;  %1039 = vmatpush.bf16.msra.mxu3 %v5064_v2  ;;  %v6291_v2 = vld [vmem:[#allocation7 + $0x4c] sm:$0xf] }
  0xea   :  { %v7103_v41 = vadd.f32 %v412_v30, %v7058_v20  ;;  %v441_v42 = vpop.f32.mrf.mxu3  ;;  %v7110_v51 = vpop.f32.mrf.mxu1  ;;  %v5037_v30 = vld [vmem:[#allocation7 + $0x70] sm:$0xf0]  ;;  %1001 = vmatpush.bf16.msra.mxu0 %v5036_v24  ;;  %v398_v24 = vadd.f32 %v7033_v7, %v7058_v20  ;;  %1028 = vmatpush.bf16.msra.mxu2 %v5028_v3  ;;  %v4987_v7 = vld [vmem:[#allocation7] sm:$0xf]  ;;  %v6283_v3 = vld [vmem:[#allocation7 + $0xc] sm:$0xf] }
  0xeb   :  { %v7108_v50 = vadd.f32 %v441_v42, %v7060_v21  ;;  %v5040_v45 = vor.u32 %v6294_v16, %v5037_v30  ;;  %v5003_v16 = vld [vmem:[#allocation7 + $0x20] sm:$0xf]  ;;  %v5032_v30 = vor.u32 %v6291_v2, %v5029_v11  ;;  %v4988_v61 = vor.u32 %v6284_v59, %v4987_v7  ;;  %v4997_v11 = vld [vmem:[#allocation7 + $0x18] sm:$0xf0] }
  0xed   :  { %1014 = vmatpush.bf16.msra.mxu1 %v5040_v45  ;;  %1040 = vmatpush.bf16.msra.mxu3 %v5048_v5 }
  0xee   :  { %1002 = vmatpush.bf16.msra.mxu0 %v5020_v6 }
  0xf1   :  { %v7114_v22 = vpop.f32.mrf.mxu2  ;;  %v686_v42 = vpop.f32.mrf.mxu0  ;;  %1015 = vmatpush.bf16.msra.mxu1 %v5024_v0  ;;  %1041 = vmatpush.bf16.msra.mxu3 %v5032_v30  ;;  %v6285_v0 = vld [vmem:[#allocation7 + $0x14] sm:$0xf0] }
  0xf2   :  { %v7118_v40 = vpop.f32.mrf.mxu3  ;;  %v729_v52 = vadd.f32 %v686_v42, %v340_v18  ;;  %v699_v53 = vpop.f32.mrf.mxu1  ;;  %v6288_v18 = vld [vmem:[#allocation7 + $0x2c] sm:$0xf0]  ;;  %v5011_v42 = vld [vmem:[#allocation7 + $0x28] sm:$0xf] }
  0xf3   :  { %v730_v55 = vadd.f32 %v699_v53, %v369_v36  ;;  %v5004_v32 = vor.u32 %v6288_v18, %v5003_v16  ;;  %v5005_v36 = vld [vmem:[#allocation7 + $0x30] sm:$0xf0]  ;;  %v5012_v56 = vor.u32 %v6289_v47, %v5011_v42 }
  0xf4   :  { %v4982_v60 = vmul.f32 -1.442695, %v729_v52  ;;  %v5008_v46 = vor.u32 %v6286_v34, %v5005_v36  ;;  %v5013_v52 = vld [vmem:[#allocation7 + $0x38] sm:$0xf0]  ;;  %v5000_v34 = vor.u32 %v6283_v3, %v4997_v11 }
  0xf5   :  { %v4983_v63 = vmul.f32 -1.442695, %v730_v55  ;;  %v5016_v58 = vor.u32 %v6287_v49, %v5013_v52  ;;  %1003 = vmatpush.bf16.msra.mxu0 %v5004_v32  ;;  %1029 = vmatpush.bf16.msra.mxu2 %v5012_v56 }
  0xf6   :  { %6586 = vpow2.f32 %v4982_v60  ;;  %v6282_v60 = vld [vmem:[#allocation7 + $0x4] sm:$0xf]  ;;  %1016 = vmatpush.bf16.msra.mxu1 %v5008_v46  ;;  %v427_v46 = vadd.f32 %v7035_v8, %v7060_v21 }
  0xf7   :  { %6588 = vpow2.f32 %v4983_v63  ;;  %v4995_v63 = vld [vmem:[#allocation7 + $0x8] sm:$0xf]  ;;  %v4992_v2 = vor.u32 %v6282_v60, %v4989_v62  ;;  %1042 = vmatpush.bf16.msra.mxu3 %v5016_v58 }
  0xf8   :  { %v4996_v18 = vor.u32 %v6285_v0, %v4995_v63 }
  0xf9   :  { %v712_v45 = vpop.f32.mrf.mxu2  ;;  %v688_v55 = vpop.f32.mrf.mxu0  ;;  %1004 = vmatpush.bf16.msra.mxu0 %v4988_v61 }
  0xfa   :  { %v731_v53 = vadd.f32 %v712_v45, %v398_v24  ;;  %v725_v5 = vpop.f32.mrf.mxu3  ;;  %v701_v6 = vpop.f32.mrf.mxu1  ;;  %1017 = vmatpush.bf16.msra.mxu1 %v4992_v2  ;;  %1030 = vmatpush.bf16.msra.mxu2 %v4996_v18 }
  0xfb   :  { %1043 = vmatpush.bf16.msra.mxu3 %v5000_v34  ;;  %v732_v52 = vadd.f32 %v725_v5, %v427_v46 }
  0xfc   :  { %v4984_v1 = vmul.f32 -1.442695, %v731_v53  ;;  %v6587_v16 = vpop.eup %6586 }
  0xfd   :  { %v6589_v24 = vpop.eup %6588  ;;  %v742_v30 = vadd.f32 1.0, %v6587_v16 }
  0xfe   :  { %6590 = vpow2.f32 %v4984_v1  ;;  %v743_v36 = vadd.f32 1.0, %v6589_v24 }
  0xff   :  { %6592 = vrcp.f32 %v742_v30  ;;  %v756_v59 = vand.u32 2147483648, %v742_v30  ;;  %v754_v61 = vand.u32 2147483647, %v742_v30  ;;  %vm750_vm2 = vweird.f32 %v742_v30 }
 0x100   :  { %6594 = vrcp.f32 %v743_v36  ;;  %v771_v60 = vand.u32 2147483648, %v743_v36  ;;  %v769_v63 = vand.u32 2147483647, %v743_v36  ;;  %vm765_vm3 = vweird.f32 %v743_v36 }
 0x101   :  { %v714_v32 = vpop.f32.mrf.mxu2  ;;  %v757_v1 = vor.u32 1.1754944e-38, %v756_v59  ;;  %vm755_vm5 = vcmp.eq.f32.partialorder %v754_v61, 8.507059e+37  ;;  %v6342_v61 = vld [vmem:[#allocation7 + $0xe4] sm:$0xf] }
 0x102   :  { %v727_v42 = vpop.f32.mrf.mxu3  ;;  %v772_v3 = vor.u32 1.1754944e-38, %v771_v60  ;;  %vm770_vm7 = vcmp.eq.f32.partialorder %v769_v63, 8.507059e+37  ;;  %v5230_v60 = vld [vmem:[#allocation7 + $0xe0] sm:$0xf]  ;;  %v5238_v63 = vld [vmem:[#allocation7 + $0xe8] sm:$0xf] }
 0x104   :  { %v6591_v45 = vpop.eup %6590 }
 0x105   :  { %v744_v47 = vadd.f32 1.0, %v6591_v45  ;;  %v6593_v49 = vpop.eup %6592 }
 0x106   :  { %v6595_v53 = vpop.eup %6594  ;;  %v746_v55 = vmul.f32 %v6593_v49, %v742_v30  ;;  %vm751_vm0 = vweird.f32 %v6593_v49 }
 0x107   :  { %6596 = vrcp.f32 %v744_v47  ;;  %v761_v56 = vmul.f32 %v6595_v53, %v743_v36  ;;  %vm766_vm1 = vweird.f32 %v6595_v53  ;;  %vm752_vm4 = vmor %vm750_vm2, %vm751_vm0  ;;  %v786_v36 = vand.u32 2147483648, %v744_v47 }
 0x108   :  { %v747_v58 = vsub.f32 1.0, %v746_v55  ;;  %6598 = vtanh.f32 %v732_v52  ;;  %vm767_vm6 = vmor %vm765_vm3, %vm766_vm1  ;;  %vm780_vm9 = vweird.f32 %v744_v47 }
 0x109   :  { %v762_v7 = vsub.f32 1.0, %v761_v56  ;;  %v787_v56 = vor.u32 1.1754944e-38, %v786_v36  ;;  %v5224_v36 = vld [vmem:[#allocation7 + $0xd8] sm:$0xf0] }
 0x10a   :  { %v748_v6 = vmul.f32 %v6593_v49, %v747_v58 }
 0x10b   :  { %v763_v62 = vmul.f32 %v6595_v53, %v762_v7 }
 0x10c   :  { %v749_v8 = vadd.f32 %v6593_v49, %v748_v6  ;;  %v6344_v6 = vld [vmem:[#allocation7 + $0xec] sm:$0xf0] }
 0x10d   :  { %v6597_v0 = vpop.eup %6596  ;;  %v764_v2 = vadd.f32 %v6595_v53, %v763_v62  ;;  %v5231_v62 = vor.u32 %v6344_v6, %v5230_v60  ;;  %v5206_v60 = vld [vmem:[#allocation7 + $0xa8] sm:$0xf]  ;;  %v6337_v6 = vld [vmem:[#allocation7 + $0xb4] sm:$0xf0] }
 0x10e   :  { %v776_v5 = vmul.f32 %v6597_v0, %v744_v47  ;;  %v753_v11 = vsel %vm752_vm4, %v6593_v49, %v749_v8  ;;  %v6599_v16 = vpop.eup %6598  ;;  %vm781_vm8 = vweird.f32 %v6597_v0  ;;  %v784_v49 = vand.u32 2147483647, %v744_v47  ;;  %v5232_v47 = vld [vmem:[#allocation7 + $0xf0] sm:$0xf0] }
 0x10f   :  { %v758_v24 = vsel %vm755_vm5, %v757_v1, %v753_v11  ;;  %v768_v34 = vsel %vm767_vm6, %v6595_v53, %v764_v2  ;;  %vm782_vm10 = vmor %vm780_vm9, %vm781_vm8  ;;  %v5235_v8 = vor.u32 %v6342_v61, %v5232_v47  ;;  %v6343_v1 = vld [vmem:[#allocation7 + $0xec] sm:$0xf]  ;;  %v5240_v2 = vld [vmem:[#allocation7 + $0xf8] sm:$0xf0]  ;;  %1318 = vmatpush.bf16.msrb.mxu0 %v5231_v62  ;;  %v5207_v62 = vor.u32 %v6337_v6, %v5206_v60 }
 0x110   :  { %v777_v18 = vsub.f32 1.0, %v776_v5  ;;  %v773_v32 = vsel %vm770_vm7, %v772_v3, %v768_v34  ;;  %v792_v42 = vmul.f32 %v6599_v16, %v758_v24  ;;  %vm785_vm11 = vcmp.eq.f32.partialorder %v784_v49, 8.507059e+37  ;;  %v5214_v11 = vld [vmem:[#allocation7 + $0xc0] sm:$0xf]  ;;  %v6340_v16 = vld [vmem:[#allocation7 + $0xcc] sm:$0xf0] }
 0x111   :  { %v791_v46 = vmul.f32 0.0, %v773_v32  ;;  %v5243_v3 = vor.u32 %v6343_v1, %v5240_v2  ;;  %1331 = vmatpush.bf16.msrb.mxu1 %v5235_v8  ;;  %v5215_v24 = vor.u32 %v6340_v16, %v5214_v11  ;;  %v5216_v34 = vld [vmem:[#allocation7 + $0xd0] sm:$0xf0]  ;;  %v5222_v32 = vld [vmem:[#allocation7 + $0xc8] sm:$0xf] }
 0x112   :  { %v778_v45 = vmul.f32 %v6597_v0, %v777_v18  ;;  %v6338_v18 = vld [vmem:[#allocation7 + $0xc4] sm:$0xf]  ;;  %v6335_v47 = vld [vmem:[#allocation7 + $0xac] sm:$0xf]  ;;  %v5182_v8 = vld [vmem:[#allocation7 + $0x80] sm:$0xf] }
 0x113   :  { %v7124_v52 = vadd.f32 %v792_v42, %v791_v46  ;;  %1357 = vmatpush.bf16.msrb.mxu3 %v5243_v3  ;;  %v6341_v42 = vld [vmem:[#allocation7 + $0xd4] sm:$0xf0]  ;;  %1319 = vmatpush.bf16.msrb.mxu0 %v5215_v24  ;;  %v6330_v1 = vld [vmem:[#allocation7 + $0x84] sm:$0xf]  ;;  %v5184_v3 = vld [vmem:[#allocation7 + $0x90] sm:$0xf0] }
 0x114   :  { %v779_v30 = vadd.f32 %v6597_v0, %v778_v45  ;;  %v5219_v45 = vor.u32 %v6338_v18, %v5216_v34  ;;  %v5223_v46 = vor.u32 %v6341_v42, %v5222_v32  ;;  %v5190_v11 = vld [vmem:[#allocation7 + $0x88] sm:$0xf]  ;;  %v6333_v16 = vld [vmem:[#allocation7 + $0x94] sm:$0xf0]  ;;  %v5187_v18 = vor.u32 %v6330_v1, %v5184_v3  ;;  %v6331_v34 = vld [vmem:[#allocation7 + $0x8c] sm:$0xf] }
 0x115   :  { %6600 = vtanh.f32 %v7124_v52  ;;  %v5191_v24 = vor.u32 %v6333_v16, %v5190_v11  ;;  %v5192_v32 = vld [vmem:[#allocation7 + $0x98] sm:$0xf0]  ;;  %v6327_v6 = vld [vmem:[#allocation7 + $0x6c] sm:$0xf]  ;;  %v6324_v1 = vld [vmem:[#allocation7 + $0x4c] sm:$0xf0] }
 0x116   :  { %v783_v55 = vsel %vm782_vm10, %v6597_v0, %v779_v30  ;;  %v6345_v0 = vld [vmem:[#allocation7 + $0xf4] sm:$0xf0]  ;;  %v6339_v30 = vld [vmem:[#allocation7 + $0xcc] sm:$0xf]  ;;  %1332 = vmatpush.bf16.msrb.mxu1 %v5219_v45  ;;  %v5195_v42 = vor.u32 %v6331_v34, %v5192_v32  ;;  %v5166_v45 = vld [vmem:[#allocation7 + $0x60] sm:$0xf] }
 0x117   :  { %v788_v53 = vsel %vm785_vm11, %v787_v56, %v783_v55  ;;  %v5239_v5 = vor.u32 %v6345_v0, %v5238_v63  ;;  %v5227_v49 = vor.u32 %v6339_v30, %v5224_v36  ;;  %v5198_v55 = vld [vmem:[#allocation7 + $0xa0] sm:$0xf]  ;;  %v6336_v56 = vld [vmem:[#allocation7 + $0xac] sm:$0xf0]  ;;  %v5208_v63 = vld [vmem:[#allocation7 + $0xb8] sm:$0xf0] }
 0x118   :  { %v5211_v0 = vor.u32 %v6335_v47, %v5208_v63  ;;  %v6326_v30 = vld [vmem:[#allocation7 + $0x64] sm:$0xf]  ;;  %v5152_v3 = vld [vmem:[#allocation7 + $0x50] sm:$0xf0]  ;;  %v5158_v11 = vld [vmem:[#allocation7 + $0x48] sm:$0xf] }
 0x119   :  { %1344 = vmatpush.bf16.msrb.mxu2 %v5239_v5  ;;  %1358 = vmatpush.bf16.msrb.mxu3 %v5227_v49  ;;  %v6332_v5 = vld [vmem:[#allocation7 + $0x8c] sm:$0xf0]  ;;  %v5168_v49 = vld [vmem:[#allocation7 + $0x70] sm:$0xf0]  ;;  %v6323_v32 = vld [vmem:[#allocation7 + $0x4c] sm:$0xf] }
 0x11a   :  { %v5183_v2 = vor.u32 %v6332_v5, %v5182_v8  ;;  %v5150_v5 = vld [vmem:[#allocation7 + $0x40] sm:$0xf] }
 0x11b   :  { %v6601_v58 = vpop.eup %6600 }
 0x11c   :  { %v7127_v7 = vmul.f32 %v6601_v58, %v788_v53  ;;  %v6334_v58 = vld [vmem:[#allocation7 + $0xa4] sm:$0xf]  ;;  %v5199_v53 = vor.u32 %v6336_v56, %v5198_v55  ;;  %v5174_v55 = vld [vmem:[#allocation7 + $0x68] sm:$0xf]  ;;  %v6329_v56 = vld [vmem:[#allocation7 + $0x74] sm:$0xf0] }
 0x11d   :  { %1345 = vmatpush.bf16.msrb.mxu2 %v5223_v46  ;;  %1359 = vmatpush.bf16.msrb.mxu3 %v5211_v0  ;;  %v6328_v46 = vld [vmem:[#allocation7 + $0x6c] sm:$0xf0]  ;;  %v5175_v60 = vor.u32 %v6329_v56, %v5174_v55  ;;  %v5136_v55 = vld [vmem:[#allocation7 + $0x30] sm:$0xf0]  ;;  %v5142_v56 = vld [vmem:[#allocation7 + $0x28] sm:$0xf] }
 0x11e   :  { %v797_v59 = vpack.c.bf16 %v7127_v7, %v7127_v7  ;;  %1320 = vmatpush.bf16.msrb.mxu0 %v5199_v53  ;;  %v5167_v36 = vor.u32 %v6328_v46, %v5166_v45  ;;  %v371_v53 = vadd.f32 %v7039_v10, %v7048_v14  ;;  %v6325_v10 = vld [vmem:[#allocation7 + $0x54] sm:$0xf0]  ;;  %v5134_v45 = vld [vmem:[#allocation7 + $0x20] sm:$0xf]  ;;  %v6320_v46 = vld [vmem:[#allocation7 + $0x2c] sm:$0xf0] }
 0x11f   :  { %v5159_v34 = vor.u32 %v6325_v10, %v5158_v11  ;;  %v5120_v11 = vld [vmem:[#allocation7 + $0x10] sm:$0xf0]  ;;  %v6317_v10 = vld [vmem:[#allocation7 + $0x14] sm:$0xf0] }
 0x120   :  { %1005 = vmatmul.bf16.vlgmr.msra.gmra.mxu0 %v797_v59  ;;  %1018 = vmatmul.bf16.vlgmr.msra.gmra.mxu1 %v797_v59 }
 0x121   :  { %1031 = vmatmul.bf16.vlgmr.msra.gmra.mxu2 %v797_v59  ;;  %1044 = vmatmul.bf16.vlgmr.msra.gmra.mxu3 %v797_v59  ;;  %v5200_v59 = vld [vmem:[#allocation7 + $0xb0] sm:$0xf0] }
 0x122   :  { %v5203_v61 = vor.u32 %v6334_v58, %v5200_v59  ;;  %1346 = vmatpush.bf16.msrb.mxu2 %v5207_v62  ;;  %1321 = vmatpush.bf16.msrb.mxu0 %v5183_v2  ;;  %v342_v58 = vadd.f32 %v7037_v9, %v7044_v12  ;;  %v5171_v59 = vor.u32 %v6326_v30, %v5168_v49  ;;  %v6322_v2 = vld [vmem:[#allocation7 + $0x44] sm:$0xf] }
 0x123   :  { %1360 = vmatpush.bf16.msrb.mxu3 %v5195_v42  ;;  %v5151_v9 = vor.u32 %v6324_v1, %v5150_v5  ;;  %v5160_v42 = vld [vmem:[#allocation7 + $0x58] sm:$0xf0]  ;;  %v6318_v49 = vld [vmem:[#allocation7 + $0x24] sm:$0xf] }
 0x124   :  { %1333 = vmatpush.bf16.msrb.mxu1 %v5203_v61  ;;  %v5176_v61 = vld [vmem:[#allocation7 + $0x78] sm:$0xf0]  ;;  %v5163_v30 = vor.u32 %v6323_v32, %v5160_v42  ;;  %v6314_v5 = vld [vmem:[#allocation7 + $0x4] sm:$0xf] }
 0x125   :  { %v5179_v63 = vor.u32 %v6327_v6, %v5176_v61  ;;  %v5144_v6 = vld [vmem:[#allocation7 + $0x38] sm:$0xf0] }
 0x126   :  { %1347 = vmatpush.bf16.msrb.mxu2 %v5191_v24  ;;  %1322 = vmatpush.bf16.msrb.mxu0 %v5167_v36  ;;  %v5155_v24 = vor.u32 %v6322_v2, %v5152_v3  ;;  %v5135_v36 = vor.u32 %v6320_v46, %v5134_v45 }
 0x127   :  { %1361 = vmatpush.bf16.msrb.mxu3 %v5179_v63 }
 0x128   :  { %1334 = vmatpush.bf16.msrb.mxu1 %v5187_v18 }
 0x12a   :  { %1348 = vmatpush.bf16.msrb.mxu2 %v5175_v60  ;;  %1323 = vmatpush.bf16.msrb.mxu0 %v5151_v9  ;;  %v6319_v60 = vld [vmem:[#allocation7 + $0x2c] sm:$0xf] }
 0x12b   :  { %1362 = vmatpush.bf16.msrb.mxu3 %v5163_v30  ;;  %v5147_v63 = vor.u32 %v6319_v60, %v5144_v6 }
 0x12c   :  { %1335 = vmatpush.bf16.msrb.mxu1 %v5171_v59  ;;  %v6321_v59 = vld [vmem:[#allocation7 + $0x34] sm:$0xf0] }
 0x12e   :  { %1349 = vmatpush.bf16.msrb.mxu2 %v5159_v34  ;;  %1324 = vmatpush.bf16.msrb.mxu0 %v5135_v36  ;;  %v5128_v34 = vld [vmem:[#allocation7 + $0x18] sm:$0xf0] }
 0x12f   :  { %1363 = vmatpush.bf16.msrb.mxu3 %v5147_v63 }
 0x130   :  { %1336 = vmatpush.bf16.msrb.mxu1 %v5155_v24  ;;  %v6315_v24 = vld [vmem:[#allocation7 + $0xc] sm:$0xf] }
 0x131   :  { %v5131_v45 = vor.u32 %v6315_v24, %v5128_v34 }
 0x133   :  { %1364 = vmatpush.bf16.msrb.mxu3 %v5131_v45 }
 0x19d   :  { %v1006_v62 = vpop.f32.mrf.mxu0  ;;  %v1019_v47 = vpop.f32.mrf.mxu1 }
 0x19e   :  { %v1049_v0 = vadd.f32 %v1006_v62, %v342_v58  ;;  %v1050_v8 = vadd.f32 %v1019_v47, %v371_v53  ;;  %v400_v58 = vadd.f32 %v7046_v13, %v7058_v20  ;;  %v5139_v53 = vor.u32 %v6318_v49, %v5136_v55  ;;  %v5126_v13 = vld [vmem:[#allocation7 + $0x8] sm:$0xf] }
 0x19f   :  { %v5143_v47 = vor.u32 %v6321_v59, %v5142_v56 }
 0x1a0   :  { %v5113_v16 = vmul.f32 -1.442695, %v1049_v0  ;;  %v5114_v18 = vmul.f32 -1.442695, %v1050_v8  ;;  %v5118_v0 = vld [vmem:[#allocation7] sm:$0xf]  ;;  %1337 = vmatpush.bf16.msrb.mxu1 %v5139_v53 }
 0x1a1   :  { %v6316_v8 = vld [vmem:[#allocation7 + $0xc] sm:$0xf0]  ;;  %1350 = vmatpush.bf16.msrb.mxu2 %v5143_v47 }
 0x1a2   :  { %6602 = vpow2.f32 %v5113_v16  ;;  %v5119_v3 = vor.u32 %v6316_v8, %v5118_v0  ;;  %v5123_v16 = vor.u32 %v6314_v5, %v5120_v11 }
 0x1a3   :  { %6604 = vpow2.f32 %v5114_v18  ;;  %v5127_v18 = vor.u32 %v6317_v10, %v5126_v13 }
 0x1a4   :  { %v1032_v61 = vpop.f32.mrf.mxu2  ;;  %v1045_v62 = vpop.f32.mrf.mxu3  ;;  %1325 = vmatpush.bf16.msrb.mxu0 %v5119_v3  ;;  %1338 = vmatpush.bf16.msrb.mxu1 %v5123_v16 }
 0x1a5   :  { %v1051_v1 = vadd.f32 %v1032_v61, %v400_v58  ;;  %v1008_v2 = vpop.f32.mrf.mxu0  ;;  %v1021_v9 = vpop.f32.mrf.mxu1  ;;  %1351 = vmatpush.bf16.msrb.mxu2 %v5127_v18  ;;  %v429_v58 = vadd.f32 %v7050_v15, %v7060_v21 }
 0x1a7   :  { %v5115_v32 = vmul.f32 -1.442695, %v1051_v1  ;;  %v1052_v60 = vadd.f32 %v1045_v62, %v429_v58 }
 0x1a8   :  { %v6603_v42 = vpop.eup %6602 }
 0x1a9   :  { %v6605_v46 = vpop.eup %6604  ;;  %v1062_v30 = vadd.f32 1.0, %v6603_v42  ;;  %6606 = vpow2.f32 %v5115_v32 }
 0x1aa   :  { %v1063_v49 = vadd.f32 1.0, %v6605_v46 }
 0x1ab   :  { %6608 = vrcp.f32 %v1062_v30  ;;  %v1076_v8 = vand.u32 2147483648, %v1062_v30  ;;  %v1074_v2 = vand.u32 2147483647, %v1062_v30  ;;  %vm1070_vm14 = vweird.f32 %v1062_v30 }
 0x1ac   :  { %6610 = vrcp.f32 %v1063_v49  ;;  %v1034_v36 = vpop.f32.mrf.mxu2  ;;  %v1047_v55 = vpop.f32.mrf.mxu3  ;;  %v1091_v5 = vand.u32 2147483648, %v1063_v49  ;;  %v1089_v3 = vand.u32 2147483647, %v1063_v49  ;;  %vm1085_vm15 = vweird.f32 %v1063_v49 }
 0x1ad   :  { %v1077_v13 = vor.u32 1.1754944e-38, %v1076_v8  ;;  %vm1075_vm2 = vcmp.eq.f32.partialorder %v1074_v2, 8.507059e+37  ;;  %v6374_v8 = vld [vmem:[#allocation7 + $0xe4] sm:$0xf]  ;;  %v6377_v2 = vld [vmem:[#allocation7 + $0xf4] sm:$0xf0] }
 0x1ae   :  { %v1092_v16 = vor.u32 1.1754944e-38, %v1091_v5  ;;  %vm1090_vm3 = vcmp.eq.f32.partialorder %v1089_v3, 8.507059e+37 }
 0x1af   :  { %v6607_v56 = vpop.eup %6606 }
 0x1b0   :  { %v1064_v53 = vadd.f32 1.0, %v6607_v56 }
 0x1b1   :  { %v6609_v59 = vpop.eup %6608 }
 0x1b2   :  { %v6611_v6 = vpop.eup %6610  ;;  %v1066_v61 = vmul.f32 %v6609_v59, %v1062_v30  ;;  %6612 = vrcp.f32 %v1064_v53  ;;  %vm1071_vm12 = vweird.f32 %v6609_v59  ;;  %v1106_v56 = vand.u32 2147483648, %v1064_v53 }
 0x1b3   :  { %v1081_v47 = vmul.f32 %v6611_v6, %v1063_v49  ;;  %6614 = vtanh.f32 %v1052_v60  ;;  %vm1086_vm13 = vweird.f32 %v6611_v6  ;;  %vm1072_vm0 = vmor %vm1070_vm14, %vm1071_vm12  ;;  %vm1100_vm5 = vweird.f32 %v1064_v53 }
 0x1b4   :  { %v1067_v63 = vsub.f32 1.0, %v1066_v61  ;;  %vm1087_vm1 = vmor %vm1085_vm15, %vm1086_vm13  ;;  %v1104_v58 = vand.u32 2147483647, %v1064_v53  ;;  %v1107_v60 = vor.u32 1.1754944e-38, %v1106_v56  ;;  %v6368_v56 = vld [vmem:[#allocation7 + $0xac] sm:$0xf0] }
 0x1b5   :  { %v1082_v0 = vsub.f32 1.0, %v1081_v47 }
 0x1b6   :  { %v1068_v1 = vmul.f32 %v6609_v59, %v1067_v63  ;;  %vm1105_vm7 = vcmp.eq.f32.partialorder %v1104_v58, 8.507059e+37  ;;  %v5361_v63 = vld [vmem:[#allocation7 + $0xe0] sm:$0xf]  ;;  %v6366_v58 = vld [vmem:[#allocation7 + $0xa4] sm:$0xf] }
 0x1b7   :  { %v1083_v9 = vmul.f32 %v6611_v6, %v1082_v0  ;;  %v6376_v0 = vld [vmem:[#allocation7 + $0xec] sm:$0xf0] }
 0x1b8   :  { %v6613_v11 = vpop.eup %6612  ;;  %v1069_v15 = vadd.f32 %v6609_v59, %v1068_v1  ;;  %v5362_v5 = vor.u32 %v6376_v0, %v5361_v63  ;;  %v5369_v1 = vld [vmem:[#allocation7 + $0xe8] sm:$0xf]  ;;  %v6367_v0 = vld [vmem:[#allocation7 + $0xac] sm:$0xf] }
 0x1b9   :  { %v1096_v62 = vmul.f32 %v6613_v11, %v1064_v53  ;;  %v1084_v10 = vadd.f32 %v6611_v6, %v1083_v9  ;;  %v6615_v24 = vpop.eup %6614  ;;  %vm1101_vm4 = vweird.f32 %v6613_v11  ;;  %v5363_v53 = vld [vmem:[#allocation7 + $0xf0] sm:$0xf0]  ;;  %v5370_v3 = vor.u32 %v6377_v2, %v5369_v1  ;;  %v6364_v1 = vld [vmem:[#allocation7 + $0x8c] sm:$0xf0]  ;;  %v6362_v2 = vld [vmem:[#allocation7 + $0x84] sm:$0xf] }
 0x1ba   :  { %v1073_v18 = vsel %vm1072_vm0, %v6609_v59, %v1069_v15  ;;  %vm1102_vm6 = vmor %vm1100_vm5, %vm1101_vm4  ;;  %v5366_v9 = vor.u32 %v6374_v8, %v5363_v53  ;;  %v5371_v15 = vld [vmem:[#allocation7 + $0xf8] sm:$0xf0]  ;;  %1639 = vmatpush.bf16.msra.mxu0 %v5362_v5  ;;  %v5313_v53 = vld [vmem:[#allocation7 + $0x80] sm:$0xf] }
 0x1bb   :  { %v1097_v34 = vsub.f32 1.0, %v1096_v62  ;;  %v1078_v32 = vsel %vm1075_vm2, %v1077_v13, %v1073_v18  ;;  %v1088_v42 = vsel %vm1087_vm1, %v6611_v6, %v1084_v10  ;;  %1665 = vmatpush.bf16.msra.mxu2 %v5370_v3  ;;  %v5345_v13 = vld [vmem:[#allocation7 + $0xc0] sm:$0xf]  ;;  %v6372_v10 = vld [vmem:[#allocation7 + $0xcc] sm:$0xf0] }
 0x1bc   :  { %v1093_v45 = vsel %vm1090_vm3, %v1092_v16, %v1088_v42  ;;  %v1112_v46 = vmul.f32 %v6615_v24, %v1078_v32  ;;  %1652 = vmatpush.bf16.msra.mxu1 %v5366_v9  ;;  %v6370_v16 = vld [vmem:[#allocation7 + $0xc4] sm:$0xf]  ;;  %v5346_v18 = vor.u32 %v6372_v10, %v5345_v13  ;;  %v5347_v24 = vld [vmem:[#allocation7 + $0xd0] sm:$0xf0]  ;;  %v6373_v32 = vld [vmem:[#allocation7 + $0xd4] sm:$0xf0]  ;;  %v5314_v9 = vor.u32 %v6364_v1, %v5313_v53 }
 0x1bd   :  { %v1098_v36 = vmul.f32 %v6613_v11, %v1097_v34  ;;  %v1111_v55 = vmul.f32 %v1093_v45, %v7124_v52  ;;  %v5353_v34 = vld [vmem:[#allocation7 + $0xc8] sm:$0xf]  ;;  %v5350_v42 = vor.u32 %v6370_v16, %v5347_v24  ;;  %v5339_v8 = vld [vmem:[#allocation7 + $0xb8] sm:$0xf0]  ;;  %v5315_v3 = vld [vmem:[#allocation7 + $0x90] sm:$0xf0] }
 0x1be   :  { %v5354_v45 = vor.u32 %v6373_v32, %v5353_v34  ;;  %1640 = vmatpush.bf16.msra.mxu0 %v5346_v18  ;;  %v5342_v5 = vor.u32 %v6367_v0, %v5339_v8  ;;  %v6363_v10 = vld [vmem:[#allocation7 + $0x8c] sm:$0xf]  ;;  %v5323_v16 = vld [vmem:[#allocation7 + $0x98] sm:$0xf0]  ;;  %v5297_v24 = vld [vmem:[#allocation7 + $0x60] sm:$0xf] }
 0x1bf   :  { %v7140_v30 = vadd.f32 %v1112_v46, %v1111_v55  ;;  %v1099_v49 = vadd.f32 %v6613_v11, %v1098_v36  ;;  %v6371_v46 = vld [vmem:[#allocation7 + $0xcc] sm:$0xf]  ;;  %v5355_v36 = vld [vmem:[#allocation7 + $0xd8] sm:$0xf0]  ;;  %v5326_v18 = vor.u32 %v6363_v10, %v5323_v16  ;;  %v6360_v34 = vld [vmem:[#allocation7 + $0x6c] sm:$0xf0] }
 0x1c0   :  { %v5358_v55 = vor.u32 %v6371_v46, %v5355_v36  ;;  %1653 = vmatpush.bf16.msra.mxu1 %v5350_v42  ;;  %1666 = vmatpush.bf16.msra.mxu2 %v5354_v45  ;;  %v6358_v32 = vld [vmem:[#allocation7 + $0x64] sm:$0xf]  ;;  %v5298_v42 = vor.u32 %v6360_v34, %v5297_v24  ;;  %v5299_v45 = vld [vmem:[#allocation7 + $0x70] sm:$0xf0]  ;;  %v5305_v46 = vld [vmem:[#allocation7 + $0x68] sm:$0xf] }
 0x1c1   :  { %6616 = vtanh.f32 %v7140_v30  ;;  %v1103_v59 = vsel %vm1102_vm6, %v6613_v11, %v1099_v49  ;;  %v6375_v11 = vld [vmem:[#allocation7 + $0xec] sm:$0xf]  ;;  %v5329_v49 = vld [vmem:[#allocation7 + $0xa0] sm:$0xf]  ;;  %v6361_v36 = vld [vmem:[#allocation7 + $0x74] sm:$0xf0] }
 0x1c2   :  { %v1108_v61 = vsel %vm1105_vm7, %v1107_v60, %v1103_v59  ;;  %v5374_v62 = vor.u32 %v6375_v11, %v5371_v15  ;;  %v5330_v59 = vor.u32 %v6368_v56, %v5329_v49  ;;  %v5331_v60 = vld [vmem:[#allocation7 + $0xb0] sm:$0xf0]  ;;  %v5321_v11 = vld [vmem:[#allocation7 + $0x88] sm:$0xf]  ;;  %v6365_v15 = vld [vmem:[#allocation7 + $0x94] sm:$0xf0]  ;;  %v5306_v49 = vor.u32 %v6361_v36, %v5305_v46 }
 0x1c3   :  { %v5322_v13 = vor.u32 %v6365_v15, %v5321_v11  ;;  %v6359_v56 = vld [vmem:[#allocation7 + $0x6c] sm:$0xf]  ;;  %v6356_v0 = vld [vmem:[#allocation7 + $0x4c] sm:$0xf0]  ;;  %v6354_v8 = vld [vmem:[#allocation7 + $0x44] sm:$0xf] }
 0x1c4   :  { %1678 = vmatpush.bf16.msra.mxu3 %v5374_v62  ;;  %1641 = vmatpush.bf16.msra.mxu0 %v5330_v59  ;;  %v5318_v62 = vor.u32 %v6362_v2, %v5315_v3  ;;  %v5283_v53 = vld [vmem:[#allocation7 + $0x50] sm:$0xf0]  ;;  %v5289_v1 = vld [vmem:[#allocation7 + $0x48] sm:$0xf]  ;;  %v6357_v2 = vld [vmem:[#allocation7 + $0x54] sm:$0xf0] }
 0x1c5   :  { %v5286_v11 = vor.u32 %v6354_v8, %v5283_v53  ;;  %v5290_v15 = vor.u32 %v6357_v2, %v5289_v1  ;;  %v6352_v10 = vld [vmem:[#allocation7 + $0x2c] sm:$0xf0]  ;;  %v5267_v24 = vld [vmem:[#allocation7 + $0x30] sm:$0xf0]  ;;  %v5273_v34 = vld [vmem:[#allocation7 + $0x28] sm:$0xf] }
 0x1c6   :  { %v5275_v46 = vld [vmem:[#allocation7 + $0x38] sm:$0xf0]  ;;  %v5257_v8 = vld [vmem:[#allocation7 + $0x8] sm:$0xf]  ;;  %v6347_v2 = vld [vmem:[#allocation7 + $0xc] sm:$0xf] }
 0x1c7   :  { %v6617_v6 = vpop.eup %6616 }
 0x1c8   :  { %v7143_v47 = vmul.f32 %v6617_v6, %v1108_v61  ;;  %1679 = vmatpush.bf16.msra.mxu3 %v5358_v55  ;;  %v5337_v6 = vld [vmem:[#allocation7 + $0xa8] sm:$0xf]  ;;  %v6369_v61 = vld [vmem:[#allocation7 + $0xb4] sm:$0xf0]  ;;  %1642 = vmatpush.bf16.msra.mxu0 %v5314_v9  ;;  %v5302_v55 = vor.u32 %v6358_v32, %v5299_v45  ;;  %v6351_v45 = vld [vmem:[#allocation7 + $0x2c] sm:$0xf] }
 0x1c9   :  { %v5338_v63 = vor.u32 %v6369_v61, %v5337_v6 }
 0x1ca   :  { %v1118_v52 = vpack.c.bf16 %v7143_v47, %v7143_v47 }
 0x1cb   :  { %1667 = vmatpush.bf16.msra.mxu2 %v5338_v63  ;;  %v5281_v63 = vld [vmem:[#allocation7 + $0x40] sm:$0xf] }
 0x1cc   :  { %1326 = vmatmul.bf16.vlgmr.msrb.gmra.mxu0 %v1118_v52  ;;  %1339 = vmatmul.bf16.vlgmr.msrb.gmra.mxu1 %v1118_v52 }
 0x1cd   :  { %1352 = vmatmul.bf16.vlgmr.msrb.gmra.mxu2 %v1118_v52  ;;  %1365 = vmatmul.bf16.vlgmr.msrb.gmra.mxu3 %v1118_v52  ;;  %v5334_v52 = vor.u32 %v6366_v58, %v5331_v60  ;;  %v5307_v58 = vld [vmem:[#allocation7 + $0x78] sm:$0xf0] }
 0x1ce   :  { %1680 = vmatpush.bf16.msra.mxu3 %v5342_v5  ;;  %1643 = vmatpush.bf16.msra.mxu0 %v5298_v42  ;;  %v5310_v6 = vor.u32 %v6359_v56, %v5307_v58  ;;  %v5282_v5 = vor.u32 %v6356_v0, %v5281_v63  ;;  %v6353_v42 = vld [vmem:[#allocation7 + $0x34] sm:$0xf0]  ;;  %v5278_v56 = vor.u32 %v6351_v45, %v5275_v46  ;;  %v5249_v58 = vld [vmem:[#allocation7] sm:$0xf]  ;;  %v5251_v0 = vld [vmem:[#allocation7 + $0x10] sm:$0xf0] }
 0x1cf   :  { %1654 = vmatpush.bf16.msra.mxu1 %v5334_v52  ;;  %1668 = vmatpush.bf16.msra.mxu2 %v5322_v13  ;;  %v5291_v13 = vld [vmem:[#allocation7 + $0x58] sm:$0xf0] }
 0x1d2   :  { %1681 = vmatpush.bf16.msra.mxu3 %v5326_v18  ;;  %1644 = vmatpush.bf16.msra.mxu0 %v5282_v5  ;;  %v6350_v18 = vld [vmem:[#allocation7 + $0x24] sm:$0xf]  ;;  %v6349_v5 = vld [vmem:[#allocation7 + $0x14] sm:$0xf0] }
 0x1d3   :  { %1655 = vmatpush.bf16.msra.mxu1 %v5318_v62  ;;  %1669 = vmatpush.bf16.msra.mxu2 %v5306_v49  ;;  %v6355_v62 = vld [vmem:[#allocation7 + $0x4c] sm:$0xf]  ;;  %v5270_v32 = vor.u32 %v6350_v18, %v5267_v24  ;;  %v5274_v49 = vor.u32 %v6353_v42, %v5273_v34  ;;  %v5258_v1 = vor.u32 %v6349_v5, %v5257_v8 }
 0x1d6   :  { %1682 = vmatpush.bf16.msra.mxu3 %v5310_v6 }
 0x1d7   :  { %1656 = vmatpush.bf16.msra.mxu1 %v5302_v55  ;;  %1670 = vmatpush.bf16.msra.mxu2 %v5290_v15 }
 0x1db   :  { %1657 = vmatpush.bf16.msra.mxu1 %v5286_v11  ;;  %1671 = vmatpush.bf16.msra.mxu2 %v5274_v49 }
 0x1df   :  { %1658 = vmatpush.bf16.msra.mxu1 %v5270_v32  ;;  %1672 = vmatpush.bf16.msra.mxu2 %v5258_v1 }
 0x249   :  { %v1327_v59 = vpop.f32.mrf.mxu0  ;;  %v1340_v60 = vpop.f32.mrf.mxu1 }
 0x24a   :  { %v1370_v61 = vadd.f32 %v1327_v59, %v7053_v17  ;;  %v1371_v52 = vadd.f32 %v1340_v60, %v7056_v19  ;;  %v5265_v17 = vld [vmem:[#allocation7 + $0x20] sm:$0xf]  ;;  %v5294_v19 = vor.u32 %v6355_v62, %v5291_v13  ;;  %v6348_v59 = vld [vmem:[#allocation7 + $0xc] sm:$0xf0]  ;;  %v6346_v60 = vld [vmem:[#allocation7 + $0x4] sm:$0xf] }
 0x24b   :  { %v5266_v16 = vor.u32 %v6352_v10, %v5265_v17  ;;  %v5250_v63 = vor.u32 %v6348_v59, %v5249_v58  ;;  %v5254_v53 = vor.u32 %v6346_v60, %v5251_v0 }
 0x24c   :  { %v5244_v9 = vmul.f32 -1.442695, %v1370_v61  ;;  %v5245_v3 = vmul.f32 -1.442695, %v1371_v52  ;;  %1683 = vmatpush.bf16.msra.mxu3 %v5294_v19 }
 0x24d   :  { %1645 = vmatpush.bf16.msra.mxu0 %v5266_v16  ;;  %1659 = vmatpush.bf16.msra.mxu1 %v5254_v53 }
 0x24e   :  { %6618 = vpow2.f32 %v5244_v9  ;;  %v5259_v9 = vld [vmem:[#allocation7 + $0x18] sm:$0xf0] }
 0x24f   :  { %6620 = vpow2.f32 %v5245_v3  ;;  %v5262_v15 = vor.u32 %v6347_v2, %v5259_v9 }
 0x250   :  { %v1353_v36 = vpop.f32.mrf.mxu2  ;;  %v1366_v55 = vpop.f32.mrf.mxu3  ;;  %1684 = vmatpush.bf16.msra.mxu3 %v5278_v56 }
 0x251   :  { %v1372_v6 = vadd.f32 %v1353_v36, %v7063_v23  ;;  %v1329_v61 = vpop.f32.mrf.mxu0  ;;  %v1342_v52 = vpop.f32.mrf.mxu1  ;;  %1646 = vmatpush.bf16.msra.mxu0 %v5250_v63  ;;  %v1373_v24 = vadd.f32 %v1366_v55, %v7068_v26 }
 0x253   :  { %v5246_v3 = vmul.f32 -1.442695, %v1372_v6 }
 0x254   :  { %v6619_v11 = vpop.eup %6618  ;;  %1685 = vmatpush.bf16.msra.mxu3 %v5262_v15 }
 0x255   :  { %v6621_v62 = vpop.eup %6620  ;;  %v1383_v13 = vadd.f32 1.0, %v6619_v11  ;;  %6622 = vpow2.f32 %v5246_v3 }
 0x256   :  { %v1384_v23 = vadd.f32 1.0, %v6621_v62 }
 0x257   :  { %6624 = vrcp.f32 %v1383_v13  ;;  %v1397_v36 = vand.u32 2147483648, %v1383_v13  ;;  %v1395_v58 = vand.u32 2147483647, %v1383_v13  ;;  %vm1391_vm10 = vweird.f32 %v1383_v13 }
 0x258   :  { %6626 = vrcp.f32 %v1384_v23  ;;  %v1355_v17 = vpop.f32.mrf.mxu2  ;;  %v1368_v10 = vpop.f32.mrf.mxu3  ;;  %v1412_v49 = vand.u32 2147483648, %v1384_v23  ;;  %v1410_v60 = vand.u32 2147483647, %v1384_v23  ;;  %vm1406_vm11 = vweird.f32 %v1384_v23 }
 0x259   :  { %v1398_v55 = vor.u32 1.1754944e-38, %v1397_v36  ;;  %vm1396_vm14 = vcmp.eq.f32.partialorder %v1395_v58, 8.507059e+37  ;;  %v6409_v36 = vld [vmem:[#allocation7 + $0xf4] sm:$0xf0]  ;;  %v6407_v58 = vld [vmem:[#allocation7 + $0xec] sm:$0xf] }
 0x25a   :  { %v1413_v63 = vor.u32 1.1754944e-38, %v1412_v49  ;;  %vm1411_vm15 = vcmp.eq.f32.partialorder %v1410_v60, 8.507059e+37 }
 0x25b   :  { %v6623_v19 = vpop.eup %6622 }
 0x25c   :  { %v1385_v16 = vadd.f32 1.0, %v6623_v19 }
 0x25d   :  { %v6625_v18 = vpop.eup %6624 }
 0x25e   :  { %v6627_v34 = vpop.eup %6626  ;;  %v1387_v32 = vmul.f32 %v6625_v18, %v1383_v13  ;;  %6628 = vrcp.f32 %v1385_v16  ;;  %vm1392_vm8 = vweird.f32 %v6625_v18  ;;  %v1427_v13 = vand.u32 2147483648, %v1385_v16 }
 0x25f   :  { %v1402_v42 = vmul.f32 %v6627_v34, %v1384_v23  ;;  %6630 = vtanh.f32 %v1373_v24  ;;  %vm1407_vm9 = vweird.f32 %v6627_v34  ;;  %vm1393_vm12 = vmor %vm1391_vm10, %vm1392_vm8  ;;  %vm1421_vm1 = vweird.f32 %v1385_v16 }
 0x260   :  { %v1388_v45 = vsub.f32 1.0, %v1387_v32  ;;  %vm1408_vm13 = vmor %vm1406_vm11, %vm1407_vm9  ;;  %v1425_v23 = vand.u32 2147483647, %v1385_v16  ;;  %v1428_v10 = vor.u32 1.1754944e-38, %v1427_v13  ;;  %v6408_v32 = vld [vmem:[#allocation7 + $0xec] sm:$0xf0] }
 0x261   :  { %v1403_v46 = vsub.f32 1.0, %v1402_v42  ;;  %v6406_v42 = vld [vmem:[#allocation7 + $0xe4] sm:$0xf]  ;;  %v5462_v13 = vld [vmem:[#allocation7 + $0xb0] sm:$0xf0] }
 0x262   :  { %v1389_v56 = vmul.f32 %v6625_v18, %v1388_v45  ;;  %vm1426_vm3 = vcmp.eq.f32.partialorder %v1425_v23, 8.507059e+37  ;;  %v5468_v23 = vld [vmem:[#allocation7 + $0xa8] sm:$0xf] }
 0x263   :  { %v1404_v59 = vmul.f32 %v6627_v34, %v1403_v46  ;;  %v5500_v46 = vld [vmem:[#allocation7 + $0xe8] sm:$0xf] }
 0x264   :  { %v6629_v6 = vpop.eup %6628  ;;  %v1390_v61 = vadd.f32 %v6625_v18, %v1389_v56  ;;  %v5501_v56 = vor.u32 %v6409_v36, %v5500_v46  ;;  %v5446_v46 = vld [vmem:[#allocation7 + $0x90] sm:$0xf0]  ;;  %v5452_v36 = vld [vmem:[#allocation7 + $0x88] sm:$0xf] }
 0x265   :  { %v1417_v26 = vmul.f32 %v6629_v6, %v1385_v16  ;;  %v1405_v52 = vadd.f32 %v6627_v34, %v1404_v59  ;;  %v6631_v8 = vpop.eup %6630  ;;  %vm1422_vm0 = vweird.f32 %v6629_v6  ;;  %v5494_v16 = vld [vmem:[#allocation7 + $0xf0] sm:$0xf0]  ;;  %v5502_v59 = vld [vmem:[#allocation7 + $0xf8] sm:$0xf0] }
 0x266   :  { %v1394_v0 = vsel %vm1393_vm12, %v6625_v18, %v1390_v61  ;;  %vm1423_vm2 = vmor %vm1421_vm1, %vm1422_vm0  ;;  %v5497_v49 = vor.u32 %v6406_v42, %v5494_v16  ;;  %v5505_v60 = vor.u32 %v6407_v58, %v5502_v59  ;;  %1986 = vmatpush.bf16.msrb.mxu2 %v5501_v56  ;;  %v6404_v61 = vld [vmem:[#allocation7 + $0xcc] sm:$0xf0]  ;;  %v6395_v59 = vld [vmem:[#allocation7 + $0x8c] sm:$0xf] }
 0x267   :  { %v1418_v5 = vsub.f32 1.0, %v1417_v26  ;;  %v1399_v53 = vsel %vm1396_vm14, %v1398_v55, %v1394_v0  ;;  %v1409_v1 = vsel %vm1408_vm13, %v6627_v34, %v1405_v52  ;;  %v5492_v34 = vld [vmem:[#allocation7 + $0xe0] sm:$0xf]  ;;  %v6402_v26 = vld [vmem:[#allocation7 + $0xc4] sm:$0xf] }
 0x268   :  { %v1414_v2 = vsel %vm1411_vm15, %v1413_v63, %v1409_v1  ;;  %v1433_v9 = vmul.f32 %v6631_v8, %v1399_v53  ;;  %v5493_v45 = vor.u32 %v6408_v32, %v5492_v34  ;;  %1973 = vmatpush.bf16.msrb.mxu1 %v5497_v49  ;;  %1999 = vmatpush.bf16.msrb.mxu3 %v5505_v60  ;;  %v5478_v52 = vld [vmem:[#allocation7 + $0xd0] sm:$0xf0]  ;;  %v5484_v63 = vld [vmem:[#allocation7 + $0xc8] sm:$0xf]  ;;  %v6405_v0 = vld [vmem:[#allocation7 + $0xd4] sm:$0xf0] }
 0x269   :  { %v1419_v3 = vmul.f32 %v6629_v6, %v1418_v5  ;;  %v1432_v11 = vmul.f32 %v1414_v2, %v7140_v30  ;;  %v5481_v8 = vor.u32 %v6402_v26, %v5478_v52  ;;  %v5485_v5 = vor.u32 %v6405_v0, %v5484_v63  ;;  %v6403_v53 = vld [vmem:[#allocation7 + $0xcc] sm:$0xf]  ;;  %v5486_v1 = vld [vmem:[#allocation7 + $0xd8] sm:$0xf0]  ;;  %v5444_v32 = vld [vmem:[#allocation7 + $0x80] sm:$0xf] }
 0x26a   :  { %1960 = vmatpush.bf16.msrb.mxu0 %v5493_v45  ;;  %v5489_v2 = vor.u32 %v6403_v53, %v5486_v1  ;;  %v6396_v42 = vld [vmem:[#allocation7 + $0x8c] sm:$0xf0]  ;;  %v6394_v45 = vld [vmem:[#allocation7 + $0x84] sm:$0xf]  ;;  %v6397_v49 = vld [vmem:[#allocation7 + $0x94] sm:$0xf0]  ;;  %v376_v53 = vadd.f32 %v7070_v27, %v7048_v14 }
 0x26b   :  { %v7152_v15 = vadd.f32 %v1433_v9, %v1432_v11  ;;  %v1420_v62 = vadd.f32 %v6629_v6, %v1419_v3  ;;  %1987 = vmatpush.bf16.msrb.mxu2 %v5485_v5  ;;  %v5460_v9 = vld [vmem:[#allocation7 + $0xa0] sm:$0xf]  ;;  %v6400_v3 = vld [vmem:[#allocation7 + $0xac] sm:$0xf0]  ;;  %v6398_v11 = vld [vmem:[#allocation7 + $0xa4] sm:$0xf]  ;;  %v5445_v16 = vor.u32 %v6396_v42, %v5444_v32  ;;  %v5449_v56 = vor.u32 %v6394_v45, %v5446_v46 }
 0x26c   :  { %1974 = vmatpush.bf16.msrb.mxu1 %v5481_v8  ;;  %2000 = vmatpush.bf16.msrb.mxu3 %v5489_v2  ;;  %v5453_v58 = vor.u32 %v6397_v49, %v5452_v36  ;;  %v5454_v60 = vld [vmem:[#allocation7 + $0x98] sm:$0xf0]  ;;  %v6392_v26 = vld [vmem:[#allocation7 + $0x6c] sm:$0xf0]  ;;  %v5430_v63 = vld [vmem:[#allocation7 + $0x70] sm:$0xf0]  ;;  %v347_v5 = vadd.f32 %v7065_v25, %v7044_v12 }
 0x26d   :  { %6632 = vtanh.f32 %v7152_v15  ;;  %v1424_v17 = vsel %vm1423_vm2, %v6629_v6, %v1420_v62  ;;  %v5476_v6 = vld [vmem:[#allocation7 + $0xc0] sm:$0xf]  ;;  %v5461_v62 = vor.u32 %v6400_v3, %v5460_v9  ;;  %v5436_v0 = vld [vmem:[#allocation7 + $0x68] sm:$0xf]  ;;  %v6393_v8 = vld [vmem:[#allocation7 + $0x74] sm:$0xf0] }
 0x26e   :  { %v1429_v18 = vsel %vm1426_vm3, %v1428_v10, %v1424_v17  ;;  %v5477_v55 = vor.u32 %v6404_v61, %v5476_v6  ;;  %v6401_v17 = vld [vmem:[#allocation7 + $0xb4] sm:$0xf0]  ;;  %v5465_v10 = vor.u32 %v6398_v11, %v5462_v13  ;;  %v5457_v6 = vor.u32 %v6395_v59, %v5454_v60  ;;  %v5428_v61 = vld [vmem:[#allocation7 + $0x60] sm:$0xf]  ;;  %v6391_v9 = vld [vmem:[#allocation7 + $0x6c] sm:$0xf] }
 0x26f   :  { %v5429_v52 = vor.u32 %v6392_v26, %v5428_v61  ;;  %v5437_v2 = vor.u32 %v6393_v8, %v5436_v0  ;;  %v5438_v3 = vld [vmem:[#allocation7 + $0x78] sm:$0xf0]  ;;  %v6389_v27 = vld [vmem:[#allocation7 + $0x54] sm:$0xf0]  ;;  %v6387_v46 = vld [vmem:[#allocation7 + $0x4c] sm:$0xf]  ;;  %v405_v26 = vadd.f32 %v7072_v28, %v7058_v20 }
 0x270   :  { %1961 = vmatpush.bf16.msrb.mxu0 %v5477_v55  ;;  %1975 = vmatpush.bf16.msrb.mxu1 %v5465_v10  ;;  %v6390_v55 = vld [vmem:[#allocation7 + $0x64] sm:$0xf]  ;;  %v5441_v13 = vor.u32 %v6391_v9, %v5438_v3  ;;  %v5412_v10 = vld [vmem:[#allocation7 + $0x40] sm:$0xf]  ;;  %v5422_v36 = vld [vmem:[#allocation7 + $0x58] sm:$0xf0] }
 0x271   :  { %v5433_v1 = vor.u32 %v6390_v55, %v5430_v63  ;;  %v5396_v49 = vld [vmem:[#allocation7 + $0x20] sm:$0xf]  ;;  %v6382_v60 = vld [vmem:[#allocation7 + $0x24] sm:$0xf]  ;;  %v5404_v61 = vld [vmem:[#allocation7 + $0x28] sm:$0xf] }
 0x272   :  { %v6383_v63 = vld [vmem:[#allocation7 + $0x2c] sm:$0xf]  ;;  %v5406_v0 = vld [vmem:[#allocation7 + $0x38] sm:$0xf0]  ;;  %v6380_v9 = vld [vmem:[#allocation7 + $0xc] sm:$0xf0] }
 0x273   :  { %v6633_v19 = vpop.eup %6632  ;;  %v6378_v3 = vld [vmem:[#allocation7 + $0x4] sm:$0xf]  ;;  %v5388_v28 = vld [vmem:[#allocation7 + $0x8] sm:$0xf] }
 0x274   :  { %v7155_v24 = vmul.f32 %v6633_v19, %v1429_v18  ;;  %v5469_v19 = vor.u32 %v6401_v17, %v5468_v23  ;;  %v6399_v18 = vld [vmem:[#allocation7 + $0xac] sm:$0xf]  ;;  %1962 = vmatpush.bf16.msrb.mxu0 %v5461_v62  ;;  %1976 = vmatpush.bf16.msrb.mxu1 %v5449_v56  ;;  %v6384_v56 = vld [vmem:[#allocation7 + $0x2c] sm:$0xf0] }
 0x275   :  { %v5397_v59 = vor.u32 %v6384_v56, %v5396_v49  ;;  %v434_v56 = vadd.f32 %v7074_v29, %v7060_v21 }
 0x276   :  { %v1439_v30 = vpack.c.bf16 %v7155_v24, %v7155_v24  ;;  %1988 = vmatpush.bf16.msrb.mxu2 %v5469_v19  ;;  %v6388_v19 = vld [vmem:[#allocation7 + $0x4c] sm:$0xf0] }
 0x277   :  { %v5413_v25 = vor.u32 %v6388_v19, %v5412_v10  ;;  %v6381_v10 = vld [vmem:[#allocation7 + $0x14] sm:$0xf0] }
 0x278   :  { %1647 = vmatmul.bf16.vlgmr.msra.gmra.mxu0 %v1439_v30  ;;  %1660 = vmatmul.bf16.vlgmr.msra.gmra.mxu1 %v1439_v30 }
 0x279   :  { %1673 = vmatmul.bf16.vlgmr.msra.gmra.mxu2 %v1439_v30  ;;  %1686 = vmatmul.bf16.vlgmr.msra.gmra.mxu3 %v1439_v30  ;;  %v5470_v30 = vld [vmem:[#allocation7 + $0xb8] sm:$0xf0] }
 0x27a   :  { %v5473_v34 = vor.u32 %v6399_v18, %v5470_v30  ;;  %1963 = vmatpush.bf16.msrb.mxu0 %v5445_v16  ;;  %1989 = vmatpush.bf16.msrb.mxu2 %v5453_v58  ;;  %v6386_v18 = vld [vmem:[#allocation7 + $0x44] sm:$0xf]  ;;  %v5414_v30 = vld [vmem:[#allocation7 + $0x50] sm:$0xf0]  ;;  %v5425_v58 = vor.u32 %v6387_v46, %v5422_v36 }
 0x27b   :  { %1977 = vmatpush.bf16.msrb.mxu1 %v5433_v1  ;;  %v5417_v45 = vor.u32 %v6386_v18, %v5414_v30  ;;  %v5409_v1 = vor.u32 %v6383_v63, %v5406_v0  ;;  %v5389_v18 = vor.u32 %v6381_v10, %v5388_v28  ;;  %v5390_v30 = vld [vmem:[#allocation7 + $0x18] sm:$0xf0] }
 0x27c   :  { %2001 = vmatpush.bf16.msrb.mxu3 %v5473_v34  ;;  %v5420_v34 = vld [vmem:[#allocation7 + $0x48] sm:$0xf] }
 0x27d   :  { %v5421_v16 = vor.u32 %v6389_v27, %v5420_v34 }
 0x27e   :  { %1964 = vmatpush.bf16.msrb.mxu0 %v5429_v52  ;;  %1990 = vmatpush.bf16.msrb.mxu2 %v5437_v2  ;;  %v6385_v52 = vld [vmem:[#allocation7 + $0x34] sm:$0xf0]  ;;  %v5380_v2 = vld [vmem:[#allocation7] sm:$0xf] }
 0x27f   :  { %1978 = vmatpush.bf16.msrb.mxu1 %v5417_v45 }
 0x280   :  { %2002 = vmatpush.bf16.msrb.mxu3 %v5457_v6  ;;  %v5398_v6 = vld [vmem:[#allocation7 + $0x30] sm:$0xf0] }
 0x281   :  { %v5401_v55 = vor.u32 %v6382_v60, %v5398_v6 }
 0x282   :  { %1965 = vmatpush.bf16.msrb.mxu0 %v5413_v25  ;;  %1991 = vmatpush.bf16.msrb.mxu2 %v5421_v16  ;;  %v6379_v25 = vld [vmem:[#allocation7 + $0xc] sm:$0xf] }
 0x283   :  { %1979 = vmatpush.bf16.msrb.mxu1 %v5401_v55 }
 0x284   :  { %2003 = vmatpush.bf16.msrb.mxu3 %v5441_v13 }
 0x286   :  { %1966 = vmatpush.bf16.msrb.mxu0 %v5397_v59 }
 0x288   :  { %2004 = vmatpush.bf16.msrb.mxu3 %v5425_v58 }
 0x28c   :  { %2005 = vmatpush.bf16.msrb.mxu3 %v5409_v1 }
 0x2f5   :  { %v1648_v11 = vpop.f32.mrf.mxu0  ;;  %v1661_v62 = vpop.f32.mrf.mxu1 }
 0x2f6   :  { %v1691_v23 = vadd.f32 %v1648_v11, %v347_v5  ;;  %v1692_v17 = vadd.f32 %v1661_v62, %v376_v53  ;;  %v5405_v53 = vor.u32 %v6385_v52, %v5404_v61 }
 0x2f8   :  { %v5375_v32 = vmul.f32 -1.442695, %v1691_v23  ;;  %v5376_v42 = vmul.f32 -1.442695, %v1692_v17  ;;  %v5381_v23 = vor.u32 %v6380_v9, %v5380_v2  ;;  %v5382_v17 = vld [vmem:[#allocation7 + $0x10] sm:$0xf0]  ;;  %1992 = vmatpush.bf16.msrb.mxu2 %v5405_v53 }
 0x2f9   :  { %v5385_v19 = vor.u32 %v6378_v3, %v5382_v17 }
 0x2fa   :  { %6634 = vpow2.f32 %v5375_v32  ;;  %v5393_v32 = vor.u32 %v6379_v25, %v5390_v30  ;;  %1967 = vmatpush.bf16.msrb.mxu0 %v5381_v23 }
 0x2fb   :  { %6636 = vpow2.f32 %v5376_v42  ;;  %1980 = vmatpush.bf16.msrb.mxu1 %v5385_v19 }
 0x2fc   :  { %v1674_v8 = vpop.f32.mrf.mxu2  ;;  %v1687_v5 = vpop.f32.mrf.mxu3  ;;  %1993 = vmatpush.bf16.msrb.mxu2 %v5389_v18  ;;  %2006 = vmatpush.bf16.msrb.mxu3 %v5393_v32 }
 0x2fd   :  { %v1693_v11 = vadd.f32 %v1674_v8, %v405_v26  ;;  %v1650_v62 = vpop.f32.mrf.mxu0  ;;  %v1663_v13 = vpop.f32.mrf.mxu1  ;;  %v1694_v60 = vadd.f32 %v1687_v5, %v434_v56  ;;  %v5623_v56 = vld [vmem:[#allocation7 + $0xe0] sm:$0xf] }
 0x2ff   :  { %v5377_v34 = vmul.f32 -1.442695, %v1693_v11 }
 0x300   :  { %v6635_v27 = vpop.eup %6634 }
 0x301   :  { %v6637_v42 = vpop.eup %6636  ;;  %v1704_v45 = vadd.f32 1.0, %v6635_v27  ;;  %6638 = vpow2.f32 %v5377_v34 }
 0x302   :  { %v1705_v16 = vadd.f32 1.0, %v6637_v42 }
 0x303   :  { %6640 = vrcp.f32 %v1704_v45  ;;  %v1718_v63 = vand.u32 2147483648, %v1704_v45  ;;  %v1716_v53 = vand.u32 2147483647, %v1704_v45  ;;  %vm1712_vm6 = vweird.f32 %v1704_v45 }
 0x304   :  { %6642 = vrcp.f32 %v1705_v16  ;;  %v1676_v46 = vpop.f32.mrf.mxu2  ;;  %v1689_v36 = vpop.f32.mrf.mxu3  ;;  %v1733_v0 = vand.u32 2147483648, %v1705_v16  ;;  %v1731_v2 = vand.u32 2147483647, %v1705_v16  ;;  %vm1727_vm7 = vweird.f32 %v1705_v16 }
 0x305   :  { %v1719_v3 = vor.u32 1.1754944e-38, %v1718_v63  ;;  %vm1717_vm10 = vcmp.eq.f32.partialorder %v1716_v53, 8.507059e+37  ;;  %v6439_v63 = vld [vmem:[#allocation7 + $0xec] sm:$0xf]  ;;  %v5607_v53 = vld [vmem:[#allocation7 + $0xc0] sm:$0xf] }
 0x306   :  { %v1734_v62 = vor.u32 1.1754944e-38, %v1733_v0  ;;  %vm1732_vm11 = vcmp.eq.f32.partialorder %v1731_v2, 8.507059e+37  ;;  %v5633_v0 = vld [vmem:[#allocation7 + $0xf8] sm:$0xf0]  ;;  %v6434_v2 = vld [vmem:[#allocation7 + $0xc4] sm:$0xf] }
 0x307   :  { %v6639_v49 = vpop.eup %6638 }
 0x308   :  { %v1706_v58 = vadd.f32 1.0, %v6639_v49 }
 0x309   :  { %v6641_v59 = vpop.eup %6640 }
 0x30a   :  { %v6643_v6 = vpop.eup %6642  ;;  %v1708_v61 = vmul.f32 %v6641_v59, %v1704_v45  ;;  %6644 = vrcp.f32 %v1706_v58  ;;  %vm1713_vm4 = vweird.f32 %v6641_v59  ;;  %v1748_v32 = vand.u32 2147483648, %v1706_v58 }
 0x30b   :  { %v1723_v26 = vmul.f32 %v6643_v6, %v1705_v16  ;;  %6646 = vtanh.f32 %v1694_v60  ;;  %vm1728_vm5 = vweird.f32 %v6643_v6  ;;  %vm1714_vm8 = vmor %vm1712_vm6, %vm1713_vm4  ;;  %vm1742_vm13 = vweird.f32 %v1706_v58  ;;  %v6438_v60 = vld [vmem:[#allocation7 + $0xe4] sm:$0xf] }
 0x30c   :  { %v1709_v55 = vsub.f32 1.0, %v1708_v61  ;;  %vm1729_vm9 = vmor %vm1727_vm7, %vm1728_vm5  ;;  %v1746_v42 = vand.u32 2147483647, %v1706_v58  ;;  %v1749_v16 = vor.u32 1.1754944e-38, %v1748_v32  ;;  %v5631_v61 = vld [vmem:[#allocation7 + $0xe8] sm:$0xf] }
 0x30d   :  { %v1724_v52 = vsub.f32 1.0, %v1723_v26  ;;  %v6441_v26 = vld [vmem:[#allocation7 + $0xf4] sm:$0xf0] }
 0x30e   :  { %v1710_v8 = vmul.f32 %v6641_v59, %v1709_v55  ;;  %vm1747_vm15 = vcmp.eq.f32.partialorder %v1746_v42, 8.507059e+37 }
 0x30f   :  { %v1725_v1 = vmul.f32 %v6643_v6, %v1724_v52  ;;  %v5632_v52 = vor.u32 %v6441_v26, %v5631_v61 }
 0x310   :  { %v6645_v9 = vpop.eup %6644  ;;  %v1711_v29 = vadd.f32 %v6641_v59, %v1710_v8  ;;  %v5636_v8 = vor.u32 %v6439_v63, %v5633_v0  ;;  %v5559_v0 = vld [vmem:[#allocation7 + $0x60] sm:$0xf] }
 0x311   :  { %v1738_v5 = vmul.f32 %v6645_v9, %v1706_v58  ;;  %v1726_v11 = vadd.f32 %v6643_v6, %v1725_v1  ;;  %v6647_v23 = vpop.eup %6646  ;;  %vm1743_vm12 = vweird.f32 %v6645_v9  ;;  %v5625_v58 = vld [vmem:[#allocation7 + $0xf0] sm:$0xf0]  ;;  %2307 = vmatpush.bf16.msra.mxu2 %v5632_v52  ;;  %v6436_v1 = vld [vmem:[#allocation7 + $0xcc] sm:$0xf0]  ;;  %v5585_v52 = vld [vmem:[#allocation7 + $0x98] sm:$0xf0] }
 0x312   :  { %v1715_v13 = vsel %vm1714_vm8, %v6641_v59, %v1711_v29  ;;  %vm1744_vm14 = vmor %vm1742_vm13, %vm1743_vm12  ;;  %v6440_v59 = vld [vmem:[#allocation7 + $0xec] sm:$0xf0]  ;;  %v5628_v55 = vor.u32 %v6438_v60, %v5625_v58  ;;  %2320 = vmatpush.bf16.msra.mxu3 %v5636_v8  ;;  %v5609_v29 = vld [vmem:[#allocation7 + $0xd0] sm:$0xf0] }
 0x313   :  { %v1739_v17 = vsub.f32 1.0, %v1738_v5  ;;  %v1720_v28 = vsel %vm1717_vm10, %v1719_v3, %v1715_v13  ;;  %v1730_v10 = vsel %vm1729_vm9, %v6643_v6, %v1726_v11  ;;  %v5624_v6 = vor.u32 %v6440_v59, %v5623_v56  ;;  %v5615_v5 = vld [vmem:[#allocation7 + $0xc8] sm:$0xf]  ;;  %v6437_v3 = vld [vmem:[#allocation7 + $0xd4] sm:$0xf0] }
 0x314   :  { %v1735_v19 = vsel %vm1732_vm11, %v1734_v62, %v1730_v10  ;;  %v1754_v18 = vmul.f32 %v6647_v23, %v1720_v28  ;;  %2294 = vmatpush.bf16.msra.mxu1 %v5628_v55  ;;  %v5612_v11 = vor.u32 %v6434_v2, %v5609_v29  ;;  %v5616_v62 = vor.u32 %v6437_v3, %v5615_v5  ;;  %v6435_v13 = vld [vmem:[#allocation7 + $0xcc] sm:$0xf]  ;;  %v5617_v23 = vld [vmem:[#allocation7 + $0xd8] sm:$0xf0]  ;;  %v5591_v28 = vld [vmem:[#allocation7 + $0xa0] sm:$0xf] }
 0x315   :  { %v1740_v25 = vmul.f32 %v6645_v9, %v1739_v17  ;;  %v1753_v30 = vmul.f32 %v1735_v19, %v7152_v15  ;;  %2281 = vmatpush.bf16.msra.mxu0 %v5624_v6  ;;  %v5620_v17 = vor.u32 %v6435_v13, %v5617_v23  ;;  %v6432_v10 = vld [vmem:[#allocation7 + $0xac] sm:$0xf0]  ;;  %v6430_v19 = vld [vmem:[#allocation7 + $0xa4] sm:$0xf]  ;;  %v5577_v60 = vld [vmem:[#allocation7 + $0x90] sm:$0xf0] }
 0x316   :  { %2308 = vmatpush.bf16.msra.mxu2 %v5616_v62  ;;  %v6426_v56 = vld [vmem:[#allocation7 + $0x84] sm:$0xf]  ;;  %v5583_v6 = vld [vmem:[#allocation7 + $0x88] sm:$0xf]  ;;  %v6429_v58 = vld [vmem:[#allocation7 + $0x94] sm:$0xf0] }
 0x317   :  { %v7168_v34 = vadd.f32 %v1754_v18, %v1753_v30  ;;  %v1741_v27 = vadd.f32 %v6645_v9, %v1740_v25  ;;  %2321 = vmatpush.bf16.msra.mxu3 %v5620_v17  ;;  %v5592_v18 = vor.u32 %v6432_v10, %v5591_v28  ;;  %v5593_v25 = vld [vmem:[#allocation7 + $0xb0] sm:$0xf0]  ;;  %v5599_v30 = vld [vmem:[#allocation7 + $0xa8] sm:$0xf]  ;;  %v5580_v61 = vor.u32 %v6426_v56, %v5577_v60  ;;  %v6427_v55 = vld [vmem:[#allocation7 + $0x8c] sm:$0xf] }
 0x318   :  { %2295 = vmatpush.bf16.msra.mxu1 %v5612_v11  ;;  %v5596_v32 = vor.u32 %v6430_v19, %v5593_v25  ;;  %v5584_v26 = vor.u32 %v6429_v58, %v5583_v6  ;;  %v5588_v63 = vor.u32 %v6427_v55, %v5585_v52  ;;  %v6424_v8 = vld [vmem:[#allocation7 + $0x6c] sm:$0xf0]  ;;  %v5561_v2 = vld [vmem:[#allocation7 + $0x70] sm:$0xf0]  ;;  %v6425_v29 = vld [vmem:[#allocation7 + $0x74] sm:$0xf0] }
 0x319   :  { %6648 = vtanh.f32 %v7168_v34  ;;  %v1745_v45 = vsel %vm1744_vm14, %v6645_v9, %v1741_v27  ;;  %v5608_v9 = vor.u32 %v6436_v1, %v5607_v53  ;;  %v6433_v27 = vld [vmem:[#allocation7 + $0xb4] sm:$0xf0]  ;;  %v6422_v53 = vld [vmem:[#allocation7 + $0x64] sm:$0xf]  ;;  %v5560_v1 = vor.u32 %v6424_v8, %v5559_v0  ;;  %v6423_v11 = vld [vmem:[#allocation7 + $0x6c] sm:$0xf] }
 0x31a   :  { %v1750_v36 = vsel %vm1747_vm15, %v1749_v16, %v1745_v45  ;;  %v5600_v42 = vor.u32 %v6433_v27, %v5599_v30  ;;  %v6431_v45 = vld [vmem:[#allocation7 + $0xac] sm:$0xf]  ;;  %v5601_v16 = vld [vmem:[#allocation7 + $0xb8] sm:$0xf0]  ;;  %v5564_v5 = vor.u32 %v6422_v53, %v5561_v2  ;;  %v5543_v19 = vld [vmem:[#allocation7 + $0x40] sm:$0xf] }
 0x31b   :  { %2282 = vmatpush.bf16.msra.mxu0 %v5608_v9  ;;  %v5567_v9 = vld [vmem:[#allocation7 + $0x68] sm:$0xf]  ;;  %v5569_v62 = vld [vmem:[#allocation7 + $0x78] sm:$0xf0]  ;;  %v6418_v25 = vld [vmem:[#allocation7 + $0x44] sm:$0xf] }
 0x31c   :  { %2296 = vmatpush.bf16.msra.mxu1 %v5596_v32  ;;  %2309 = vmatpush.bf16.msra.mxu2 %v5600_v42  ;;  %v5568_v3 = vor.u32 %v6425_v29, %v5567_v9  ;;  %v5572_v17 = vor.u32 %v6423_v11, %v5569_v62  ;;  %v5545_v27 = vld [vmem:[#allocation7 + $0x50] sm:$0xf0]  ;;  %v5551_v32 = vld [vmem:[#allocation7 + $0x48] sm:$0xf]  ;;  %v6421_v42 = vld [vmem:[#allocation7 + $0x54] sm:$0xf0] }
 0x31d   :  { %v5553_v56 = vld [vmem:[#allocation7 + $0x58] sm:$0xf0]  ;;  %v6414_v6 = vld [vmem:[#allocation7 + $0x24] sm:$0xf]  ;;  %v5529_v58 = vld [vmem:[#allocation7 + $0x30] sm:$0xf0] }
 0x31e   :  { %v6417_v55 = vld [vmem:[#allocation7 + $0x34] sm:$0xf0]  ;;  %v6415_v52 = vld [vmem:[#allocation7 + $0x2c] sm:$0xf]  ;;  %v5511_v2 = vld [vmem:[#allocation7] sm:$0xf] }
 0x31f   :  { %v6649_v46 = vpop.eup %6648  ;;  %2283 = vmatpush.bf16.msra.mxu0 %v5592_v18  ;;  %v6420_v18 = vld [vmem:[#allocation7 + $0x4c] sm:$0xf0]  ;;  %v6410_v29 = vld [vmem:[#allocation7 + $0x4] sm:$0xf] }
 0x320   :  { %v7171_v49 = vmul.f32 %v6649_v46, %v1750_v36  ;;  %v5604_v46 = vor.u32 %v6431_v45, %v5601_v16  ;;  %v5575_v36 = vld [vmem:[#allocation7 + $0x80] sm:$0xf]  ;;  %2297 = vmatpush.bf16.msra.mxu1 %v5580_v61  ;;  %2310 = vmatpush.bf16.msra.mxu2 %v5584_v26  ;;  %v5544_v30 = vor.u32 %v6420_v18, %v5543_v19  ;;  %v5535_v61 = vld [vmem:[#allocation7 + $0x28] sm:$0xf]  ;;  %v6412_v9 = vld [vmem:[#allocation7 + $0xc] sm:$0xf0] }
 0x321   :  { %v5532_v26 = vor.u32 %v6414_v6, %v5529_v58  ;;  %v5536_v53 = vor.u32 %v6417_v55, %v5535_v61  ;;  %v5512_v62 = vor.u32 %v6412_v9, %v5511_v2  ;;  %v6411_v19 = vld [vmem:[#allocation7 + $0xc] sm:$0xf]  ;;  %v5521_v18 = vld [vmem:[#allocation7 + $0x18] sm:$0xf0] }
 0x322   :  { %v1760_v15 = vpack.c.bf16 %v7171_v49, %v7171_v49  ;;  %2322 = vmatpush.bf16.msra.mxu3 %v5604_v46  ;;  %v5548_v46 = vor.u32 %v6418_v25, %v5545_v27  ;;  %v5524_v27 = vor.u32 %v6411_v19, %v5521_v18 }
 0x324   :  { %1968 = vmatmul.bf16.vlgmr.msrb.gmra.mxu0 %v1760_v15  ;;  %1981 = vmatmul.bf16.vlgmr.msrb.gmra.mxu1 %v1760_v15 }
 0x325   :  { %1994 = vmatmul.bf16.vlgmr.msrb.gmra.mxu2 %v1760_v15  ;;  %2007 = vmatmul.bf16.vlgmr.msrb.gmra.mxu3 %v1760_v15  ;;  %v6428_v15 = vld [vmem:[#allocation7 + $0x8c] sm:$0xf0] }
 0x326   :  { %v5576_v59 = vor.u32 %v6428_v15, %v5575_v36  ;;  %2323 = vmatpush.bf16.msra.mxu3 %v5588_v63  ;;  %2298 = vmatpush.bf16.msra.mxu1 %v5564_v5  ;;  %v5552_v36 = vor.u32 %v6421_v42, %v5551_v32  ;;  %v6419_v15 = vld [vmem:[#allocation7 + $0x4c] sm:$0xf]  ;;  %v5537_v63 = vld [vmem:[#allocation7 + $0x38] sm:$0xf0] }
 0x327   :  { %2311 = vmatpush.bf16.msra.mxu2 %v5568_v3 }
 0x328   :  { %2284 = vmatpush.bf16.msra.mxu0 %v5576_v59  ;;  %v6416_v59 = vld [vmem:[#allocation7 + $0x2c] sm:$0xf0] }
 0x32a   :  { %2324 = vmatpush.bf16.msra.mxu3 %v5572_v17  ;;  %2299 = vmatpush.bf16.msra.mxu1 %v5548_v46  ;;  %v6413_v17 = vld [vmem:[#allocation7 + $0x14] sm:$0xf0] }
 0x32b   :  { %2312 = vmatpush.bf16.msra.mxu2 %v5552_v36 }
 0x32c   :  { %2285 = vmatpush.bf16.msra.mxu0 %v5560_v1  ;;  %v5540_v1 = vor.u32 %v6415_v52, %v5537_v63 }
 0x32e   :  { %2300 = vmatpush.bf16.msra.mxu1 %v5532_v26 }
 0x32f   :  { %2313 = vmatpush.bf16.msra.mxu2 %v5536_v53 }
 0x330   :  { %2286 = vmatpush.bf16.msra.mxu0 %v5544_v30 }
 0x3a1   :  { %v1969_v13 = vpop.f32.mrf.mxu0  ;;  %v1982_v23 = vpop.f32.mrf.mxu1 }
 0x3a2   :  { %v2012_v28 = vadd.f32 %v1969_v13, %v7077_v31  ;;  %v2013_v10 = vadd.f32 %v1982_v23, %v7080_v33  ;;  %v5527_v31 = vld [vmem:[#allocation7 + $0x20] sm:$0xf]  ;;  %v5556_v33 = vor.u32 %v6419_v15, %v5553_v56  ;;  %v5513_v13 = vld [vmem:[#allocation7 + $0x10] sm:$0xf0]  ;;  %v5519_v23 = vld [vmem:[#allocation7 + $0x8] sm:$0xf] }
 0x3a3   :  { %v5528_v60 = vor.u32 %v6416_v59, %v5527_v31 }
 0x3a4   :  { %v5506_v45 = vmul.f32 -1.442695, %v2012_v28  ;;  %v5507_v16 = vmul.f32 -1.442695, %v2013_v10  ;;  %2325 = vmatpush.bf16.msra.mxu3 %v5556_v33  ;;  %v5516_v28 = vor.u32 %v6410_v29, %v5513_v13  ;;  %v5520_v10 = vor.u32 %v6413_v17, %v5519_v23 }
 0x3a5   :  { %2287 = vmatpush.bf16.msra.mxu0 %v5528_v60 }
 0x3a6   :  { %6650 = vpow2.f32 %v5506_v45  ;;  %2301 = vmatpush.bf16.msra.mxu1 %v5516_v28  ;;  %2314 = vmatpush.bf16.msra.mxu2 %v5520_v10 }
 0x3a7   :  { %6652 = vpow2.f32 %v5507_v16 }
 0x3a8   :  { %v1995_v0 = vpop.f32.mrf.mxu2  ;;  %v2008_v8 = vpop.f32.mrf.mxu3  ;;  %2326 = vmatpush.bf16.msra.mxu3 %v5540_v1 }
 0x3a9   :  { %v2014_v5 = vadd.f32 %v1995_v0, %v7083_v35  ;;  %v1971_v3 = vpop.f32.mrf.mxu0  ;;  %v1984_v11 = vpop.f32.mrf.mxu1  ;;  %2288 = vmatpush.bf16.msra.mxu0 %v5512_v62  ;;  %v2015_v56 = vadd.f32 %v2008_v8, %v7088_v38 }
 0x3ab   :  { %v5508_v25 = vmul.f32 -1.442695, %v2014_v5 }
 0x3ac   :  { %v6651_v30 = vpop.eup %6650  ;;  %2327 = vmatpush.bf16.msra.mxu3 %v5524_v27 }
 0x3ad   :  { %v6653_v32 = vpop.eup %6652  ;;  %v2025_v42 = vadd.f32 1.0, %v6651_v30  ;;  %6654 = vpow2.f32 %v5508_v25 }
 0x3ae   :  { %v2026_v35 = vadd.f32 1.0, %v6653_v32 }
 0x3af   :  { %6656 = vrcp.f32 %v2025_v42  ;;  %v2039_v58 = vand.u32 2147483648, %v2025_v42  ;;  %v2037_v55 = vand.u32 2147483647, %v2025_v42  ;;  %vm2033_vm2 = vweird.f32 %v2025_v42 }
 0x3b0   :  { %6658 = vrcp.f32 %v2026_v35  ;;  %v1997_v45 = vpop.f32.mrf.mxu2  ;;  %v2010_v16 = vpop.f32.mrf.mxu3  ;;  %v2054_v61 = vand.u32 2147483648, %v2026_v35  ;;  %v2052_v63 = vand.u32 2147483647, %v2026_v35  ;;  %vm2048_vm3 = vweird.f32 %v2026_v35 }
 0x3b1   :  { %v2040_v8 = vor.u32 1.1754944e-38, %v2039_v58  ;;  %vm2038_vm6 = vcmp.eq.f32.partialorder %v2037_v55, 8.507059e+37  ;;  %v6472_v45 = vld [vmem:[#allocation7 + $0xec] sm:$0xf0]  ;;  %v6470_v16 = vld [vmem:[#allocation7 + $0xe4] sm:$0xf] }
 0x3b2   :  { %v2055_v2 = vor.u32 1.1754944e-38, %v2054_v61  ;;  %vm2053_vm7 = vcmp.eq.f32.partialorder %v2052_v63, 8.507059e+37  ;;  %v5738_v58 = vld [vmem:[#allocation7 + $0xc0] sm:$0xf]  ;;  %v6468_v61 = vld [vmem:[#allocation7 + $0xcc] sm:$0xf0] }
 0x3b3   :  { %v6655_v46 = vpop.eup %6654  ;;  %v5739_v55 = vor.u32 %v6468_v61, %v5738_v58  ;;  %v5746_v63 = vld [vmem:[#allocation7 + $0xc8] sm:$0xf]  ;;  %v6457_v61 = vld [vmem:[#allocation7 + $0x74] sm:$0xf0] }
 0x3b4   :  { %v2027_v36 = vadd.f32 1.0, %v6655_v46  ;;  %v5698_v58 = vld [vmem:[#allocation7 + $0x68] sm:$0xf] }
 0x3b5   :  { %v6657_v15 = vpop.eup %6656 }
 0x3b6   :  { %v6659_v31 = vpop.eup %6658  ;;  %v2029_v59 = vmul.f32 %v6657_v15, %v2025_v42  ;;  %6660 = vrcp.f32 %v2027_v36  ;;  %vm2034_vm0 = vweird.f32 %v6657_v15  ;;  %v2069_v19 = vand.u32 2147483648, %v2027_v36 }
 0x3b7   :  { %v2044_v33 = vmul.f32 %v6659_v31, %v2026_v35  ;;  %6662 = vtanh.f32 %v2015_v56  ;;  %vm2049_vm1 = vweird.f32 %v6659_v31  ;;  %vm2035_vm4 = vmor %vm2033_vm2, %vm2034_vm0  ;;  %vm2063_vm9 = vweird.f32 %v2027_v36  ;;  %v5754_v35 = vld [vmem:[#allocation7 + $0xe0] sm:$0xf]  ;;  %v6473_v56 = vld [vmem:[#allocation7 + $0xf4] sm:$0xf0] }
 0x3b8   :  { %v2030_v60 = vsub.f32 1.0, %v2029_v59  ;;  %vm2050_vm5 = vmor %vm2048_vm3, %vm2049_vm1  ;;  %v2067_v18 = vand.u32 2147483647, %v2027_v36  ;;  %v2070_v30 = vor.u32 1.1754944e-38, %v2069_v19  ;;  %v5755_v46 = vor.u32 %v6472_v45, %v5754_v35  ;;  %v5732_v19 = vld [vmem:[#allocation7 + $0xb8] sm:$0xf0] }
 0x3b9   :  { %v2045_v6 = vsub.f32 1.0, %v2044_v33  ;;  %v6471_v33 = vld [vmem:[#allocation7 + $0xec] sm:$0xf]  ;;  %v5714_v35 = vld [vmem:[#allocation7 + $0x88] sm:$0xf] }
 0x3ba   :  { %v2031_v26 = vmul.f32 %v6657_v15, %v2030_v60  ;;  %vm2068_vm11 = vcmp.eq.f32.partialorder %v2067_v18, 8.507059e+37  ;;  %v5764_v60 = vld [vmem:[#allocation7 + $0xf8] sm:$0xf0]  ;;  %2602 = vmatpush.bf16.msrb.mxu0 %v5755_v46  ;;  %v6461_v45 = vld [vmem:[#allocation7 + $0x94] sm:$0xf0] }
 0x3bb   :  { %v2046_v52 = vmul.f32 %v6659_v31, %v2045_v6  ;;  %v5767_v6 = vor.u32 %v6471_v33, %v5764_v60  ;;  %v5715_v46 = vor.u32 %v6461_v45, %v5714_v35  ;;  %v6454_v33 = vld [vmem:[#allocation7 + $0x64] sm:$0xf]  ;;  %v5660_v35 = vld [vmem:[#allocation7 + $0x30] sm:$0xf0]  ;;  %v5666_v45 = vld [vmem:[#allocation7 + $0x28] sm:$0xf] }
 0x3bc   :  { %v6661_v0 = vpop.eup %6660  ;;  %v2032_v53 = vadd.f32 %v6657_v15, %v2031_v26  ;;  %v6466_v26 = vld [vmem:[#allocation7 + $0xc4] sm:$0xf] }
 0x3bd   :  { %v2059_v38 = vmul.f32 %v6661_v0, %v2027_v36  ;;  %v2047_v1 = vadd.f32 %v6659_v31, %v2046_v52  ;;  %v6663_v29 = vpop.eup %6662  ;;  %vm2064_vm8 = vweird.f32 %v6661_v0  ;;  %v5756_v36 = vld [vmem:[#allocation7 + $0xf0] sm:$0xf0]  ;;  %2641 = vmatpush.bf16.msrb.mxu3 %v5767_v6 }
 0x3be   :  { %v2036_v9 = vsel %vm2035_vm4, %v6657_v15, %v2032_v53  ;;  %vm2065_vm10 = vmor %vm2063_vm9, %vm2064_vm8  ;;  %v5762_v15 = vld [vmem:[#allocation7 + $0xe8] sm:$0xf]  ;;  %v5740_v52 = vld [vmem:[#allocation7 + $0xd0] sm:$0xf0]  ;;  %2603 = vmatpush.bf16.msrb.mxu0 %v5739_v55  ;;  %v381_v55 = vadd.f32 %v7090_v39, %v7048_v14 }
 0x3bf   :  { %v2060_v5 = vsub.f32 1.0, %v2059_v38  ;;  %v2041_v3 = vsel %vm2038_vm6, %v2040_v8, %v2036_v9  ;;  %v2051_v11 = vsel %vm2050_vm5, %v6659_v31, %v2047_v1  ;;  %v5759_v31 = vor.u32 %v6470_v16, %v5756_v36  ;;  %v6467_v8 = vld [vmem:[#allocation7 + $0xcc] sm:$0xf]  ;;  %v5748_v1 = vld [vmem:[#allocation7 + $0xd8] sm:$0xf0] }
 0x3c0   :  { %v2056_v62 = vsel %vm2053_vm7, %v2055_v2, %v2051_v11  ;;  %v2075_v13 = vmul.f32 %v6663_v29, %v2041_v3  ;;  %v5763_v59 = vor.u32 %v6473_v56, %v5762_v15  ;;  %v5743_v53 = vor.u32 %v6466_v26, %v5740_v52  ;;  %v5722_v9 = vld [vmem:[#allocation7 + $0xa0] sm:$0xf]  ;;  %v6464_v29 = vld [vmem:[#allocation7 + $0xac] sm:$0xf0]  ;;  %v5724_v11 = vld [vmem:[#allocation7 + $0xb0] sm:$0xf0] }
 0x3c1   :  { %v2061_v23 = vmul.f32 %v6661_v0, %v2060_v5  ;;  %v2074_v17 = vmul.f32 %v2056_v62, %v7168_v34  ;;  %2615 = vmatpush.bf16.msrb.mxu1 %v5759_v31  ;;  %v5751_v2 = vor.u32 %v6467_v8, %v5748_v1  ;;  %v6462_v5 = vld [vmem:[#allocation7 + $0xa4] sm:$0xf]  ;;  %v5723_v3 = vor.u32 %v6464_v29, %v5722_v9  ;;  %v5730_v62 = vld [vmem:[#allocation7 + $0xa8] sm:$0xf]  ;;  %v6459_v36 = vld [vmem:[#allocation7 + $0x8c] sm:$0xf] }
 0x3c2   :  { %2628 = vmatpush.bf16.msrb.mxu2 %v5763_v59  ;;  %v5716_v15 = vld [vmem:[#allocation7 + $0x98] sm:$0xf0]  ;;  %v5690_v31 = vld [vmem:[#allocation7 + $0x60] sm:$0xf]  ;;  %v6456_v59 = vld [vmem:[#allocation7 + $0x6c] sm:$0xf0]  ;;  %v352_v26 = vadd.f32 %v7085_v37, %v7044_v12 }
 0x3c3   :  { %v7180_v28 = vadd.f32 %v2075_v13, %v2074_v17  ;;  %v2062_v10 = vadd.f32 %v6661_v0, %v2061_v23  ;;  %2642 = vmatpush.bf16.msrb.mxu3 %v5751_v2  ;;  %v6465_v13 = vld [vmem:[#allocation7 + $0xb4] sm:$0xf0]  ;;  %v5727_v23 = vor.u32 %v6462_v5, %v5724_v11  ;;  %2604 = vmatpush.bf16.msrb.mxu0 %v5723_v3  ;;  %v5692_v6 = vld [vmem:[#allocation7 + $0x70] sm:$0xf0]  ;;  %v5674_v29 = vld [vmem:[#allocation7 + $0x40] sm:$0xf] }
 0x3c4   :  { %v5731_v17 = vor.u32 %v6465_v13, %v5730_v62  ;;  %v5719_v56 = vor.u32 %v6459_v36, %v5716_v15  ;;  %v5691_v60 = vor.u32 %v6456_v59, %v5690_v31  ;;  %v5695_v52 = vor.u32 %v6454_v33, %v5692_v6  ;;  %v6452_v5 = vld [vmem:[#allocation7 + $0x4c] sm:$0xf0]  ;;  %v6450_v3 = vld [vmem:[#allocation7 + $0x44] sm:$0xf]  ;;  %v5676_v11 = vld [vmem:[#allocation7 + $0x50] sm:$0xf0] }
 0x3c5   :  { %6664 = vtanh.f32 %v7180_v28  ;;  %v2066_v25 = vsel %vm2065_vm10, %v6661_v0, %v2062_v10  ;;  %v6469_v0 = vld [vmem:[#allocation7 + $0xd4] sm:$0xf0]  ;;  %2616 = vmatpush.bf16.msrb.mxu1 %v5743_v53  ;;  %v6463_v10 = vld [vmem:[#allocation7 + $0xac] sm:$0xf]  ;;  %v5700_v53 = vld [vmem:[#allocation7 + $0x78] sm:$0xf0]  ;;  %v5675_v37 = vor.u32 %v6452_v5, %v5674_v29 }
 0x3c6   :  { %v2071_v32 = vsel %vm2068_vm11, %v2070_v30, %v2066_v25  ;;  %v5747_v38 = vor.u32 %v6469_v0, %v5746_v63  ;;  %v5735_v18 = vor.u32 %v6463_v10, %v5732_v19  ;;  %v5706_v25 = vld [vmem:[#allocation7 + $0x80] sm:$0xf]  ;;  %v6460_v30 = vld [vmem:[#allocation7 + $0x8c] sm:$0xf0]  ;;  %v5699_v63 = vor.u32 %v6457_v61, %v5698_v58  ;;  %v6455_v0 = vld [vmem:[#allocation7 + $0x6c] sm:$0xf] }
 0x3c7   :  { %v5703_v1 = vor.u32 %v6455_v0, %v5700_v53  ;;  %v5682_v62 = vld [vmem:[#allocation7 + $0x48] sm:$0xf]  ;;  %v6453_v39 = vld [vmem:[#allocation7 + $0x54] sm:$0xf0]  ;;  %v6451_v19 = vld [vmem:[#allocation7 + $0x4c] sm:$0xf] }
 0x3c8   :  { %2629 = vmatpush.bf16.msrb.mxu2 %v5747_v38  ;;  %2643 = vmatpush.bf16.msrb.mxu3 %v5735_v18  ;;  %v5683_v10 = vor.u32 %v6453_v39, %v5682_v62  ;;  %v5684_v18 = vld [vmem:[#allocation7 + $0x58] sm:$0xf0]  ;;  %v6449_v36 = vld [vmem:[#allocation7 + $0x34] sm:$0xf0]  ;;  %v6447_v15 = vld [vmem:[#allocation7 + $0x2c] sm:$0xf] }
 0x3c9   :  { %2617 = vmatpush.bf16.msrb.mxu1 %v5727_v23  ;;  %v5667_v33 = vor.u32 %v6449_v36, %v5666_v45  ;;  %v5642_v6 = vld [vmem:[#allocation7] sm:$0xf]  ;;  %v6444_v58 = vld [vmem:[#allocation7 + $0xc] sm:$0xf0]  ;;  %v6442_v61 = vld [vmem:[#allocation7 + $0x4] sm:$0xf] }
 0x3ca   :  { %v5644_v0 = vld [vmem:[#allocation7 + $0x10] sm:$0xf0]  ;;  %v6445_v53 = vld [vmem:[#allocation7 + $0x14] sm:$0xf0] }
 0x3cb   :  { %v6665_v27 = vpop.eup %6664 }
 0x3cc   :  { %v7183_v42 = vmul.f32 %v6665_v27, %v2071_v32  ;;  %2630 = vmatpush.bf16.msrb.mxu2 %v5731_v17  ;;  %v6458_v27 = vld [vmem:[#allocation7 + $0x84] sm:$0xf]  ;;  %v5707_v32 = vor.u32 %v6460_v30, %v5706_v25  ;;  %2644 = vmatpush.bf16.msrb.mxu3 %v5719_v56  ;;  %v5679_v17 = vor.u32 %v6450_v3, %v5676_v11  ;;  %v5658_v25 = vld [vmem:[#allocation7 + $0x20] sm:$0xf]  ;;  %v6448_v30 = vld [vmem:[#allocation7 + $0x2c] sm:$0xf0] }
 0x3cd   :  { %v5668_v56 = vld [vmem:[#allocation7 + $0x38] sm:$0xf0] }
 0x3ce   :  { %v2081_v34 = vpack.c.bf16 %v7183_v42, %v7183_v42  ;;  %2605 = vmatpush.bf16.msrb.mxu0 %v5707_v32  ;;  %v5659_v32 = vor.u32 %v6448_v30, %v5658_v25 }
 0x3d0   :  { %2289 = vmatmul.bf16.vlgmr.msra.gmra.mxu0 %v2081_v34  ;;  %2302 = vmatmul.bf16.vlgmr.msra.gmra.mxu1 %v2081_v34 }
 0x3d1   :  { %2315 = vmatmul.bf16.vlgmr.msra.gmra.mxu2 %v2081_v34  ;;  %2328 = vmatmul.bf16.vlgmr.msra.gmra.mxu3 %v2081_v34  ;;  %v5708_v34 = vld [vmem:[#allocation7 + $0x90] sm:$0xf0] }
 0x3d2   :  { %v5711_v16 = vor.u32 %v6458_v27, %v5708_v34  ;;  %2631 = vmatpush.bf16.msrb.mxu2 %v5715_v46  ;;  %2606 = vmatpush.bf16.msrb.mxu0 %v5691_v60  ;;  %v5687_v27 = vor.u32 %v6451_v19, %v5684_v18  ;;  %v6446_v34 = vld [vmem:[#allocation7 + $0x24] sm:$0xf]  ;;  %v5671_v60 = vor.u32 %v6447_v15, %v5668_v56 }
 0x3d3   :  { %2645 = vmatpush.bf16.msrb.mxu3 %v5703_v1  ;;  %v5663_v46 = vor.u32 %v6446_v34, %v5660_v35  ;;  %v6443_v1 = vld [vmem:[#allocation7 + $0xc] sm:$0xf] }
 0x3d4   :  { %2618 = vmatpush.bf16.msrb.mxu1 %v5711_v16  ;;  %v410_v16 = vadd.f32 %v7092_v43, %v7058_v20  ;;  %v5650_v43 = vld [vmem:[#allocation7 + $0x8] sm:$0xf] }
 0x3d6   :  { %2632 = vmatpush.bf16.msrb.mxu2 %v5699_v63  ;;  %2607 = vmatpush.bf16.msrb.mxu0 %v5675_v37  ;;  %v5643_v63 = vor.u32 %v6444_v58, %v5642_v6 }
 0x3d7   :  { %2646 = vmatpush.bf16.msrb.mxu3 %v5687_v27 }
 0x3d8   :  { %2619 = vmatpush.bf16.msrb.mxu1 %v5695_v52 }
 0x3da   :  { %2633 = vmatpush.bf16.msrb.mxu2 %v5683_v10  ;;  %2608 = vmatpush.bf16.msrb.mxu0 %v5659_v32 }
 0x3db   :  { %2647 = vmatpush.bf16.msrb.mxu3 %v5671_v60 }
 0x3dc   :  { %2620 = vmatpush.bf16.msrb.mxu1 %v5679_v17 }
 0x3de   :  { %2634 = vmatpush.bf16.msrb.mxu2 %v5667_v33  ;;  %2609 = vmatpush.bf16.msrb.mxu0 %v5643_v63 }
 0x3e0   :  { %2621 = vmatpush.bf16.msrb.mxu1 %v5663_v46 }
 0x44d   :  { %v2290_v38 = vpop.f32.mrf.mxu0  ;;  %v2303_v8 = vpop.f32.mrf.mxu1 }
 0x44e   :  { %v2333_v2 = vadd.f32 %v2290_v38, %v352_v26  ;;  %v2334_v9 = vadd.f32 %v2303_v8, %v381_v55  ;;  %v5647_v38 = vor.u32 %v6442_v61, %v5644_v0  ;;  %v5651_v8 = vor.u32 %v6445_v53, %v5650_v43 }
 0x450   :  { %v5637_v13 = vmul.f32 -1.442695, %v2333_v2  ;;  %v5638_v23 = vmul.f32 -1.442695, %v2334_v9  ;;  %v5652_v2 = vld [vmem:[#allocation7 + $0x18] sm:$0xf0]  ;;  %2622 = vmatpush.bf16.msrb.mxu1 %v5647_v38  ;;  %2635 = vmatpush.bf16.msrb.mxu2 %v5651_v8 }
 0x451   :  { %v5655_v5 = vor.u32 %v6443_v1, %v5652_v2 }
 0x452   :  { %6666 = vpow2.f32 %v5637_v13 }
 0x453   :  { %6668 = vpow2.f32 %v5638_v23  ;;  %2648 = vmatpush.bf16.msrb.mxu3 %v5655_v5  ;;  %v439_v23 = vadd.f32 %v7094_v48, %v7060_v21 }
 0x454   :  { %v2316_v31 = vpop.f32.mrf.mxu2  ;;  %v2329_v59 = vpop.f32.mrf.mxu3 }
 0x455   :  { %v2335_v26 = vadd.f32 %v2316_v31, %v410_v16  ;;  %v2292_v55 = vpop.f32.mrf.mxu0  ;;  %v2305_v52 = vpop.f32.mrf.mxu1  ;;  %v2336_v19 = vadd.f32 %v2329_v59, %v439_v23  ;;  %v6505_v23 = vld [vmem:[#allocation7 + $0xf4] sm:$0xf0] }
 0x457   :  { %v5639_v9 = vmul.f32 -1.442695, %v2335_v26 }
 0x458   :  { %v6667_v29 = vpop.eup %6666 }
 0x459   :  { %v6669_v3 = vpop.eup %6668  ;;  %v2346_v37 = vadd.f32 1.0, %v6667_v29  ;;  %6670 = vpow2.f32 %v5639_v9 }
 0x45a   :  { %v2347_v11 = vadd.f32 1.0, %v6669_v3  ;;  %v5885_v3 = vld [vmem:[#allocation7 + $0xe0] sm:$0xf] }
 0x45b   :  { %6672 = vrcp.f32 %v2346_v37  ;;  %v2360_v34 = vand.u32 2147483648, %v2346_v37  ;;  %v2358_v16 = vand.u32 2147483647, %v2346_v37  ;;  %vm2354_vm14 = vweird.f32 %v2346_v37 }
 0x45c   :  { %6674 = vrcp.f32 %v2347_v11  ;;  %v2318_v62 = vpop.f32.mrf.mxu2  ;;  %v2331_v39 = vpop.f32.mrf.mxu3  ;;  %v2375_v35 = vand.u32 2147483648, %v2347_v11  ;;  %v2373_v36 = vand.u32 2147483647, %v2347_v11  ;;  %vm2369_vm15 = vweird.f32 %v2347_v11 }
 0x45d   :  { %v2361_v31 = vor.u32 1.1754944e-38, %v2360_v34  ;;  %vm2359_vm2 = vcmp.eq.f32.partialorder %v2358_v16, 8.507059e+37  ;;  %v5887_v39 = vld [vmem:[#allocation7 + $0xf0] sm:$0xf0]  ;;  %v6501_v16 = vld [vmem:[#allocation7 + $0xd4] sm:$0xf0] }
 0x45e   :  { %v2376_v33 = vor.u32 1.1754944e-38, %v2375_v35  ;;  %vm2374_vm3 = vcmp.eq.f32.partialorder %v2373_v36, 8.507059e+37  ;;  %v5871_v35 = vld [vmem:[#allocation7 + $0xd0] sm:$0xf0] }
 0x45f   :  { %v6671_v13 = vpop.eup %6670 }
 0x460   :  { %v2348_v17 = vadd.f32 1.0, %v6671_v13  ;;  %v5893_v13 = vld [vmem:[#allocation7 + $0xe8] sm:$0xf] }
 0x461   :  { %v6673_v10 = vpop.eup %6672 }
 0x462   :  { %v6675_v18 = vpop.eup %6674  ;;  %v2350_v25 = vmul.f32 %v6673_v10, %v2346_v37  ;;  %6676 = vrcp.f32 %v2348_v17  ;;  %vm2355_vm12 = vweird.f32 %v6673_v10  ;;  %v2390_v38 = vand.u32 2147483648, %v2348_v17  ;;  %v6504_v37 = vld [vmem:[#allocation7 + $0xec] sm:$0xf0] }
 0x463   :  { %v2365_v30 = vmul.f32 %v6675_v18, %v2347_v11  ;;  %6678 = vtanh.f32 %v2336_v19  ;;  %vm2370_vm13 = vweird.f32 %v6675_v18  ;;  %vm2356_vm0 = vmor %vm2354_vm14, %vm2355_vm12  ;;  %vm2384_vm5 = vweird.f32 %v2348_v17  ;;  %v6502_v11 = vld [vmem:[#allocation7 + $0xe4] sm:$0xf]  ;;  %v6503_v19 = vld [vmem:[#allocation7 + $0xec] sm:$0xf] }
 0x464   :  { %v2351_v27 = vsub.f32 1.0, %v2350_v25  ;;  %vm2371_vm1 = vmor %vm2369_vm15, %vm2370_vm13  ;;  %v2388_v8 = vand.u32 2147483647, %v2348_v17  ;;  %v2391_v2 = vor.u32 1.1754944e-38, %v2390_v38  ;;  %v5886_v62 = vor.u32 %v6504_v37, %v5885_v3  ;;  %v6492_v38 = vld [vmem:[#allocation7 + $0x8c] sm:$0xf0] }
 0x465   :  { %v2366_v32 = vsub.f32 1.0, %v2365_v30  ;;  %v5869_v30 = vld [vmem:[#allocation7 + $0xc0] sm:$0xf]  ;;  %v6491_v37 = vld [vmem:[#allocation7 + $0x8c] sm:$0xf] }
 0x466   :  { %v2352_v45 = vmul.f32 %v6673_v10, %v2351_v27  ;;  %vm2389_vm7 = vcmp.eq.f32.partialorder %v2388_v8, 8.507059e+37  ;;  %2923 = vmatpush.bf16.msra.mxu0 %v5886_v62  ;;  %v6500_v27 = vld [vmem:[#allocation7 + $0xcc] sm:$0xf0]  ;;  %v6490_v8 = vld [vmem:[#allocation7 + $0x84] sm:$0xf] }
 0x467   :  { %v2367_v46 = vmul.f32 %v6675_v18, %v2366_v32  ;;  %v6498_v32 = vld [vmem:[#allocation7 + $0xc4] sm:$0xf]  ;;  %v5870_v34 = vor.u32 %v6500_v27, %v5869_v30  ;;  %v6487_v27 = vld [vmem:[#allocation7 + $0x6c] sm:$0xf] }
 0x468   :  { %v6677_v15 = vpop.eup %6676  ;;  %v2353_v48 = vadd.f32 %v6673_v10, %v2352_v45  ;;  %v5877_v45 = vld [vmem:[#allocation7 + $0xc8] sm:$0xf] }
 0x469   :  { %v2380_v56 = vmul.f32 %v6677_v15, %v2348_v17  ;;  %v2368_v59 = vadd.f32 %v6675_v18, %v2367_v46  ;;  %v6679_v6 = vpop.eup %6678  ;;  %vm2385_vm4 = vweird.f32 %v6677_v15  ;;  %v5890_v17 = vor.u32 %v6502_v11, %v5887_v39  ;;  %v5847_v11 = vld [vmem:[#allocation7 + $0x98] sm:$0xf0]  ;;  %v5821_v39 = vld [vmem:[#allocation7 + $0x60] sm:$0xf] }
 0x46a   :  { %v2357_v60 = vsel %vm2356_vm0, %v6673_v10, %v2353_v48  ;;  %vm2386_vm6 = vmor %vm2384_vm5, %vm2385_vm4  ;;  %v5894_v10 = vor.u32 %v6505_v23, %v5893_v13  ;;  %v5874_v46 = vor.u32 %v6498_v32, %v5871_v35  ;;  %v5878_v36 = vor.u32 %v6501_v16, %v5877_v45  ;;  %v5879_v48 = vld [vmem:[#allocation7 + $0xd8] sm:$0xf0]  ;;  %2924 = vmatpush.bf16.msra.mxu0 %v5870_v34  ;;  %v6488_v13 = vld [vmem:[#allocation7 + $0x6c] sm:$0xf0] }
 0x46b   :  { %v2381_v58 = vsub.f32 1.0, %v2380_v56  ;;  %v2362_v61 = vsel %vm2359_vm2, %v2361_v31, %v2357_v60  ;;  %v2372_v26 = vsel %vm2371_vm1, %v6675_v18, %v2368_v59  ;;  %v5895_v18 = vld [vmem:[#allocation7 + $0xf8] sm:$0xf0]  ;;  %2936 = vmatpush.bf16.msra.mxu1 %v5890_v17  ;;  %v5853_v31 = vld [vmem:[#allocation7 + $0xa0] sm:$0xf]  ;;  %v5850_v62 = vor.u32 %v6491_v37, %v5847_v11 }
 0x46c   :  { %v2377_v55 = vsel %vm2374_vm3, %v2376_v33, %v2372_v26  ;;  %v2396_v52 = vmul.f32 %v6679_v6, %v2362_v61  ;;  %v5898_v25 = vor.u32 %v6503_v19, %v5895_v18  ;;  %2949 = vmatpush.bf16.msra.mxu2 %v5894_v10  ;;  %v6496_v59 = vld [vmem:[#allocation7 + $0xac] sm:$0xf0]  ;;  %v6494_v33 = vld [vmem:[#allocation7 + $0xa4] sm:$0xf]  ;;  %v5855_v6 = vld [vmem:[#allocation7 + $0xb0] sm:$0xf0]  ;;  %v5822_v17 = vor.u32 %v6488_v13, %v5821_v39 }
 0x46d   :  { %v2382_v63 = vmul.f32 %v6677_v15, %v2381_v58  ;;  %v2395_v0 = vmul.f32 %v2377_v55, %v7180_v28  ;;  %v5854_v60 = vor.u32 %v6496_v59, %v5853_v31  ;;  %v5861_v58 = vld [vmem:[#allocation7 + $0xa8] sm:$0xf]  ;;  %v6497_v61 = vld [vmem:[#allocation7 + $0xb4] sm:$0xf0]  ;;  %v5858_v26 = vor.u32 %v6494_v33, %v5855_v6  ;;  %v6486_v23 = vld [vmem:[#allocation7 + $0x64] sm:$0xf] }
 0x46e   :  { %2962 = vmatpush.bf16.msra.mxu3 %v5898_v25  ;;  %v5862_v55 = vor.u32 %v6497_v61, %v5861_v58  ;;  %v5823_v10 = vld [vmem:[#allocation7 + $0x70] sm:$0xf0]  ;;  %v5829_v19 = vld [vmem:[#allocation7 + $0x68] sm:$0xf]  ;;  %v6489_v18 = vld [vmem:[#allocation7 + $0x74] sm:$0xf0] }
 0x46f   :  { %v7196_v43 = vadd.f32 %v2396_v52, %v2395_v0  ;;  %v2383_v53 = vadd.f32 %v6677_v15, %v2382_v63  ;;  %2937 = vmatpush.bf16.msra.mxu1 %v5874_v46  ;;  %v6495_v52 = vld [vmem:[#allocation7 + $0xac] sm:$0xf]  ;;  %v5863_v63 = vld [vmem:[#allocation7 + $0xb8] sm:$0xf0]  ;;  %2925 = vmatpush.bf16.msra.mxu0 %v5854_v60  ;;  %v5826_v25 = vor.u32 %v6486_v23, %v5823_v10  ;;  %v5805_v35 = vld [vmem:[#allocation7 + $0x40] sm:$0xf] }
 0x470   :  { %2950 = vmatpush.bf16.msra.mxu2 %v5878_v36  ;;  %v5866_v0 = vor.u32 %v6495_v52, %v5863_v63  ;;  %v5830_v30 = vor.u32 %v6489_v18, %v5829_v19  ;;  %v5831_v32 = vld [vmem:[#allocation7 + $0x78] sm:$0xf0]  ;;  %v6484_v45 = vld [vmem:[#allocation7 + $0x4c] sm:$0xf0]  ;;  %v6482_v16 = vld [vmem:[#allocation7 + $0x44] sm:$0xf] }
 0x471   :  { %6680 = vtanh.f32 %v7196_v43  ;;  %v2387_v1 = vsel %vm2386_vm6, %v6677_v15, %v2383_v53  ;;  %v6499_v15 = vld [vmem:[#allocation7 + $0xcc] sm:$0xf]  ;;  %v5837_v53 = vld [vmem:[#allocation7 + $0x80] sm:$0xf]  ;;  %v5834_v34 = vor.u32 %v6487_v27, %v5831_v32  ;;  %v5806_v46 = vor.u32 %v6484_v45, %v5805_v35  ;;  %v5807_v36 = vld [vmem:[#allocation7 + $0x50] sm:$0xf0] }
 0x472   :  { %v2392_v29 = vsel %vm2389_vm7, %v2391_v2, %v2387_v1  ;;  %v5882_v56 = vor.u32 %v6499_v15, %v5879_v48  ;;  %v5838_v1 = vor.u32 %v6492_v38, %v5837_v53  ;;  %v5839_v2 = vld [vmem:[#allocation7 + $0x90] sm:$0xf0]  ;;  %v5813_v15 = vld [vmem:[#allocation7 + $0x48] sm:$0xf]  ;;  %v6485_v48 = vld [vmem:[#allocation7 + $0x54] sm:$0xf0] }
 0x473   :  { %2938 = vmatpush.bf16.msra.mxu1 %v5858_v26  ;;  %v5814_v31 = vor.u32 %v6485_v48, %v5813_v15  ;;  %v6483_v59 = vld [vmem:[#allocation7 + $0x4c] sm:$0xf]  ;;  %v5815_v33 = vld [vmem:[#allocation7 + $0x58] sm:$0xf0]  ;;  %v5789_v6 = vld [vmem:[#allocation7 + $0x20] sm:$0xf] }
 0x474   :  { %2963 = vmatpush.bf16.msra.mxu3 %v5882_v56  ;;  %2951 = vmatpush.bf16.msra.mxu2 %v5862_v55  ;;  %v5810_v56 = vor.u32 %v6482_v16, %v5807_v36  ;;  %v5818_v60 = vor.u32 %v6483_v59, %v5815_v33  ;;  %v6480_v58 = vld [vmem:[#allocation7 + $0x2c] sm:$0xf0]  ;;  %v6478_v61 = vld [vmem:[#allocation7 + $0x24] sm:$0xf]  ;;  %v5791_v55 = vld [vmem:[#allocation7 + $0x30] sm:$0xf0] }
 0x475   :  { %2926 = vmatpush.bf16.msra.mxu0 %v5838_v1  ;;  %v5790_v26 = vor.u32 %v6480_v58, %v5789_v6  ;;  %v5797_v52 = vld [vmem:[#allocation7 + $0x28] sm:$0xf]  ;;  %v6481_v63 = vld [vmem:[#allocation7 + $0x34] sm:$0xf0]  ;;  %v6479_v38 = vld [vmem:[#allocation7 + $0x2c] sm:$0xf] }
 0x476   :  { %v5798_v53 = vor.u32 %v6481_v63, %v5797_v52  ;;  %v5781_v37 = vld [vmem:[#allocation7 + $0x8] sm:$0xf]  ;;  %v6477_v11 = vld [vmem:[#allocation7 + $0x14] sm:$0xf0]  ;;  %v6475_v13 = vld [vmem:[#allocation7 + $0xc] sm:$0xf] }
 0x477   :  { %v6681_v9 = vpop.eup %6680  ;;  %v5782_v39 = vor.u32 %v6477_v11, %v5781_v37  ;;  %v5783_v23 = vld [vmem:[#allocation7 + $0x18] sm:$0xf0]  ;;  %v6536_v19 = vld [vmem:[#allocation9 + $0xec] sm:$0xf0]  ;;  %v6534_v18 = vld [vmem:[#allocation9 + $0xe4] sm:$0xf] }
 0x478   :  { %v7199_v5 = vmul.f32 %v6681_v9, %v2392_v29  ;;  %2964 = vmatpush.bf16.msra.mxu3 %v5866_v0  ;;  %v5845_v9 = vld [vmem:[#allocation7 + $0x88] sm:$0xf]  ;;  %v6493_v29 = vld [vmem:[#allocation7 + $0x94] sm:$0xf0]  ;;  %v5794_v0 = vor.u32 %v6478_v61, %v5791_v55  ;;  %v5786_v10 = vor.u32 %v6475_v13, %v5783_v23  ;;  %v6535_v16 = vld [vmem:[#allocation9 + $0xec] sm:$0xf] }
 0x479   :  { %v5846_v3 = vor.u32 %v6493_v29, %v5845_v9  ;;  %2927 = vmatpush.bf16.msra.mxu0 %v5822_v17  ;;  %v6476_v9 = vld [vmem:[#allocation7 + $0xc] sm:$0xf0]  ;;  %v6474_v29 = vld [vmem:[#allocation7 + $0x4] sm:$0xf]  ;;  %v6016_v17 = vld [vmem:[#allocation9 + $0xe0] sm:$0xf] }
 0x47a   :  { %v2402_v28 = vpack.c.bf16 %v7199_v5, %v7199_v5  ;;  %v6017_v32 = vor.u32 %v6536_v19, %v6016_v17  ;;  %v6024_v35 = vld [vmem:[#allocation9 + $0xe8] sm:$0xf]  ;;  %v6537_v45 = vld [vmem:[#allocation9 + $0xf4] sm:$0xf0]  ;;  %v6026_v48 = vld [vmem:[#allocation9 + $0xf8] sm:$0xf0] }
 0x47b   :  { %2952 = vmatpush.bf16.msra.mxu2 %v5846_v3  ;;  %v5775_v3 = vld [vmem:[#allocation7 + $0x10] sm:$0xf0]  ;;  %v6025_v15 = vor.u32 %v6537_v45, %v6024_v35  ;;  %v6029_v59 = vor.u32 %v6535_v16, %v6026_v48  ;;  %v6008_v58 = vld [vmem:[#allocation9 + $0xc8] sm:$0xf]  ;;  %v6533_v52 = vld [vmem:[#allocation9 + $0xd4] sm:$0xf0] }
 0x47c   :  { %2610 = vmatmul.bf16.vlgmr.msrb.gmra.mxu0 %v2402_v28  ;;  %2623 = vmatmul.bf16.vlgmr.msrb.gmra.mxu1 %v2402_v28  ;;  %v6002_v6 = vld [vmem:[#allocation9 + $0xd0] sm:$0xf0]  ;;  %v6010_v63 = vld [vmem:[#allocation9 + $0xd8] sm:$0xf0]  ;;  %v5968_v13 = vld [vmem:[#allocation9 + $0x80] sm:$0xf] }
 0x47d   :  { %2636 = vmatmul.bf16.vlgmr.msrb.gmra.mxu2 %v2402_v28  ;;  %2649 = vmatmul.bf16.vlgmr.msrb.gmra.mxu3 %v2402_v28  ;;  %v5842_v28 = vor.u32 %v6490_v8, %v5839_v2  ;;  %v5799_v8 = vld [vmem:[#allocation7 + $0x38] sm:$0xf0]  ;;  %v5773_v2 = vld [vmem:[#allocation7] sm:$0xf]  ;;  %v6524_v23 = vld [vmem:[#allocation9 + $0x8c] sm:$0xf0] }
 0x47e   :  { %2965 = vmatpush.bf16.msra.mxu3 %v5850_v62  ;;  %2928 = vmatpush.bf16.msra.mxu0 %v5806_v46  ;;  %v5802_v1 = vor.u32 %v6479_v38, %v5799_v8  ;;  %v5778_v62 = vor.u32 %v6474_v29, %v5775_v3  ;;  %v6528_v38 = vld [vmem:[#allocation9 + $0xac] sm:$0xf0]  ;;  %v6526_v8 = vld [vmem:[#allocation9 + $0xa4] sm:$0xf]  ;;  %v5992_v29 = vld [vmem:[#allocation9 + $0xa8] sm:$0xf]  ;;  %v5969_v16 = vor.u32 %v6524_v23, %v5968_v13 }
 0x47f   :  { %2939 = vmatpush.bf16.msra.mxu1 %v5842_v28  ;;  %2953 = vmatpush.bf16.msra.mxu2 %v5830_v30  ;;  %v5774_v28 = vor.u32 %v6476_v9, %v5773_v2  ;;  %v6527_v3 = vld [vmem:[#allocation9 + $0xac] sm:$0xf]  ;;  %v5978_v35 = vld [vmem:[#allocation9 + $0x98] sm:$0xf0]  ;;  %v6517_v13 = vld [vmem:[#allocation9 + $0x54] sm:$0xf0] }
 0x482   :  { %2966 = vmatpush.bf16.msra.mxu3 %v5834_v34  ;;  %2929 = vmatpush.bf16.msra.mxu0 %v5790_v26 }
 0x483   :  { %2940 = vmatpush.bf16.msra.mxu1 %v5826_v25  ;;  %2954 = vmatpush.bf16.msra.mxu2 %v5814_v31  ;;  %v6018_v25 = vld [vmem:[#allocation9 + $0xf0] sm:$0xf0]  ;;  %v6532_v31 = vld [vmem:[#allocation9 + $0xcc] sm:$0xf0] }
 0x484   :  { %v6021_v34 = vor.u32 %v6534_v18, %v6018_v25  ;;  %v6522_v25 = vld [vmem:[#allocation9 + $0x84] sm:$0xf] }
 0x486   :  { %2967 = vmatpush.bf16.msra.mxu3 %v5818_v60  ;;  %2930 = vmatpush.bf16.msra.mxu0 %v5774_v28  ;;  %v6530_v60 = vld [vmem:[#allocation9 + $0xc4] sm:$0xf]  ;;  %v6529_v28 = vld [vmem:[#allocation9 + $0xb4] sm:$0xf0] }
 0x487   :  { %2941 = vmatpush.bf16.msra.mxu1 %v5810_v56  ;;  %2955 = vmatpush.bf16.msra.mxu2 %v5798_v53  ;;  %v6000_v56 = vld [vmem:[#allocation9 + $0xc0] sm:$0xf]  ;;  %v6005_v55 = vor.u32 %v6530_v60, %v6002_v6  ;;  %v6520_v6 = vld [vmem:[#allocation9 + $0x6c] sm:$0xf0] }
 0x488   :  { %v6001_v33 = vor.u32 %v6532_v31, %v6000_v56 }
 0x48a   :  { %2968 = vmatpush.bf16.msra.mxu3 %v5802_v1  ;;  %3258 = vmatpush.bf16.msrb.mxu0 %v6017_v32  ;;  %v5986_v1 = vld [vmem:[#allocation9 + $0xb0] sm:$0xf0]  ;;  %v6525_v32 = vld [vmem:[#allocation9 + $0x94] sm:$0xf0] }
 0x48b   :  { %2942 = vmatpush.bf16.msra.mxu1 %v5794_v0  ;;  %2956 = vmatpush.bf16.msra.mxu2 %v5782_v39  ;;  %v5984_v0 = vld [vmem:[#allocation9 + $0xa0] sm:$0xf]  ;;  %v5989_v9 = vor.u32 %v6526_v8, %v5986_v1  ;;  %v5994_v39 = vld [vmem:[#allocation9 + $0xb8] sm:$0xf0] }
 0x48c   :  { %v5985_v2 = vor.u32 %v6528_v38, %v5984_v0  ;;  %v5997_v18 = vor.u32 %v6527_v3, %v5994_v39  ;;  %v6519_v38 = vld [vmem:[#allocation9 + $0x6c] sm:$0xf]  ;;  %v5962_v8 = vld [vmem:[#allocation9 + $0x78] sm:$0xf0]  ;;  %v5936_v1 = vld [vmem:[#allocation9 + $0x40] sm:$0xf] }
 0x48d   :  { %v5944_v39 = vld [vmem:[#allocation9 + $0x48] sm:$0xf] }
 0x48e   :  { %2969 = vmatpush.bf16.msra.mxu3 %v5786_v10  ;;  %3259 = vmatpush.bf16.msrb.mxu0 %v6001_v33 }
 0x48f   :  { %2943 = vmatpush.bf16.msra.mxu1 %v5778_v62  ;;  %3316 = vmatpush.bf16.msrb.mxu2 %v6025_v15  ;;  %v5993_v62 = vor.u32 %v6529_v28, %v5992_v29  ;;  %v6516_v29 = vld [vmem:[#allocation9 + $0x4c] sm:$0xf0]  ;;  %v6514_v28 = vld [vmem:[#allocation9 + $0x44] sm:$0xf] }
 0x492   :  { %3345 = vmatpush.bf16.msrb.mxu3 %v6029_v59  ;;  %3260 = vmatpush.bf16.msrb.mxu0 %v5985_v2  ;;  %v5952_v59 = vld [vmem:[#allocation9 + $0x60] sm:$0xf] }
 0x493   :  { %3287 = vmatpush.bf16.msrb.mxu1 %v6021_v34  ;;  %v6523_v34 = vld [vmem:[#allocation9 + $0x8c] sm:$0xf] }
 0x494   :  { %v5981_v56 = vor.u32 %v6523_v34, %v5978_v35  ;;  %v5945_v34 = vor.u32 %v6517_v13, %v5944_v39  ;;  %v6507_v39 = vld [vmem:[#allocation9 + $0xc] sm:$0xf]  ;;  %v5914_v13 = vld [vmem:[#allocation9 + $0x18] sm:$0xf0] }
 0x496   :  { %3261 = vmatpush.bf16.msrb.mxu0 %v5969_v16  ;;  %v5922_v16 = vld [vmem:[#allocation9 + $0x30] sm:$0xf0] }
 0x497   :  { %3288 = vmatpush.bf16.msrb.mxu1 %v6005_v55 }
 0x49b   :  { %3289 = vmatpush.bf16.msrb.mxu1 %v5989_v9  ;;  %v5965_v9 = vor.u32 %v6519_v38, %v5962_v8  ;;  %v5906_v38 = vld [vmem:[#allocation9 + $0x10] sm:$0xf0]  ;;  %v5912_v8 = vld [vmem:[#allocation9 + $0x8] sm:$0xf] }
 0x4f9   :  { %v2611_v30 = vpop.f32.mrf.mxu0  ;;  %v2624_v27 = vpop.f32.mrf.mxu1 }
 0x4fa   :  { %v2654_v46 = vadd.f32 %v2611_v30, %v7097_v54  ;;  %v2655_v36 = vadd.f32 %v2624_v27, %v7100_v57  ;;  %v6009_v54 = vor.u32 %v6533_v52, %v6008_v58  ;;  %v6531_v57 = vld [vmem:[#allocation9 + $0xcc] sm:$0xf]  ;;  %v5970_v30 = vld [vmem:[#allocation9 + $0x90] sm:$0xf0]  ;;  %v5976_v27 = vld [vmem:[#allocation9 + $0x88] sm:$0xf]  ;;  %v5953_v58 = vor.u32 %v6520_v6, %v5952_v59 }
 0x4fb   :  { %v6013_v53 = vor.u32 %v6531_v57, %v6010_v63  ;;  %v5977_v15 = vor.u32 %v6525_v32, %v5976_v27  ;;  %v6521_v57 = vld [vmem:[#allocation9 + $0x74] sm:$0xf0]  ;;  %v6511_v6 = vld [vmem:[#allocation9 + $0x2c] sm:$0xf] }
 0x4fc   :  { %v5768_v61 = vmul.f32 -1.442695, %v2654_v46  ;;  %v5769_v26 = vmul.f32 -1.442695, %v2655_v36  ;;  %3317 = vmatpush.bf16.msrb.mxu2 %v6009_v54  ;;  %v5973_v46 = vor.u32 %v6522_v25, %v5970_v30  ;;  %v5960_v54 = vld [vmem:[#allocation9 + $0x68] sm:$0xf]  ;;  %3262 = vmatpush.bf16.msrb.mxu0 %v5953_v58 }
 0x4fd   :  { %3346 = vmatpush.bf16.msrb.mxu3 %v6013_v53  ;;  %v5961_v53 = vor.u32 %v6521_v57, %v5960_v54  ;;  %v6512_v30 = vld [vmem:[#allocation9 + $0x2c] sm:$0xf0]  ;;  %v5930_v58 = vld [vmem:[#allocation9 + $0x38] sm:$0xf0]  ;;  %v6506_v57 = vld [vmem:[#allocation9 + $0x4] sm:$0xf] }
 0x4fe   :  { %6682 = vpow2.f32 %v5768_v61  ;;  %3290 = vmatpush.bf16.msrb.mxu1 %v5973_v46  ;;  %v6518_v61 = vld [vmem:[#allocation9 + $0x64] sm:$0xf]  ;;  %v6508_v54 = vld [vmem:[#allocation9 + $0xc] sm:$0xf0] }
 0x4ff   :  { %6684 = vpow2.f32 %v5769_v26  ;;  %v5954_v26 = vld [vmem:[#allocation9 + $0x70] sm:$0xf0] }
 0x500   :  { %v2637_v37 = vpop.f32.mrf.mxu2  ;;  %v2650_v11 = vpop.f32.mrf.mxu3  ;;  %3318 = vmatpush.bf16.msrb.mxu2 %v5993_v62  ;;  %v5957_v52 = vor.u32 %v6518_v61, %v5954_v26  ;;  %v5938_v62 = vld [vmem:[#allocation9 + $0x50] sm:$0xf0] }
 0x501   :  { %v2656_v17 = vadd.f32 %v2637_v37, %v7103_v41  ;;  %v2613_v10 = vpop.f32.mrf.mxu0  ;;  %v2626_v19 = vpop.f32.mrf.mxu1  ;;  %3347 = vmatpush.bf16.msrb.mxu3 %v5997_v18  ;;  %v2657_v0 = vadd.f32 %v2650_v11, %v7108_v50  ;;  %v5937_v37 = vor.u32 %v6516_v29, %v5936_v1  ;;  %v6515_v11 = vld [vmem:[#allocation9 + $0x4c] sm:$0xf]  ;;  %v5941_v32 = vor.u32 %v6514_v28, %v5938_v62  ;;  %v6509_v1 = vld [vmem:[#allocation9 + $0x14] sm:$0xf0] }
 0x502   :  { %3291 = vmatpush.bf16.msrb.mxu1 %v5957_v52  ;;  %v5920_v10 = vld [vmem:[#allocation9 + $0x20] sm:$0xf] }
 0x503   :  { %v5770_v45 = vmul.f32 -1.442695, %v2656_v17  ;;  %v5946_v17 = vld [vmem:[#allocation9 + $0x58] sm:$0xf0]  ;;  %3263 = vmatpush.bf16.msrb.mxu0 %v5937_v37  ;;  %v5904_v52 = vld [vmem:[#allocation9] sm:$0xf] }
 0x504   :  { %v6683_v36 = vpop.eup %6682  ;;  %3319 = vmatpush.bf16.msrb.mxu2 %v5977_v15  ;;  %v5949_v35 = vor.u32 %v6515_v11, %v5946_v17  ;;  %v5913_v11 = vor.u32 %v6509_v1, %v5912_v8  ;;  %v6130_v8 = vld [vmem:[#allocation10 + $0xd0] sm:$0xf0]  ;;  %v6136_v1 = vld [vmem:[#allocation10 + $0xc8] sm:$0xf] }
 0x505   :  { %v6685_v48 = vpop.eup %6684  ;;  %v7206_v41 = vadd.f32 1.0, %v6683_v36  ;;  %6686 = vpow2.f32 %v5770_v45  ;;  %3348 = vmatpush.bf16.msrb.mxu3 %v5981_v56  ;;  %v6510_v45 = vld [vmem:[#allocation9 + $0x24] sm:$0xf]  ;;  %v5928_v56 = vld [vmem:[#allocation9 + $0x28] sm:$0xf] }
 0x506   :  { %v7208_v31 = vadd.f32 1.0, %v6685_v48  ;;  %v5921_v48 = vor.u32 %v6512_v30, %v5920_v10  ;;  %3292 = vmatpush.bf16.msrb.mxu1 %v5941_v32 }
 0x507   :  { %6688 = vrcp.f32 %v7206_v41  ;;  %v2679_v55 = vand.u32 2147483647, %v7206_v41  ;;  %v2681_v25 = vand.u32 2147483648, %v7206_v41  ;;  %vm2675_vm12 = vweird.f32 %v7206_v41 }
 0x508   :  { %6690 = vrcp.f32 %v7208_v31  ;;  %v2639_v33 = vpop.f32.mrf.mxu2  ;;  %v2652_v60 = vpop.f32.mrf.mxu3  ;;  %3320 = vmatpush.bf16.msrb.mxu2 %v5961_v53  ;;  %v2696_v18 = vand.u32 2147483648, %v7208_v31  ;;  %v2694_v15 = vand.u32 2147483647, %v7208_v31  ;;  %3264 = vmatpush.bf16.msrb.mxu0 %v5921_v48  ;;  %vm2690_vm11 = vweird.f32 %v7208_v31  ;;  %v6568_v48 = vld [vmem:[#allocation10 + $0xec] sm:$0xf0] }
 0x509   :  { %3349 = vmatpush.bf16.msrb.mxu3 %v5965_v9  ;;  %vm7227_vm8 = vcmp.eq.f32.partialorder %v2679_v55, 8.507059e+37  ;;  %v5925_v33 = vor.u32 %v6510_v45, %v5922_v16  ;;  %v6513_v60 = vld [vmem:[#allocation9 + $0x34] sm:$0xf0]  ;;  %v5933_v55 = vor.u32 %v6511_v6, %v5930_v58  ;;  %v5905_v53 = vor.u32 %v6508_v54, %v5904_v52 }
 0x50a   :  { %v5929_v26 = vor.u32 %v6513_v60, %v5928_v56  ;;  %v2697_v29 = vor.u32 1.1754944e-38, %v2696_v18  ;;  %v2682_v37 = vor.u32 1.1754944e-38, %v2681_v25  ;;  %vm2695_vm15 = vcmp.eq.f32.partialorder %v2694_v15, 8.507059e+37  ;;  %v6566_v56 = vld [vmem:[#allocation10 + $0xe4] sm:$0xf] }
 0x50b   :  { %v6687_v63 = vpop.eup %6686  ;;  %3293 = vmatpush.bf16.msrb.mxu1 %v5925_v33  ;;  %v5917_v18 = vor.u32 %v6507_v39, %v5914_v13  ;;  %v3052_v15 = vpack.c.bf16 %v7143_v47, %v7127_v7  ;;  %v6146_v33 = vld [vmem:[#allocation10 + $0xf0] sm:$0xf0]  ;;  %v3053_v6 = vpack.c.bf16 %v7171_v49, %v7155_v24  ;;  %v3054_v7 = vpack.c.bf16 %v7199_v5, %v7183_v42  ;;  %v6152_v47 = vld [vmem:[#allocation10 + $0xe8] sm:$0xf]  ;;  %v6569_v58 = vld [vmem:[#allocation10 + $0xf4] sm:$0xf0] }
 0x50c   :  { %v7214_v2 = vadd.f32 1.0, %v6687_v63  ;;  %3321 = vmatpush.bf16.msrb.mxu2 %v5945_v34  ;;  %3265 = vmatpush.bf16.msrb.mxu0 %v5905_v53  ;;  %v7266_v60 = vor.u32 %v6566_v56, %v6146_v33  ;;  %v357_v49 = vadd.f32 %v7105_v44, %v7044_v12  ;;  %v386_v42 = vadd.f32 %v7110_v51, %v7048_v14  ;;  %v6562_v53 = vld [vmem:[#allocation10 + $0xc4] sm:$0xf]  ;;  %v6563_v14 = vld [vmem:[#allocation10 + $0xcc] sm:$0xf] }
 0x50d   :  { %v7216_v3 = vpop.eup %6688  ;;  %3350 = vmatpush.bf16.msrb.mxu3 %v5949_v35  ;;  %v7286_v12 = vor.u32 %v6562_v53, %v6130_v8  ;;  %v6112_v51 = vld [vmem:[#allocation10 + $0xa0] sm:$0xf]  ;;  %v6114_v13 = vld [vmem:[#allocation10 + $0xb0] sm:$0xf0]  ;;  %v6552_v56 = vld [vmem:[#allocation10 + $0x6c] sm:$0xf0] }
 0x50e   :  { %v7218_v23 = vpop.eup %6690  ;;  %v2671_v50 = vmul.f32 %v7216_v3, %v7206_v41  ;;  %6692 = vrcp.f32 %v7214_v2  ;;  %vm2676_vm9 = vweird.f32 %v7216_v3  ;;  %v2711_v34 = vand.u32 2147483648, %v7214_v2  ;;  %v6550_v33 = vld [vmem:[#allocation10 + $0x64] sm:$0xf]  ;;  %v6064_v53 = vld [vmem:[#allocation10 + $0x40] sm:$0xf] }
 0x50f   :  { %v2686_v19 = vmul.f32 %v7218_v23, %v7208_v31  ;;  %6694 = vtanh.f32 %v2657_v0  ;;  %vm2691_vm10 = vweird.f32 %v7218_v23  ;;  %vm2677_vm13 = vmor %vm2675_vm12, %vm2676_vm9  ;;  %vm2705_vm1 = vweird.f32 %v7214_v2  ;;  %v6548_v8 = vld [vmem:[#allocation10 + $0x4c] sm:$0xf0] }
 0x510   :  { %v2672_v27 = vsub.f32 1.0, %v2671_v50  ;;  %vm2692_vm14 = vmor %vm2690_vm11, %vm2691_vm10  ;;  %3322 = vmatpush.bf16.msrb.mxu2 %v5929_v26  ;;  %v5909_v50 = vor.u32 %v6506_v57, %v5906_v38  ;;  %v2712_v45 = vor.u32 1.1754944e-38, %v2711_v34  ;;  %v6567_v26 = vld [vmem:[#allocation10 + $0xec] sm:$0xf]  ;;  %v6098_v34 = vld [vmem:[#allocation10 + $0x90] sm:$0xf0] }
 0x511   :  { %v2687_v46 = vsub.f32 1.0, %v2686_v19  ;;  %3351 = vmatpush.bf16.msrb.mxu3 %v5933_v55  ;;  %v6154_v55 = vld [vmem:[#allocation10 + $0xf8] sm:$0xf0] }
 0x512   :  { %v2673_v59 = vmul.f32 %v7216_v3, %v2672_v27  ;;  %3294 = vmatpush.bf16.msrb.mxu1 %v5909_v50  ;;  %v7277_v24 = vor.u32 %v6567_v26, %v6154_v55  ;;  %v6561_v50 = vld [vmem:[#allocation10 + $0xb4] sm:$0xf0] }
 0x513   :  { %v2688_v61 = vmul.f32 %v7218_v23, %v2687_v46  ;;  %v6553_v55 = vld [vmem:[#allocation10 + $0x74] sm:$0xf0] }
 0x514   :  { %v6693_v63 = vpop.eup %6692  ;;  %v2674_v0 = vadd.f32 %v7216_v3, %v2673_v59  ;;  %3323 = vmatpush.bf16.msrb.mxu2 %v5913_v11  ;;  %v415_v11 = vadd.f32 %v7114_v22, %v7058_v20  ;;  %v6557_v22 = vld [vmem:[#allocation10 + $0x94] sm:$0xf0] }
 0x515   :  { %v6695_v9 = vpop.eup %6694  ;;  %v2701_v28 = vmul.f32 %v6693_v63, %v7214_v2  ;;  %v2689_v62 = vadd.f32 %v7218_v23, %v2688_v61  ;;  %3352 = vmatpush.bf16.msrb.mxu3 %v5917_v18  ;;  %vm2706_vm0 = vweird.f32 %v6693_v63  ;;  %v7274_v61 = vor.u32 %v6569_v58, %v6152_v47  ;;  %v6096_v18 = vld [vmem:[#allocation10 + $0x80] sm:$0xf]  ;;  %v6082_v47 = vld [vmem:[#allocation10 + $0x70] sm:$0xf0]  ;;  %v6088_v58 = vld [vmem:[#allocation10 + $0x68] sm:$0xf] }
 0x516   :  { %v2678_v41 = vsel %vm2677_vm13, %v7216_v3, %v2674_v0  ;;  %vm2707_vm2 = vmor %vm2705_vm1, %vm2706_vm0  ;;  %v6564_v0 = vld [vmem:[#allocation10 + $0xcc] sm:$0xf0] }
 0x517   :  { %v2702_v17 = vsub.f32 1.0, %v2701_v28  ;;  %v2683_v10 = vsel %vm7227_vm8, %v2682_v37, %v2678_v41  ;;  %v2693_v19 = vsel %vm2692_vm14, %v7218_v23, %v2689_v62  ;;  %v2709_v23 = vand.u32 2147483647, %v7214_v2  ;;  %v6144_v2 = vld [vmem:[#allocation10 + $0xe0] sm:$0xf] }
 0x518   :  { %v2698_v25 = vsel %vm2695_vm15, %v2697_v29, %v2693_v19  ;;  %v2717_v30 = vmul.f32 %v6695_v9, %v2683_v10  ;;  %v7264_v59 = vor.u32 %v6568_v48, %v6144_v2  ;;  %v6565_v9 = vld [vmem:[#allocation10 + $0xd4] sm:$0xf0]  ;;  %v6560_v37 = vld [vmem:[#allocation10 + $0xac] sm:$0xf0]  ;;  %v6558_v62 = vld [vmem:[#allocation10 + $0xa4] sm:$0xf] }
 0x519   :  { %v2703_v31 = vmul.f32 %v6693_v63, %v2702_v17  ;;  %v2716_v27 = vmul.f32 %v2698_v25, %v7196_v43  ;;  %vm2710_vm3 = vcmp.eq.f32.partialorder %v2709_v23, 8.507059e+37  ;;  %v7288_v44 = vor.u32 %v6565_v9, %v6136_v1  ;;  %v6120_v41 = vld [vmem:[#allocation10 + $0xa8] sm:$0xf]  ;;  %v6138_v19 = vld [vmem:[#allocation10 + $0xd8] sm:$0xf0] }
 0x51a   :  { %v7293_v39 = vor.u32 %v6560_v37, %v6112_v51  ;;  %v7297_v17 = vor.u32 %v6558_v62, %v6114_v13  ;;  %v7299_v10 = vor.u32 %v6561_v50, %v6120_v41  ;;  %v6556_v25 = vld [vmem:[#allocation10 + $0x8c] sm:$0xf0]  ;;  %v6104_v23 = vld [vmem:[#allocation10 + $0x88] sm:$0xf]  ;;  %v6080_v48 = vld [vmem:[#allocation10 + $0x60] sm:$0xf]  ;;  %v7336_v62 = vor.u32 %v6548_v8, %v6064_v53 }
 0x51b   :  { %v7252_v3 = vadd.f32 %v2717_v30, %v2716_v27  ;;  %v2704_v32 = vadd.f32 %v6693_v63, %v2703_v31  ;;  %v7303_v27 = vor.u32 %v6563_v14, %v6138_v19  ;;  %v7306_v20 = vor.u32 %v6556_v25, %v6096_v18  ;;  %v6546_v9 = vld [vmem:[#allocation10 + $0x44] sm:$0xf]  ;;  %v6549_v37 = vld [vmem:[#allocation10 + $0x54] sm:$0xf0]  ;;  %v6551_v13 = vld [vmem:[#allocation10 + $0x6c] sm:$0xf] }
 0x51c   :  { %v7312_v2 = vor.u32 %v6557_v22, %v6104_v23  ;;  %v6090_v41 = vld [vmem:[#allocation10 + $0x78] sm:$0xf0]  ;;  %v6048_v19 = vld [vmem:[#allocation10 + $0x20] sm:$0xf]  ;;  %v6544_v18 = vld [vmem:[#allocation10 + $0x2c] sm:$0xf0] }
 0x51d   :  { %6696 = vtanh.f32 %v7252_v3  ;;  %v2708_v35 = vsel %vm2707_vm2, %v6693_v63, %v2704_v32  ;;  %v6128_v63 = vld [vmem:[#allocation10 + $0xc0] sm:$0xf]  ;;  %v6554_v32 = vld [vmem:[#allocation10 + $0x84] sm:$0xf]  ;;  %v6050_v23 = vld [vmem:[#allocation10 + $0x30] sm:$0xf0] }
 0x51e   :  { %v2713_v16 = vsel %vm2710_vm3, %v2712_v45, %v2708_v35  ;;  %v7284_v38 = vor.u32 %v6564_v0, %v6128_v63  ;;  %v7326_v63 = vor.u32 %v6550_v33, %v6082_v47  ;;  %v7328_v0 = vor.u32 %v6553_v55, %v6088_v58  ;;  %v6032_v8 = vld [vmem:[#allocation10] sm:$0xf] }
 0x523   :  { %v6697_v43 = vpop.eup %6696 }
 0x524   :  { %v7258_v46 = vmul.f32 %v6697_v43, %v2713_v16  ;;  %v6559_v16 = vld [vmem:[#allocation10 + $0xac] sm:$0xf] }
 0x526   :  { %v2723_v36 = vpack.c.bf16 %v7258_v46, %v7258_v46 }
 0x528   :  { %2931 = vmatmul.bf16.vlgmr.msra.gmra.mxu0 %v2723_v36  ;;  %2944 = vmatmul.bf16.vlgmr.msra.gmra.mxu1 %v2723_v36 }
 0x529   :  { %2957 = vmatmul.bf16.vlgmr.msra.gmra.mxu2 %v2723_v36  ;;  %2970 = vmatmul.bf16.vlgmr.msra.gmra.mxu3 %v2723_v36  ;;  %v6122_v36 = vld [vmem:[#allocation10 + $0xb8] sm:$0xf0] }
 0x52a   :  { %3604 = vmatpush.bf16.msra.mxu0 %v7264_v59  ;;  %3617 = vmatpush.bf16.msra.mxu1 %v7266_v60 }
 0x52b   :  { %3630 = vmatpush.bf16.msra.mxu2 %v7274_v61  ;;  %3643 = vmatpush.bf16.msra.mxu3 %v7277_v24 }
 0x52e   :  { %3605 = vmatpush.bf16.msra.mxu0 %v7284_v38  ;;  %3618 = vmatpush.bf16.msra.mxu1 %v7286_v12 }
 0x52f   :  { %3631 = vmatpush.bf16.msra.mxu2 %v7288_v44  ;;  %3644 = vmatpush.bf16.msra.mxu3 %v7303_v27 }
 0x532   :  { %3606 = vmatpush.bf16.msra.mxu0 %v7293_v39  ;;  %3619 = vmatpush.bf16.msra.mxu1 %v7297_v17 }
 0x533   :  { %3632 = vmatpush.bf16.msra.mxu2 %v7299_v10 }
 0x536   :  { %3607 = vmatpush.bf16.msra.mxu0 %v7306_v20 }
 0x537   :  { %3633 = vmatpush.bf16.msra.mxu2 %v7312_v2 }
 0x538   :  { %3266 = vmatmul.bf16.vlgmr.msrb.gmra.mxu0 %v3052_v15  ;;  %3295 = vmatmul.bf16.vlgmr.msrb.gmra.mxu1 %v3052_v15 }
 0x539   :  { %3324 = vmatmul.bf16.vlgmr.msrb.gmra.mxu2 %v3052_v15  ;;  %3353 = vmatmul.bf16.vlgmr.msrb.gmra.mxu3 %v3052_v15  ;;  %v7310_v15 = vor.u32 %v6554_v32, %v6098_v34  ;;  %v7347_v32 = vor.u32 %v6551_v13, %v6090_v41  ;;  %v6542_v34 = vld [vmem:[#allocation10 + $0x24] sm:$0xf] }
 0x53a   :  { %v7364_v33 = vor.u32 %v6542_v34, %v6050_v23 }
 0x53b   :  { %3620 = vmatpush.bf16.msra.mxu1 %v7310_v15  ;;  %3634 = vmatpush.bf16.msra.mxu2 %v7328_v0 }
 0x53f   :  { %3621 = vmatpush.bf16.msra.mxu1 %v7326_v63 }
 0x548   :  { %3271 = vmatmul.bf16.gmra.mxu0 %v3053_v6  ;;  %3300 = vmatmul.bf16.gmra.mxu1 %v3053_v6 }
 0x549   :  { %3329 = vmatmul.bf16.gmra.mxu2 %v3053_v6  ;;  %3358 = vmatmul.bf16.gmra.mxu3 %v3053_v6 }
 0x558   :  { %3276 = vmatmul.bf16.gmra.mxu0 %v3054_v7  ;;  %3305 = vmatmul.bf16.gmra.mxu1 %v3054_v7 }
 0x559   :  { %3334 = vmatmul.bf16.gmra.mxu2 %v3054_v7  ;;  %3363 = vmatmul.bf16.gmra.mxu3 %v3054_v7  ;;  %v7315_v7 = vor.u32 %v6559_v16, %v6122_v36  ;;  %v7355_v36 = vor.u32 %v6544_v18, %v6048_v19  ;;  %v6040_v18 = vld [vmem:[#allocation10 + $0x8] sm:$0xf] }
 0x55b   :  { %3645 = vmatpush.bf16.msra.mxu3 %v7315_v7 }
 0x5a5   :  { %v2932_v5 = vpop.f32.mrf.mxu0  ;;  %v2945_v52 = vpop.f32.mrf.mxu1 }
 0x5a6   :  { %v2975_v54 = vadd.f32 %v2932_v5, %v357_v49  ;;  %v2976_v57 = vadd.f32 %v2945_v52, %v386_v42  ;;  %v6555_v49 = vld [vmem:[#allocation10 + $0x8c] sm:$0xf]  ;;  %v6106_v42 = vld [vmem:[#allocation10 + $0x98] sm:$0xf0] }
 0x5a7   :  { %v7332_v1 = vor.u32 %v6555_v49, %v6106_v42  ;;  %v6543_v49 = vld [vmem:[#allocation10 + $0x2c] sm:$0xf]  ;;  %v6058_v42 = vld [vmem:[#allocation10 + $0x38] sm:$0xf0] }
 0x5a8   :  { %v5899_v29 = vmul.f32 -1.442695, %v2975_v54  ;;  %v5900_v28 = vmul.f32 -1.442695, %v2976_v57  ;;  %v7320_v54 = vor.u32 %v6552_v56, %v6080_v48  ;;  %v6547_v48 = vld [vmem:[#allocation10 + $0x4c] sm:$0xf]  ;;  %v7389_v19 = vor.u32 %v6543_v49, %v6058_v42 }
 0x5a9   :  { %3646 = vmatpush.bf16.msra.mxu3 %v7332_v1 }
 0x5aa   :  { %6698 = vpow2.f32 %v5899_v29  ;;  %v6066_v29 = vld [vmem:[#allocation10 + $0x50] sm:$0xf0]  ;;  %3608 = vmatpush.bf16.msra.mxu0 %v7320_v54 }
 0x5ab   :  { %6700 = vpow2.f32 %v5900_v28  ;;  %v6072_v28 = vld [vmem:[#allocation10 + $0x48] sm:$0xf]  ;;  %v7340_v50 = vor.u32 %v6546_v9, %v6066_v29  ;;  %v6540_v9 = vld [vmem:[#allocation10 + $0xc] sm:$0xf0] }
 0x5ac   :  { %v2958_v30 = vpop.f32.mrf.mxu2  ;;  %v7301_v31 = vpop.f32.mrf.mxu3  ;;  %v7385_v13 = vor.u32 %v6540_v9, %v6032_v8 }
 0x5ad   :  { %v2977_v35 = vadd.f32 %v2958_v30, %v415_v11  ;;  %v2934_v45 = vpop.f32.mrf.mxu0  ;;  %v2947_v43 = vpop.f32.mrf.mxu1  ;;  %v7342_v11 = vor.u32 %v6549_v37, %v6072_v28  ;;  %v444_v30 = vadd.f32 %v7118_v40, %v7060_v21  ;;  %v6074_v21 = vld [vmem:[#allocation10 + $0x58] sm:$0xf0]  ;;  %3622 = vmatpush.bf16.msra.mxu1 %v7340_v50  ;;  %3647 = vmatpush.bf16.msra.mxu3 %v7347_v32 }
 0x5ae   :  { %v6545_v43 = vld [vmem:[#allocation10 + $0x34] sm:$0xf0]  ;;  %3609 = vmatpush.bf16.msra.mxu0 %v7336_v62  ;;  %v7373_v55 = vor.u32 %v6547_v48, %v6074_v21 }
 0x5af   :  { %v5901_v6 = vmul.f32 -1.442695, %v2977_v35  ;;  %v6056_v35 = vld [vmem:[#allocation10 + $0x28] sm:$0xf]  ;;  %v2978_v16 = vadd.f32 %v7301_v31, %v444_v30  ;;  %3635 = vmatpush.bf16.msra.mxu2 %v7342_v11 }
 0x5b0   :  { %v6699_v26 = vpop.eup %6698  ;;  %v7366_v31 = vor.u32 %v6545_v43, %v6056_v35  ;;  %v6539_v35 = vld [vmem:[#allocation10 + $0xc] sm:$0xf]  ;;  %v6042_v43 = vld [vmem:[#allocation10 + $0x18] sm:$0xf0] }
 0x5b1   :  { %v6701_v5 = vpop.eup %6700  ;;  %v7317_v52 = vadd.f32 1.0, %v6699_v26  ;;  %6702 = vpow2.f32 %v5901_v6  ;;  %3623 = vmatpush.bf16.msra.mxu1 %v7364_v33  ;;  %3648 = vmatpush.bf16.msra.mxu3 %v7373_v55  ;;  %v7408_v49 = vor.u32 %v6539_v35, %v6042_v43 }
 0x5b2   :  { %v7322_v57 = vadd.f32 1.0, %v6701_v5  ;;  %3610 = vmatpush.bf16.msra.mxu0 %v7355_v36 }
 0x5b3   :  { %6704 = vrcp.f32 %v7317_v52  ;;  %v3000_v47 = vand.u32 2147483647, %v7317_v52  ;;  %v3002_v26 = vand.u32 2147483648, %v7317_v52  ;;  %3636 = vmatpush.bf16.msra.mxu2 %v7366_v31  ;;  %vm2996_vm6 = vweird.f32 %v7317_v52 }
 0x5b4   :  { %6706 = vrcp.f32 %v7322_v57  ;;  %v2960_v14 = vpop.f32.mrf.mxu2  ;;  %v2973_v51 = vpop.f32.mrf.mxu3  ;;  %v3017_v53 = vand.u32 2147483648, %v7322_v57  ;;  %v3015_v28 = vand.u32 2147483647, %v7322_v57  ;;  %vm3011_vm7 = vweird.f32 %v7322_v57 }
 0x5b5   :  { %v6538_v14 = vld [vmem:[#allocation10 + $0x4] sm:$0xf]  ;;  %v6034_v51 = vld [vmem:[#allocation10 + $0x10] sm:$0xf0]  ;;  %v3003_v48 = vor.u32 1.1754944e-38, %v3002_v26  ;;  %vm3001_vm10 = vcmp.eq.f32.partialorder %v3000_v47, 8.507059e+37  ;;  %3649 = vmatpush.bf16.msra.mxu3 %v7389_v19 }
 0x5b6   :  { %v7387_v41 = vor.u32 %v6538_v14, %v6034_v51  ;;  %3611 = vmatpush.bf16.msra.mxu0 %v7385_v13  ;;  %vm3016_vm11 = vcmp.eq.f32.partialorder %v3015_v28, 8.507059e+37 }
 0x5b7   :  { %v6703_v25 = vpop.eup %6702 }
 0x5b8   :  { %v7349_v45 = vadd.f32 1.0, %v6703_v25  ;;  %v6541_v25 = vld [vmem:[#allocation10 + $0x14] sm:$0xf0]  ;;  %3624 = vmatpush.bf16.msra.mxu1 %v7387_v41 }
 0x5b9   :  { %v7351_v22 = vpop.eup %6704  ;;  %v7393_v23 = vor.u32 %v6541_v25, %v6040_v18  ;;  %3650 = vmatpush.bf16.msra.mxu3 %v7408_v49 }
 0x5ba   :  { %v7357_v40 = vpop.eup %6706  ;;  %v2992_v56 = vmul.f32 %v7351_v22, %v7317_v52  ;;  %6708 = vrcp.f32 %v7349_v45  ;;  %vm2997_vm5 = vweird.f32 %v7351_v22  ;;  %v3018_v52 = vor.u32 1.1754944e-38, %v3017_v53  ;;  %3730 = vmatpush.bf16.msrb.mxu0 %v7264_v59 }
 0x5bb   :  { %v3007_v6 = vmul.f32 %v7357_v40, %v7322_v57  ;;  %6710 = vtanh.f32 %v2978_v16  ;;  %vm3012_vm4 = vweird.f32 %v7357_v40  ;;  %vm2998_vm8 = vmor %vm2996_vm6, %vm2997_vm5  ;;  %3637 = vmatpush.bf16.msra.mxu2 %v7393_v23  ;;  %v3032_v8 = vand.u32 2147483648, %v7349_v45 }
 0x5bc   :  { %v2993_v58 = vsub.f32 1.0, %v2992_v56  ;;  %vm3013_vm9 = vmor %vm3011_vm7, %vm3012_vm4  ;;  %3743 = vmatpush.bf16.msrb.mxu1 %v7266_v60  ;;  %vm3026_vm13 = vweird.f32 %v7349_v45  ;;  %v3354_v18 = vpop.f32.mrf.mxu3 }
 0x5bd   :  { %v3008_v5 = vsub.f32 1.0, %v3007_v6  ;;  %3769 = vmatpush.bf16.msrb.mxu3 %v7277_v24 }
 0x5be   :  { %v2994_v29 = vmul.f32 %v7351_v22, %v2993_v58  ;;  %3731 = vmatpush.bf16.msrb.mxu0 %v7284_v38 }
 0x5bf   :  { %v3009_v37 = vmul.f32 %v7357_v40, %v3008_v5  ;;  %3756 = vmatpush.bf16.msrb.mxu2 %v7274_v61 }
 0x5c0   :  { %v6709_v30 = vpop.eup %6708  ;;  %v2995_v34 = vadd.f32 %v7351_v22, %v2994_v29  ;;  %3744 = vmatpush.bf16.msrb.mxu1 %v7286_v12  ;;  %v3033_v29 = vor.u32 1.1754944e-38, %v3032_v8 }
 0x5c1   :  { %v3022_v16 = vmul.f32 %v6709_v30, %v7349_v45  ;;  %v3010_v21 = vadd.f32 %v7357_v40, %v3009_v37  ;;  %v6711_v57 = vpop.eup %6710  ;;  %vm3027_vm12 = vweird.f32 %v6709_v30  ;;  %3770 = vmatpush.bf16.msrb.mxu3 %v7303_v27  ;;  %v3325_v37 = vpop.f32.mrf.mxu2 }
 0x5c2   :  { %v2999_v56 = vsel %vm2998_vm8, %v7351_v22, %v2995_v34  ;;  %vm3028_vm14 = vmor %vm3026_vm13, %vm3027_vm12  ;;  %3732 = vmatpush.bf16.msrb.mxu0 %v7293_v39 }
 0x5c3   :  { %v3023_v6 = vsub.f32 1.0, %v3022_v16  ;;  %v3004_v58 = vsel %vm3001_vm10, %v3003_v48, %v2999_v56  ;;  %v3014_v26 = vsel %vm3013_vm9, %v7357_v40, %v3010_v21  ;;  %3757 = vmatpush.bf16.msrb.mxu2 %v7288_v44 }
 0x5c4   :  { %v3019_v42 = vsel %vm3016_vm11, %v3018_v52, %v3014_v26  ;;  %v3038_v5 = vmul.f32 %v6711_v57, %v3004_v58  ;;  %3745 = vmatpush.bf16.msrb.mxu1 %v7297_v17  ;;  %v7490_v35 = vpop.f32.mrf.mxu3 }
 0x5c5   :  { %v3024_v22 = vmul.f32 %v6709_v30, %v3023_v6  ;;  %v3037_v47 = vmul.f32 %v3019_v42, %v7252_v3  ;;  %v3030_v3 = vand.u32 2147483647, %v7349_v45  ;;  %3771 = vmatpush.bf16.msrb.mxu3 %v7315_v7  ;;  %7843 = vst [vmem:[#allocation15_spill] sm:$0xff] %v7490_v35 }
 0x5c6   :  { %3733 = vmatpush.bf16.msrb.mxu0 %v7306_v20 }
 0x5c7   :  { %v3039_v53 = vadd.f32 %v3038_v5, %v3037_v47  ;;  %v3025_v40 = vadd.f32 %v6709_v30, %v3024_v22  ;;  %3758 = vmatpush.bf16.msrb.mxu2 %v7299_v10  ;;  %vm3031_vm15 = vcmp.eq.f32.partialorder %v3030_v3, 8.507059e+37 }
 0x5c8   :  { %3746 = vmatpush.bf16.msrb.mxu1 %v7310_v15 }
 0x5c9   :  { %6712 = vtanh.f32 %v3039_v53  ;;  %v3029_v9 = vsel %vm3028_vm14, %v6709_v30, %v3025_v40  ;;  %3772 = vmatpush.bf16.msrb.mxu3 %v7332_v1  ;;  %v7488_v34 = vpop.f32.mrf.mxu2 }
 0x5ca   :  { %v3034_v14 = vsel %vm3031_vm15, %v3033_v29, %v3029_v9  ;;  %3734 = vmatpush.bf16.msrb.mxu0 %v7320_v54 }
 0x5cb   :  { %3759 = vmatpush.bf16.msrb.mxu2 %v7312_v2 }
 0x5cc   :  { %3747 = vmatpush.bf16.msrb.mxu1 %v7326_v63  ;;  %v7498_v21 = vpop.f32.mrf.mxu3 }
 0x5cd   :  { %3773 = vmatpush.bf16.msrb.mxu3 %v7347_v32  ;;  %7847 = vst [vmem:[#allocation19_spill] sm:$0xff] %v7498_v21 }
 0x5ce   :  { %3735 = vmatpush.bf16.msrb.mxu0 %v7336_v62 }
 0x5cf   :  { %v6713_v28 = vpop.eup %6712  ;;  %3760 = vmatpush.bf16.msrb.mxu2 %v7328_v0 }
 0x5d0   :  { %v3041_v51 = vmul.f32 %v6713_v28, %v3034_v14  ;;  %3748 = vmatpush.bf16.msrb.mxu1 %v7340_v50  ;;  %v3088_v28 = vld [vmem:[%s7835_s6] sm:$0xf] }
 0x5d1   :  { %3774 = vmatpush.bf16.msrb.mxu3 %v7373_v55  ;;  %v7496_v48 = vpop.f32.mrf.mxu2 }
 0x5d2   :  { %v3055_v45 = vpack.c.bf16 %v3041_v51, %v7258_v46  ;;  %3736 = vmatpush.bf16.msrb.mxu0 %v7355_v36  ;;  %v3296_v46 = vpop.f32.mrf.mxu1  ;;  %7846 = vst [vmem:[#allocation18_spill] sm:$0xff] %v7496_v48 }
 0x5d3   :  { %3761 = vmatpush.bf16.msrb.mxu2 %v7342_v11 }
 0x5d4   :  { %3281 = vmatmul.bf16.gmra.mxu0 %v3055_v45  ;;  %3310 = vmatmul.bf16.gmra.mxu1 %v3055_v45  ;;  %v7506_v6 = vpop.f32.mrf.mxu3 }
 0x5d5   :  { %3339 = vmatmul.bf16.gmra.mxu2 %v3055_v45  ;;  %3368 = vmatmul.bf16.gmra.mxu3 %v3055_v45  ;;  %7851 = vst [vmem:[#allocation23_spill] sm:$0xff] %v7506_v6  ;;  %v7539_v45 = vperm.slane %v3088_v28, 0 }
 0x5d6   :  { %3749 = vmatpush.bf16.msrb.mxu1 %v7364_v33  ;;  %3737 = vmatpush.bf16.msrb.mxu0 %v7385_v13 }
 0x5d7   :  { %3762 = vmatpush.bf16.msrb.mxu2 %v7366_v31  ;;  %3775 = vmatpush.bf16.msrb.mxu3 %v7389_v19 }
 0x5d9   :  { %v7504_v57 = vpop.f32.mrf.mxu2 }
 0x5da   :  { %3750 = vmatpush.bf16.msrb.mxu1 %v7387_v41  ;;  %v7486_v30 = vpop.f32.mrf.mxu1  ;;  %7850 = vst [vmem:[#allocation22_spill] sm:$0xff] %v7504_v57 }
 0x5db   :  { %3763 = vmatpush.bf16.msrb.mxu2 %v7393_v23  ;;  %3776 = vmatpush.bf16.msrb.mxu3 %v7408_v49 }
 0x5dc   :  { %v7514_v5 = vpop.f32.mrf.mxu3 }
 0x5dd   :  { %7855 = vst [vmem:[#allocation27_spill] sm:$0xff] %v7514_v5 }
 0x5e1   :  { %v7512_v42 = vpop.f32.mrf.mxu2 }
 0x5e2   :  { %v7494_v16 = vpop.f32.mrf.mxu1  ;;  %7854 = vst [vmem:[#allocation26_spill] sm:$0xff] %v7512_v42  ;;  %v7549_v42 = vperm.slane %v3088_v28, 2 }
 0x5e3   :  { %7845 = vst [vmem:[#allocation17_spill] sm:$0xff] %v7494_v16 }
 0x5e4   :  { %3612 = vmatmul.bf16.vlgmr.msra.gmra.mxu0 %v6950_v4  ;;  %3625 = vmatmul.bf16.vlgmr.msra.gmra.mxu1 %v6950_v4  ;;  %v7522_v40 = vpop.f32.mrf.mxu3 }
 0x5e5   :  { %3638 = vmatmul.bf16.vlgmr.msra.gmra.mxu2 %v6950_v4  ;;  %3651 = vmatmul.bf16.vlgmr.msra.gmra.mxu3 %v6950_v4  ;;  %v3267_v4 = vpop.f32.mrf.mxu0  ;;  %7859 = vst [vmem:[#allocation31_spill] sm:$0xff] %v7522_v40 }
 0x5e6   :  { %3856 = vmatpush.bf16.msra.mxu0 %v7264_v59  ;;  %3869 = vmatpush.bf16.msra.mxu1 %v7266_v60 }
 0x5e7   :  { %3882 = vmatpush.bf16.msra.mxu2 %v7274_v61  ;;  %3895 = vmatpush.bf16.msra.mxu3 %v7277_v24 }
 0x5e9   :  { %v7520_v53 = vpop.f32.mrf.mxu2 }
 0x5ea   :  { %3857 = vmatpush.bf16.msra.mxu0 %v7284_v38  ;;  %3870 = vmatpush.bf16.msra.mxu1 %v7286_v12  ;;  %v7502_v56 = vpop.f32.mrf.mxu1  ;;  %7858 = vst [vmem:[#allocation30_spill] sm:$0xff] %v7520_v53  ;;  %v7541_v53 = vperm.slane %v3088_v28, 1 }
 0x5eb   :  { %3883 = vmatpush.bf16.msra.mxu2 %v7288_v44  ;;  %3896 = vmatpush.bf16.msra.mxu3 %v7303_v27  ;;  %7849 = vst [vmem:[#allocation21_spill] sm:$0xff] %v7502_v56 }
 0x5ed   :  { %v7484_v25 = vpop.f32.mrf.mxu0 }
 0x5ee   :  { %3858 = vmatpush.bf16.msra.mxu0 %v7293_v39  ;;  %3871 = vmatpush.bf16.msra.mxu1 %v7297_v17 }
 0x5ef   :  { %3884 = vmatpush.bf16.msra.mxu2 %v7299_v10  ;;  %3897 = vmatpush.bf16.msra.mxu3 %v7315_v7 }
 0x5f2   :  { %3859 = vmatpush.bf16.msra.mxu0 %v7306_v20  ;;  %3872 = vmatpush.bf16.msra.mxu1 %v7310_v15  ;;  %v7510_v26 = vpop.f32.mrf.mxu1 }
 0x5f3   :  { %3885 = vmatpush.bf16.msra.mxu2 %v7312_v2  ;;  %3898 = vmatpush.bf16.msra.mxu3 %v7332_v1  ;;  %7853 = vst [vmem:[#allocation25_spill] sm:$0xff] %v7510_v26  ;;  %v3326_v26 = vadd.f32 %v3325_v37, %v7549_v42 }
 0x5f5   :  { %v7492_v43 = vpop.f32.mrf.mxu0 }
 0x5f6   :  { %3860 = vmatpush.bf16.msra.mxu0 %v7320_v54  ;;  %3873 = vmatpush.bf16.msra.mxu1 %v7326_v63  ;;  %7844 = vst [vmem:[#allocation16_spill] sm:$0xff] %v7492_v43 }
 0x5f7   :  { %3886 = vmatpush.bf16.msra.mxu2 %v7328_v0  ;;  %3899 = vmatpush.bf16.msra.mxu3 %v7347_v32 }
 0x5fa   :  { %3861 = vmatpush.bf16.msra.mxu0 %v7336_v62  ;;  %3874 = vmatpush.bf16.msra.mxu1 %v7340_v50  ;;  %v7518_v47 = vpop.f32.mrf.mxu1 }
 0x5fb   :  { %3887 = vmatpush.bf16.msra.mxu2 %v7342_v11  ;;  %3900 = vmatpush.bf16.msra.mxu3 %v7373_v55  ;;  %7857 = vst [vmem:[#allocation29_spill] sm:$0xff] %v7518_v47 }
 0x5fd   :  { %v7500_v52 = vpop.f32.mrf.mxu0 }
 0x5fe   :  { %3862 = vmatpush.bf16.msra.mxu0 %v7355_v36  ;;  %3875 = vmatpush.bf16.msra.mxu1 %v7364_v33  ;;  %7848 = vst [vmem:[#allocation20_spill] sm:$0xff] %v7500_v52 }
 0x5ff   :  { %3888 = vmatpush.bf16.msra.mxu2 %v7366_v31  ;;  %3901 = vmatpush.bf16.msra.mxu3 %v7389_v19 }
 0x602   :  { %3863 = vmatpush.bf16.msra.mxu0 %v7385_v13  ;;  %3876 = vmatpush.bf16.msra.mxu1 %v7387_v41 }
 0x603   :  { %3889 = vmatpush.bf16.msra.mxu2 %v7393_v23  ;;  %3902 = vmatpush.bf16.msra.mxu3 %v7408_v49 }
 0x605   :  { %v7508_v58 = vpop.f32.mrf.mxu0 }
 0x606   :  { %7852 = vst [vmem:[#allocation24_spill] sm:$0xff] %v7508_v58 }
 0x60d   :  { %v7516_v22 = vpop.f32.mrf.mxu0 }
 0x60e   :  { %7856 = vst [vmem:[#allocation28_spill] sm:$0xff] %v7516_v22 }
 0x651   :  { %v7524_v8 = vpop.f32.mrf.mxu0  ;;  %v7526_v3 = vpop.f32.mrf.mxu1 }
 0x652   :  { %7860 = vst [vmem:[#allocation32_spill] sm:$0xff] %v7524_v8  ;;  %v3268_v8 = vadd.f32 %v3267_v4, %v7539_v45 }
 0x653   :  { %7861 = vst [vmem:[#allocation33_spill] sm:$0xff] %v7526_v3  ;;  %v3297_v3 = vadd.f32 %v3296_v46, %v7541_v53 }
 0x658   :  { %v7528_v9 = vpop.f32.mrf.mxu2  ;;  %v7530_v29 = vpop.f32.mrf.mxu3 }
 0x659   :  { %7862 = vst [vmem:[#allocation34_spill] sm:$0xff] %v7528_v9  ;;  %v7535_v14 = vpop.f32.mrf.mxu0  ;;  %v7537_v51 = vpop.f32.mrf.mxu1 }
 0x65a   :  { %7863 = vst [vmem:[#allocation35_spill] sm:$0xff] %v7530_v29 }
 0x65b   :  { %7864 = vst [vmem:[#allocation36_spill] sm:$0xff] %v7535_v14 }
 0x65c   :  { %7865 = vst [vmem:[#allocation37_spill] sm:$0xff] %v7537_v51 }
 0x660   :  { %v7545_v40 = vpop.f32.mrf.mxu2  ;;  %v7547_v9 = vpop.f32.mrf.mxu3 }
 0x661   :  { %7866 = vst [vmem:[#allocation38_spill] sm:$0xff] %v7545_v40  ;;  %v3613_v29 = vpop.f32.mrf.mxu0  ;;  %v3626_v47 = vpop.f32.mrf.mxu1 }
 0x662   :  { %7867 = vst [vmem:[#allocation39_spill] sm:$0xff] %v7547_v9  ;;  %v3656_v22 = vadd.f32 %v3613_v29, %v3268_v8  ;;  %v3657_v5 = vadd.f32 %v3626_v47, %v3297_v3  ;;  %v7552_v47 = vperm.slane %v3088_v28, 3 }
 0x664   :  { %v6158_v14 = vmul.f32 -1.442695, %v3656_v22  ;;  %v6159_v51 = vmul.f32 -1.442695, %v3657_v5  ;;  %7868 = vst [vmem:[#allocation40_spill] sm:$0xff] %v7552_v47  ;;  %v3355_v37 = vadd.f32 %v3354_v18, %v7552_v47 }
 0x666   :  { %6714 = vpow2.f32 %v6158_v14 }
 0x667   :  { %6716 = vpow2.f32 %v6159_v51 }
 0x668   :  { %v3639_v58 = vpop.f32.mrf.mxu2  ;;  %v3652_v4 = vpop.f32.mrf.mxu3 }
 0x669   :  { %v3658_v6 = vadd.f32 %v3639_v58, %v3326_v26  ;;  %v3615_v46 = vpop.f32.mrf.mxu0  ;;  %v3628_v57 = vpop.f32.mrf.mxu1  ;;  %v3659_v58 = vadd.f32 %v3652_v4, %v3355_v37 }
 0x66b   :  { %v6160_v40 = vmul.f32 -1.442695, %v3658_v6 }
 0x66c   :  { %v6715_v56 = vpop.eup %6714 }
 0x66d   :  { %v6717_v9 = vpop.eup %6716  ;;  %v3669_v52 = vadd.f32 1.0, %v6715_v56  ;;  %6718 = vpow2.f32 %v6160_v40 }
 0x66e   :  { %v3670_v8 = vadd.f32 1.0, %v6717_v9 }
 0x66f   :  { %6720 = vrcp.f32 %v3669_v52  ;;  %v3683_v40 = vand.u32 2147483648, %v3669_v52  ;;  %v3681_v46 = vand.u32 2147483647, %v3669_v52  ;;  %vm3677_vm2 = vweird.f32 %v3669_v52 }
 0x670   :  { %6722 = vrcp.f32 %v3670_v8  ;;  %v3641_v5 = vpop.f32.mrf.mxu2  ;;  %v3654_v22 = vpop.f32.mrf.mxu3  ;;  %v3698_v9 = vand.u32 2147483648, %v3670_v8  ;;  %vm3692_vm3 = vweird.f32 %v3670_v8 }
 0x671   :  { %v3696_v22 = vand.u32 2147483647, %v3670_v8  ;;  %vm3682_vm5 = vcmp.eq.f32.partialorder %v3681_v46, 8.507059e+37 }
 0x672   :  { %v3699_v48 = vor.u32 1.1754944e-38, %v3698_v9 }
 0x673   :  { %v6719_v3 = vpop.eup %6718  ;;  %vm3697_vm7 = vcmp.eq.f32.partialorder %v3696_v22, 8.507059e+37 }
 0x674   :  { %v3671_v29 = vadd.f32 1.0, %v6719_v3  ;;  %v3684_v3 = vor.u32 1.1754944e-38, %v3683_v40 }
 0x675   :  { %v6721_v14 = vpop.eup %6720 }
 0x676   :  { %v6723_v26 = vpop.eup %6722  ;;  %v3673_v57 = vmul.f32 %v6721_v14, %v3669_v52  ;;  %6724 = vrcp.f32 %v3671_v29  ;;  %vm3678_vm0 = vweird.f32 %v6721_v14  ;;  %vm3707_vm9 = vweird.f32 %v3671_v29 }
 0x677   :  { %v3688_v6 = vmul.f32 %v6723_v26, %v3670_v8  ;;  %6726 = vtanh.f32 %v3659_v58  ;;  %vm3693_vm1 = vweird.f32 %v6723_v26  ;;  %vm3679_vm4 = vmor %vm3677_vm2, %vm3678_vm0  ;;  %v3713_v8 = vand.u32 2147483648, %v3671_v29 }
 0x678   :  { %v3674_v51 = vsub.f32 1.0, %v3673_v57  ;;  %vm3694_vm6 = vmor %vm3692_vm3, %vm3693_vm1 }
 0x679   :  { %v3689_v56 = vsub.f32 1.0, %v3688_v6  ;;  %v3714_v9 = vor.u32 1.1754944e-38, %v3713_v8 }
 0x67a   :  { %v3675_v28 = vmul.f32 %v6721_v14, %v3674_v51 }
 0x67b   :  { %v3690_v5 = vmul.f32 %v6723_v26, %v3689_v56 }
 0x67c   :  { %v6725_v21 = vpop.eup %6724  ;;  %v3676_v18 = vadd.f32 %v6721_v14, %v3675_v28 }
 0x67d   :  { %v3703_v4 = vmul.f32 %v6725_v21, %v3671_v29  ;;  %v3691_v37 = vadd.f32 %v6723_v26, %v3690_v5  ;;  %v6727_v58 = vpop.eup %6726  ;;  %vm3708_vm8 = vweird.f32 %v6725_v21 }
 0x67e   :  { %v3680_v57 = vsel %vm3679_vm4, %v6721_v14, %v3676_v18  ;;  %v3711_v14 = vand.u32 2147483647, %v3671_v29  ;;  %vm3709_vm10 = vmor %vm3707_vm9, %vm3708_vm8 }
 0x67f   :  { %v3704_v6 = vsub.f32 1.0, %v3703_v4  ;;  %v3685_v51 = vsel %vm3682_vm5, %v3684_v3, %v3680_v57  ;;  %v3695_v16 = vsel %vm3694_vm6, %v6723_v26, %v3691_v37  ;;  %v3328_v4 = vadd.f32 %v7488_v34, %v7549_v42 }
 0x680   :  { %v3700_v56 = vsel %vm3697_vm7, %v3699_v48, %v3695_v16  ;;  %v3719_v43 = vmul.f32 %v6727_v58, %v3685_v51  ;;  %vm3712_vm11 = vcmp.eq.f32.partialorder %v3711_v14, 8.507059e+37 }
 0x681   :  { %v3705_v35 = vmul.f32 %v6725_v21, %v3704_v6  ;;  %v3718_v47 = vmul.f32 0.0, %v3700_v56 }
 0x683   :  { %v7555_v28 = vadd.f32 %v3719_v43, %v3718_v47  ;;  %v3706_v52 = vadd.f32 %v6725_v21, %v3705_v35  ;;  %v3270_v35 = vadd.f32 %v7484_v25, %v7539_v45  ;;  %v3299_v43 = vadd.f32 %v7486_v30, %v7541_v53 }
 0x685   :  { %6728 = vtanh.f32 %v7555_v28  ;;  %v3710_v40 = vsel %vm3709_vm10, %v6725_v21, %v3706_v52 }
 0x686   :  { %v3715_v26 = vsel %vm3712_vm11, %v3714_v9, %v3710_v40  ;;  %v7869_v9 = vld [vmem:[#allocation40_spill] sm:$0xff] }
 0x68b   :  { %v6729_v46 = vpop.eup %6728 }
 0x68c   :  { %v3722_v5 = vmul.f32 %v6729_v46, %v3715_v26  ;;  %v7870_v46 = vld [vmem:[#allocation15_spill] sm:$0xff] }
 0x68d   :  { %v3357_v34 = vadd.f32 %v7870_v46, %v7869_v9 }
 0x68e   :  { %v3723_v16 = vpack.c.bf16 %v3722_v5, %v3722_v5 }
 0x690   :  { %3738 = vmatmul.bf16.vlgmr.msrb.gmra.mxu0 %v3723_v16  ;;  %3751 = vmatmul.bf16.vlgmr.msrb.gmra.mxu1 %v3723_v16 }
 0x691   :  { %3764 = vmatmul.bf16.vlgmr.msrb.gmra.mxu2 %v3723_v16  ;;  %3777 = vmatmul.bf16.vlgmr.msrb.gmra.mxu3 %v3723_v16 }
 0x692   :  { %3982 = vmatpush.bf16.msrb.mxu0 %v7264_v59  ;;  %3995 = vmatpush.bf16.msrb.mxu1 %v7266_v60 }
 0x693   :  { %4008 = vmatpush.bf16.msrb.mxu2 %v7274_v61  ;;  %4021 = vmatpush.bf16.msrb.mxu3 %v7277_v24 }
 0x696   :  { %3983 = vmatpush.bf16.msrb.mxu0 %v7284_v38  ;;  %3996 = vmatpush.bf16.msrb.mxu1 %v7286_v12 }
 0x697   :  { %4009 = vmatpush.bf16.msrb.mxu2 %v7288_v44  ;;  %4022 = vmatpush.bf16.msrb.mxu3 %v7303_v27 }
 0x69a   :  { %3984 = vmatpush.bf16.msrb.mxu0 %v7293_v39  ;;  %3997 = vmatpush.bf16.msrb.mxu1 %v7297_v17 }
 0x69b   :  { %4010 = vmatpush.bf16.msrb.mxu2 %v7299_v10  ;;  %4023 = vmatpush.bf16.msrb.mxu3 %v7315_v7 }
 0x69e   :  { %3985 = vmatpush.bf16.msrb.mxu0 %v7306_v20  ;;  %3998 = vmatpush.bf16.msrb.mxu1 %v7310_v15 }
 0x69f   :  { %4011 = vmatpush.bf16.msrb.mxu2 %v7312_v2  ;;  %4024 = vmatpush.bf16.msrb.mxu3 %v7332_v1 }
 0x6a2   :  { %3986 = vmatpush.bf16.msrb.mxu0 %v7320_v54  ;;  %3999 = vmatpush.bf16.msrb.mxu1 %v7326_v63 }
 0x6a3   :  { %4012 = vmatpush.bf16.msrb.mxu2 %v7328_v0  ;;  %4025 = vmatpush.bf16.msrb.mxu3 %v7347_v32 }
 0x6a6   :  { %3987 = vmatpush.bf16.msrb.mxu0 %v7336_v62  ;;  %4000 = vmatpush.bf16.msrb.mxu1 %v7340_v50 }
 0x6a7   :  { %4013 = vmatpush.bf16.msrb.mxu2 %v7342_v11  ;;  %4026 = vmatpush.bf16.msrb.mxu3 %v7373_v55 }
 0x6aa   :  { %3988 = vmatpush.bf16.msrb.mxu0 %v7355_v36  ;;  %4001 = vmatpush.bf16.msrb.mxu1 %v7364_v33 }
 0x6ab   :  { %4014 = vmatpush.bf16.msrb.mxu2 %v7366_v31  ;;  %4027 = vmatpush.bf16.msrb.mxu3 %v7389_v19 }
 0x6ae   :  { %3989 = vmatpush.bf16.msrb.mxu0 %v7385_v13  ;;  %4002 = vmatpush.bf16.msrb.mxu1 %v7387_v41 }
 0x6af   :  { %4015 = vmatpush.bf16.msrb.mxu2 %v7393_v23  ;;  %4028 = vmatpush.bf16.msrb.mxu3 %v7408_v49 }
 0x70d   :  { %v3739_v48 = vpop.f32.mrf.mxu0  ;;  %v3752_v21 = vpop.f32.mrf.mxu1 }
 0x70e   :  { %v3782_v47 = vadd.f32 %v3739_v48, %v3270_v35  ;;  %v3783_v29 = vadd.f32 %v3752_v21, %v3299_v43 }
 0x710   :  { %v6161_v22 = vmul.f32 -1.442695, %v3782_v47  ;;  %v6162_v18 = vmul.f32 -1.442695, %v3783_v29 }
 0x712   :  { %6730 = vpow2.f32 %v6161_v22 }
 0x713   :  { %6732 = vpow2.f32 %v6162_v18 }
 0x714   :  { %v3765_v3 = vpop.f32.mrf.mxu2  ;;  %v3778_v37 = vpop.f32.mrf.mxu3 }
 0x715   :  { %v3784_v57 = vadd.f32 %v3765_v3, %v3328_v4  ;;  %v3741_v58 = vpop.f32.mrf.mxu0  ;;  %v3754_v6 = vpop.f32.mrf.mxu1  ;;  %v3785_v16 = vadd.f32 %v3778_v37, %v3357_v34 }
 0x717   :  { %v6163_v25 = vmul.f32 -1.442695, %v3784_v57 }
 0x718   :  { %v6731_v51 = vpop.eup %6730 }
 0x719   :  { %v6733_v56 = vpop.eup %6732  ;;  %v3795_v30 = vadd.f32 1.0, %v6731_v51  ;;  %6734 = vpow2.f32 %v6163_v25 }
 0x71a   :  { %v3796_v52 = vadd.f32 1.0, %v6733_v56 }
 0x71b   :  { %6736 = vrcp.f32 %v3795_v30  ;;  %v3809_v29 = vand.u32 2147483648, %v3795_v30  ;;  %v3807_v4 = vand.u32 2147483647, %v3795_v30  ;;  %vm3803_vm14 = vweird.f32 %v3795_v30 }
 0x71c   :  { %6738 = vrcp.f32 %v3796_v52  ;;  %v3767_v8 = vpop.f32.mrf.mxu2  ;;  %v3780_v14 = vpop.f32.mrf.mxu3  ;;  %v3824_v22 = vand.u32 2147483648, %v3796_v52  ;;  %v3822_v57 = vand.u32 2147483647, %v3796_v52  ;;  %vm3818_vm15 = vweird.f32 %v3796_v52 }
 0x71d   :  { %v3810_v25 = vor.u32 1.1754944e-38, %v3809_v29  ;;  %vm3808_vm2 = vcmp.eq.f32.partialorder %v3807_v4, 8.507059e+37 }
 0x71e   :  { %v3825_v56 = vor.u32 1.1754944e-38, %v3824_v22  ;;  %vm3823_vm3 = vcmp.eq.f32.partialorder %v3822_v57, 8.507059e+37  ;;  %v7872_v57 = vld [vmem:[#allocation17_spill] sm:$0xff] }
 0x71f   :  { %v6735_v40 = vpop.eup %6734 }
 0x720   :  { %v3797_v26 = vadd.f32 1.0, %v6735_v40 }
 0x721   :  { %v6737_v5 = vpop.eup %6736 }
 0x722   :  { %v6739_v35 = vpop.eup %6738  ;;  %v3799_v43 = vmul.f32 %v6737_v5, %v3795_v30  ;;  %6740 = vrcp.f32 %v3797_v26  ;;  %vm3804_vm12 = vweird.f32 %v6737_v5  ;;  %vm3833_vm5 = vweird.f32 %v3797_v26 }
 0x723   :  { %v3814_v48 = vmul.f32 %v6739_v35, %v3796_v52  ;;  %6742 = vtanh.f32 %v3785_v16  ;;  %vm3819_vm13 = vweird.f32 %v6739_v35  ;;  %vm3805_vm0 = vmor %vm3803_vm14, %vm3804_vm12 }
 0x724   :  { %v3800_v21 = vsub.f32 1.0, %v3799_v43  ;;  %vm3820_vm1 = vmor %vm3818_vm15, %vm3819_vm13 }
 0x725   :  { %v3815_v47 = vsub.f32 1.0, %v3814_v48 }
 0x726   :  { %v3801_v18 = vmul.f32 %v6737_v5, %v3800_v21 }
 0x727   :  { %v3816_v3 = vmul.f32 %v6739_v35, %v3815_v47  ;;  %v3839_v47 = vand.u32 2147483648, %v3797_v26 }
 0x728   :  { %v6741_v58 = vpop.eup %6740  ;;  %v3802_v6 = vadd.f32 %v6737_v5, %v3801_v18 }
 0x729   :  { %v3829_v37 = vmul.f32 %v6741_v58, %v3797_v26  ;;  %v3817_v51 = vadd.f32 %v6739_v35, %v3816_v3  ;;  %v6743_v14 = vpop.eup %6742  ;;  %vm3834_vm4 = vweird.f32 %v6741_v58  ;;  %v3840_v22 = vor.u32 1.1754944e-38, %v3839_v47 }
 0x72a   :  { %v3806_v8 = vsel %vm3805_vm0, %v6737_v5, %v3802_v6  ;;  %v3837_v5 = vand.u32 2147483647, %v3797_v26  ;;  %vm3835_vm6 = vmor %vm3833_vm5, %vm3834_vm4 }
 0x72b   :  { %v3830_v40 = vsub.f32 1.0, %v3829_v37  ;;  %v3811_v46 = vsel %vm3808_vm2, %v3810_v25, %v3806_v8  ;;  %v3821_v34 = vsel %vm3820_vm1, %v6739_v35, %v3817_v51 }
 0x72c   :  { %v3826_v16 = vsel %vm3823_vm3, %v3825_v56, %v3821_v34  ;;  %v3845_v43 = vmul.f32 %v6743_v14, %v3811_v46  ;;  %vm3838_vm7 = vcmp.eq.f32.partialorder %v3837_v5, 8.507059e+37  ;;  %v7873_v14 = vld [vmem:[#allocation18_spill] sm:$0xff] }
 0x72d   :  { %v3831_v48 = vmul.f32 %v6741_v58, %v3830_v40  ;;  %v3844_v21 = vmul.f32 %v3826_v16, %v7555_v28  ;;  %v7871_v28 = vld [vmem:[#allocation16_spill] sm:$0xff]  ;;  %v3331_v40 = vadd.f32 %v7873_v14, %v7549_v42 }
 0x72e   :  { %v3273_v26 = vadd.f32 %v7871_v28, %v7539_v45 }
 0x72f   :  { %v7599_v30 = vadd.f32 %v3845_v43, %v3844_v21  ;;  %v3832_v52 = vadd.f32 %v6741_v58, %v3831_v48 }
 0x731   :  { %6744 = vtanh.f32 %v7599_v30  ;;  %v3836_v29 = vsel %vm3835_vm6, %v6741_v58, %v3832_v52  ;;  %v3302_v58 = vadd.f32 %v7872_v57, %v7541_v53 }
 0x732   :  { %v3841_v18 = vsel %vm3838_vm7, %v3840_v22, %v3836_v29 }
 0x737   :  { %v6745_v35 = vpop.eup %6744 }
 0x738   :  { %v3848_v4 = vmul.f32 %v6745_v35, %v3841_v18 }
 0x73a   :  { %v3849_v3 = vpack.c.bf16 %v3848_v4, %v3848_v4  ;;  %v7874_v4 = vld [vmem:[#allocation19_spill] sm:$0xff] }
 0x73c   :  { %3864 = vmatmul.bf16.vlgmr.msra.gmra.mxu0 %v3849_v3  ;;  %3877 = vmatmul.bf16.vlgmr.msra.gmra.mxu1 %v3849_v3 }
 0x73d   :  { %3890 = vmatmul.bf16.vlgmr.msra.gmra.mxu2 %v3849_v3  ;;  %3903 = vmatmul.bf16.vlgmr.msra.gmra.mxu3 %v3849_v3  ;;  %v3360_v3 = vadd.f32 %v7874_v4, %v7869_v9 }
 0x73e   :  { %4108 = vmatpush.bf16.msra.mxu0 %v7264_v59  ;;  %4121 = vmatpush.bf16.msra.mxu1 %v7266_v60 }
 0x73f   :  { %4134 = vmatpush.bf16.msra.mxu2 %v7274_v61  ;;  %4147 = vmatpush.bf16.msra.mxu3 %v7277_v24 }
 0x742   :  { %4109 = vmatpush.bf16.msra.mxu0 %v7284_v38  ;;  %4122 = vmatpush.bf16.msra.mxu1 %v7286_v12 }
 0x743   :  { %4135 = vmatpush.bf16.msra.mxu2 %v7288_v44  ;;  %4148 = vmatpush.bf16.msra.mxu3 %v7303_v27 }
 0x746   :  { %4110 = vmatpush.bf16.msra.mxu0 %v7293_v39  ;;  %4123 = vmatpush.bf16.msra.mxu1 %v7297_v17 }
 0x747   :  { %4136 = vmatpush.bf16.msra.mxu2 %v7299_v10  ;;  %4149 = vmatpush.bf16.msra.mxu3 %v7315_v7 }
 0x74a   :  { %4111 = vmatpush.bf16.msra.mxu0 %v7306_v20  ;;  %4124 = vmatpush.bf16.msra.mxu1 %v7310_v15 }
 0x74b   :  { %4137 = vmatpush.bf16.msra.mxu2 %v7312_v2  ;;  %4150 = vmatpush.bf16.msra.mxu3 %v7332_v1 }
 0x74e   :  { %4112 = vmatpush.bf16.msra.mxu0 %v7320_v54  ;;  %4125 = vmatpush.bf16.msra.mxu1 %v7326_v63 }
 0x74f   :  { %4138 = vmatpush.bf16.msra.mxu2 %v7328_v0  ;;  %4151 = vmatpush.bf16.msra.mxu3 %v7347_v32 }
 0x752   :  { %4113 = vmatpush.bf16.msra.mxu0 %v7336_v62  ;;  %4126 = vmatpush.bf16.msra.mxu1 %v7340_v50 }
 0x753   :  { %4139 = vmatpush.bf16.msra.mxu2 %v7342_v11  ;;  %4152 = vmatpush.bf16.msra.mxu3 %v7373_v55 }
 0x756   :  { %4114 = vmatpush.bf16.msra.mxu0 %v7355_v36  ;;  %4127 = vmatpush.bf16.msra.mxu1 %v7364_v33 }
 0x757   :  { %4140 = vmatpush.bf16.msra.mxu2 %v7366_v31  ;;  %4153 = vmatpush.bf16.msra.mxu3 %v7389_v19 }
 0x75a   :  { %4115 = vmatpush.bf16.msra.mxu0 %v7385_v13  ;;  %4128 = vmatpush.bf16.msra.mxu1 %v7387_v41 }
 0x75b   :  { %4141 = vmatpush.bf16.msra.mxu2 %v7393_v23  ;;  %4154 = vmatpush.bf16.msra.mxu3 %v7408_v49 }
 0x7b9   :  { %v3865_v6 = vpop.f32.mrf.mxu0  ;;  %v3878_v37 = vpop.f32.mrf.mxu1 }
 0x7ba   :  { %v3908_v25 = vadd.f32 %v3865_v6, %v3273_v26  ;;  %v3909_v51 = vadd.f32 %v3878_v37, %v3302_v58 }
 0x7bc   :  { %v6164_v56 = vmul.f32 -1.442695, %v3908_v25  ;;  %v6165_v8 = vmul.f32 -1.442695, %v3909_v51 }
 0x7be   :  { %6746 = vpow2.f32 %v6164_v56 }
 0x7bf   :  { %6748 = vpow2.f32 %v6165_v8 }
 0x7c0   :  { %v3891_v46 = vpop.f32.mrf.mxu2  ;;  %v3904_v34 = vpop.f32.mrf.mxu3 }
 0x7c1   :  { %v3910_v16 = vadd.f32 %v3891_v46, %v3331_v40  ;;  %v3867_v43 = vpop.f32.mrf.mxu0  ;;  %v3880_v48 = vpop.f32.mrf.mxu1  ;;  %v3911_v57 = vadd.f32 %v3904_v34, %v3360_v3 }
 0x7c3   :  { %v6166_v21 = vmul.f32 -1.442695, %v3910_v16 }
 0x7c4   :  { %v6747_v52 = vpop.eup %6746 }
 0x7c5   :  { %v6749_v47 = vpop.eup %6748  ;;  %v3921_v5 = vadd.f32 1.0, %v6747_v52  ;;  %6750 = vpow2.f32 %v6166_v21 }
 0x7c6   :  { %v3922_v29 = vadd.f32 1.0, %v6749_v47 }
 0x7c7   :  { %6752 = vrcp.f32 %v3921_v5  ;;  %v3935_v56 = vand.u32 2147483648, %v3921_v5  ;;  %v3933_v40 = vand.u32 2147483647, %v3921_v5  ;;  %vm3929_vm10 = vweird.f32 %v3921_v5 }
 0x7c8   :  { %6754 = vrcp.f32 %v3922_v29  ;;  %v3893_v22 = vpop.f32.mrf.mxu2  ;;  %v3906_v35 = vpop.f32.mrf.mxu3  ;;  %v3950_v8 = vand.u32 2147483648, %v3922_v29  ;;  %v3948_v16 = vand.u32 2147483647, %v3922_v29  ;;  %vm3944_vm11 = vweird.f32 %v3922_v29 }
 0x7c9   :  { %v3936_v21 = vor.u32 1.1754944e-38, %v3935_v56  ;;  %vm3934_vm14 = vcmp.eq.f32.partialorder %v3933_v40, 8.507059e+37 }
 0x7ca   :  { %v3951_v47 = vor.u32 1.1754944e-38, %v3950_v8  ;;  %vm3949_vm15 = vcmp.eq.f32.partialorder %v3948_v16, 8.507059e+37  ;;  %v7876_v16 = vld [vmem:[#allocation21_spill] sm:$0xff] }
 0x7cb   :  { %v6751_v18 = vpop.eup %6750 }
 0x7cc   :  { %v3923_v28 = vadd.f32 1.0, %v6751_v18 }
 0x7cd   :  { %v6753_v26 = vpop.eup %6752 }
 0x7ce   :  { %v6755_v58 = vpop.eup %6754  ;;  %v3925_v6 = vmul.f32 %v6753_v26, %v3921_v5  ;;  %6756 = vrcp.f32 %v3923_v28  ;;  %vm3930_vm8 = vweird.f32 %v6753_v26  ;;  %vm3959_vm1 = vweird.f32 %v3923_v28 }
 0x7cf   :  { %v3940_v37 = vmul.f32 %v6755_v58, %v3922_v29  ;;  %6758 = vtanh.f32 %v3911_v57  ;;  %vm3945_vm9 = vweird.f32 %v6755_v58  ;;  %vm3931_vm12 = vmor %vm3929_vm10, %vm3930_vm8 }
 0x7d0   :  { %v3926_v25 = vsub.f32 1.0, %v3925_v6  ;;  %vm3946_vm13 = vmor %vm3944_vm11, %vm3945_vm9 }
 0x7d1   :  { %v3941_v51 = vsub.f32 1.0, %v3940_v37 }
 0x7d2   :  { %v3927_v14 = vmul.f32 %v6753_v26, %v3926_v25 }
 0x7d3   :  { %v3942_v46 = vmul.f32 %v6755_v58, %v3941_v51  ;;  %v3965_v51 = vand.u32 2147483648, %v3923_v28 }
 0x7d4   :  { %v6757_v43 = vpop.eup %6756  ;;  %v3928_v48 = vadd.f32 %v6753_v26, %v3927_v14 }
 0x7d5   :  { %v3955_v34 = vmul.f32 %v6757_v43, %v3923_v28  ;;  %v3943_v52 = vadd.f32 %v6755_v58, %v3942_v46  ;;  %v6759_v35 = vpop.eup %6758  ;;  %vm3960_vm0 = vweird.f32 %v6757_v43  ;;  %v3966_v8 = vor.u32 1.1754944e-38, %v3965_v51 }
 0x7d6   :  { %v3932_v22 = vsel %vm3931_vm12, %v6753_v26, %v3928_v48  ;;  %v3963_v26 = vand.u32 2147483647, %v3923_v28  ;;  %vm3961_vm2 = vmor %vm3959_vm1, %vm3960_vm0 }
 0x7d7   :  { %v3956_v18 = vsub.f32 1.0, %v3955_v34  ;;  %v3937_v4 = vsel %vm3934_vm14, %v3936_v21, %v3932_v22  ;;  %v3947_v3 = vsel %vm3946_vm13, %v6755_v58, %v3943_v52 }
 0x7d8   :  { %v3952_v57 = vsel %vm3949_vm15, %v3951_v47, %v3947_v3  ;;  %v3971_v6 = vmul.f32 %v6759_v35, %v3937_v4  ;;  %vm3964_vm3 = vcmp.eq.f32.partialorder %v3963_v26, 8.507059e+37  ;;  %v7877_v35 = vld [vmem:[#allocation22_spill] sm:$0xff] }
 0x7d9   :  { %v3957_v37 = vmul.f32 %v6757_v43, %v3956_v18  ;;  %v3970_v25 = vmul.f32 %v3952_v57, %v7599_v30  ;;  %v7875_v30 = vld [vmem:[#allocation20_spill] sm:$0xff]  ;;  %v3333_v18 = vadd.f32 %v7877_v35, %v7549_v42 }
 0x7da   :  { %v3275_v28 = vadd.f32 %v7875_v30, %v7539_v45 }
 0x7db   :  { %v7643_v5 = vadd.f32 %v3971_v6, %v3970_v25  ;;  %v3958_v29 = vadd.f32 %v6757_v43, %v3957_v37 }
 0x7dd   :  { %6760 = vtanh.f32 %v7643_v5  ;;  %v3962_v56 = vsel %vm3961_vm2, %v6757_v43, %v3958_v29  ;;  %v3304_v43 = vadd.f32 %v7876_v16, %v7541_v53 }
 0x7de   :  { %v3967_v14 = vsel %vm3964_vm3, %v3966_v8, %v3962_v56 }
 0x7e3   :  { %v6761_v58 = vpop.eup %6760 }
 0x7e4   :  { %v3974_v40 = vmul.f32 %v6761_v58, %v3967_v14 }
 0x7e6   :  { %v3975_v46 = vpack.c.bf16 %v3974_v40, %v3974_v40  ;;  %v7878_v40 = vld [vmem:[#allocation23_spill] sm:$0xff] }
 0x7e8   :  { %3990 = vmatmul.bf16.vlgmr.msrb.gmra.mxu0 %v3975_v46  ;;  %4003 = vmatmul.bf16.vlgmr.msrb.gmra.mxu1 %v3975_v46 }
 0x7e9   :  { %4016 = vmatmul.bf16.vlgmr.msrb.gmra.mxu2 %v3975_v46  ;;  %4029 = vmatmul.bf16.vlgmr.msrb.gmra.mxu3 %v3975_v46  ;;  %v3362_v46 = vadd.f32 %v7878_v40, %v7869_v9 }
 0x7ea   :  { %4234 = vmatpush.bf16.msrb.mxu0 %v7264_v59  ;;  %4247 = vmatpush.bf16.msrb.mxu1 %v7266_v60 }
 0x7eb   :  { %4260 = vmatpush.bf16.msrb.mxu2 %v7274_v61  ;;  %4273 = vmatpush.bf16.msrb.mxu3 %v7277_v24 }
 0x7ee   :  { %4235 = vmatpush.bf16.msrb.mxu0 %v7284_v38  ;;  %4248 = vmatpush.bf16.msrb.mxu1 %v7286_v12 }
 0x7ef   :  { %4261 = vmatpush.bf16.msrb.mxu2 %v7288_v44  ;;  %4274 = vmatpush.bf16.msrb.mxu3 %v7303_v27 }
 0x7f2   :  { %4236 = vmatpush.bf16.msrb.mxu0 %v7293_v39  ;;  %4249 = vmatpush.bf16.msrb.mxu1 %v7297_v17 }
 0x7f3   :  { %4262 = vmatpush.bf16.msrb.mxu2 %v7299_v10  ;;  %4275 = vmatpush.bf16.msrb.mxu3 %v7315_v7 }
 0x7f6   :  { %4237 = vmatpush.bf16.msrb.mxu0 %v7306_v20  ;;  %4250 = vmatpush.bf16.msrb.mxu1 %v7310_v15 }
 0x7f7   :  { %4263 = vmatpush.bf16.msrb.mxu2 %v7312_v2  ;;  %4276 = vmatpush.bf16.msrb.mxu3 %v7332_v1 }
 0x7fa   :  { %4238 = vmatpush.bf16.msrb.mxu0 %v7320_v54  ;;  %4251 = vmatpush.bf16.msrb.mxu1 %v7326_v63 }
 0x7fb   :  { %4264 = vmatpush.bf16.msrb.mxu2 %v7328_v0  ;;  %4277 = vmatpush.bf16.msrb.mxu3 %v7347_v32 }
 0x7fe   :  { %4239 = vmatpush.bf16.msrb.mxu0 %v7336_v62  ;;  %4252 = vmatpush.bf16.msrb.mxu1 %v7340_v50 }
 0x7ff   :  { %4265 = vmatpush.bf16.msrb.mxu2 %v7342_v11  ;;  %4278 = vmatpush.bf16.msrb.mxu3 %v7373_v55 }
 0x802   :  { %4240 = vmatpush.bf16.msrb.mxu0 %v7355_v36  ;;  %4253 = vmatpush.bf16.msrb.mxu1 %v7364_v33 }
 0x803   :  { %4266 = vmatpush.bf16.msrb.mxu2 %v7366_v31  ;;  %4279 = vmatpush.bf16.msrb.mxu3 %v7389_v19 }
 0x806   :  { %4241 = vmatpush.bf16.msrb.mxu0 %v7385_v13  ;;  %4254 = vmatpush.bf16.msrb.mxu1 %v7387_v41 }
 0x807   :  { %4267 = vmatpush.bf16.msrb.mxu2 %v7393_v23  ;;  %4280 = vmatpush.bf16.msrb.mxu3 %v7408_v49 }
 0x865   :  { %v3991_v48 = vpop.f32.mrf.mxu0  ;;  %v4004_v34 = vpop.f32.mrf.mxu1 }
 0x866   :  { %v4034_v21 = vadd.f32 %v3991_v48, %v3275_v28  ;;  %v4035_v52 = vadd.f32 %v4004_v34, %v3304_v43 }
 0x868   :  { %v6167_v47 = vmul.f32 -1.442695, %v4034_v21  ;;  %v6168_v22 = vmul.f32 -1.442695, %v4035_v52 }
 0x86a   :  { %6762 = vpow2.f32 %v6167_v47 }
 0x86b   :  { %6764 = vpow2.f32 %v6168_v22 }
 0x86c   :  { %v4017_v4 = vpop.f32.mrf.mxu2  ;;  %v4030_v3 = vpop.f32.mrf.mxu3 }
 0x86d   :  { %v4036_v57 = vadd.f32 %v4017_v4, %v3333_v18  ;;  %v3993_v6 = vpop.f32.mrf.mxu0  ;;  %v4006_v37 = vpop.f32.mrf.mxu1  ;;  %v4037_v16 = vadd.f32 %v4030_v3, %v3362_v46 }
 0x86f   :  { %v6169_v25 = vmul.f32 -1.442695, %v4036_v57 }
 0x870   :  { %v6763_v29 = vpop.eup %6762 }
 0x871   :  { %v6765_v51 = vpop.eup %6764  ;;  %v4047_v26 = vadd.f32 1.0, %v6763_v29  ;;  %6766 = vpow2.f32 %v6169_v25 }
 0x872   :  { %v4048_v56 = vadd.f32 1.0, %v6765_v51 }
 0x873   :  { %6768 = vrcp.f32 %v4047_v26  ;;  %v4061_v47 = vand.u32 2147483648, %v4047_v26  ;;  %v4059_v18 = vand.u32 2147483647, %v4047_v26  ;;  %vm4055_vm6 = vweird.f32 %v4047_v26 }
 0x874   :  { %6770 = vrcp.f32 %v4048_v56  ;;  %v4019_v8 = vpop.f32.mrf.mxu2  ;;  %v4032_v58 = vpop.f32.mrf.mxu3  ;;  %v4076_v22 = vand.u32 2147483648, %v4048_v56  ;;  %v4074_v57 = vand.u32 2147483647, %v4048_v56  ;;  %vm4070_vm7 = vweird.f32 %v4048_v56 }
 0x875   :  { %v4062_v25 = vor.u32 1.1754944e-38, %v4061_v47  ;;  %vm4060_vm10 = vcmp.eq.f32.partialorder %v4059_v18, 8.507059e+37 }
 0x876   :  { %v4077_v51 = vor.u32 1.1754944e-38, %v4076_v22  ;;  %vm4075_vm11 = vcmp.eq.f32.partialorder %v4074_v57, 8.507059e+37  ;;  %v7880_v57 = vld [vmem:[#allocation25_spill] sm:$0xff] }
 0x877   :  { %v6767_v14 = vpop.eup %6766 }
 0x878   :  { %v4049_v30 = vadd.f32 1.0, %v6767_v14 }
 0x879   :  { %v6769_v28 = vpop.eup %6768 }
 0x87a   :  { %v6771_v43 = vpop.eup %6770  ;;  %v4051_v48 = vmul.f32 %v6769_v28, %v4047_v26  ;;  %6772 = vrcp.f32 %v4049_v30  ;;  %vm4056_vm4 = vweird.f32 %v6769_v28  ;;  %vm4085_vm13 = vweird.f32 %v4049_v30 }
 0x87b   :  { %v4066_v34 = vmul.f32 %v6771_v43, %v4048_v56  ;;  %6774 = vtanh.f32 %v4037_v16  ;;  %vm4071_vm5 = vweird.f32 %v6771_v43  ;;  %vm4057_vm8 = vmor %vm4055_vm6, %vm4056_vm4 }
 0x87c   :  { %v4052_v21 = vsub.f32 1.0, %v4051_v48  ;;  %vm4072_vm9 = vmor %vm4070_vm7, %vm4071_vm5 }
 0x87d   :  { %v4067_v52 = vsub.f32 1.0, %v4066_v34 }
 0x87e   :  { %v4053_v35 = vmul.f32 %v6769_v28, %v4052_v21 }
 0x87f   :  { %v4068_v4 = vmul.f32 %v6771_v43, %v4067_v52  ;;  %v4091_v52 = vand.u32 2147483648, %v4049_v30 }
 0x880   :  { %v6773_v6 = vpop.eup %6772  ;;  %v4054_v37 = vadd.f32 %v6769_v28, %v4053_v35 }
 0x881   :  { %v4081_v3 = vmul.f32 %v6773_v6, %v4049_v30  ;;  %v4069_v29 = vadd.f32 %v6771_v43, %v4068_v4  ;;  %v6775_v58 = vpop.eup %6774  ;;  %vm4086_vm12 = vweird.f32 %v6773_v6  ;;  %v4092_v22 = vor.u32 1.1754944e-38, %v4091_v52 }
 0x882   :  { %v4058_v8 = vsel %vm4057_vm8, %v6769_v28, %v4054_v37  ;;  %v4089_v28 = vand.u32 2147483647, %v4049_v30  ;;  %vm4087_vm14 = vmor %vm4085_vm13, %vm4086_vm12 }
 0x883   :  { %v4082_v14 = vsub.f32 1.0, %v4081_v3  ;;  %v4063_v40 = vsel %vm4060_vm10, %v4062_v25, %v4058_v8  ;;  %v4073_v46 = vsel %vm4072_vm9, %v6771_v43, %v4069_v29 }
 0x884   :  { %v4078_v16 = vsel %vm4075_vm11, %v4077_v51, %v4073_v46  ;;  %v4097_v48 = vmul.f32 %v6775_v58, %v4063_v40  ;;  %vm4090_vm15 = vcmp.eq.f32.partialorder %v4089_v28, 8.507059e+37  ;;  %v7881_v58 = vld [vmem:[#allocation26_spill] sm:$0xff] }
 0x885   :  { %v4083_v34 = vmul.f32 %v6773_v6, %v4082_v14  ;;  %v4096_v21 = vmul.f32 %v4078_v16, %v7643_v5  ;;  %v7879_v5 = vld [vmem:[#allocation24_spill] sm:$0xff]  ;;  %v3336_v14 = vadd.f32 %v7881_v58, %v7549_v42 }
 0x886   :  { %v3278_v30 = vadd.f32 %v7879_v5, %v7539_v45 }
 0x887   :  { %v7687_v26 = vadd.f32 %v4097_v48, %v4096_v21  ;;  %v4084_v56 = vadd.f32 %v6773_v6, %v4083_v34 }
 0x889   :  { %6776 = vtanh.f32 %v7687_v26  ;;  %v4088_v47 = vsel %vm4087_vm14, %v6773_v6, %v4084_v56  ;;  %v3307_v6 = vadd.f32 %v7880_v57, %v7541_v53 }
 0x88a   :  { %v4093_v35 = vsel %vm4090_vm15, %v4092_v22, %v4088_v47 }
 0x88f   :  { %v6777_v43 = vpop.eup %6776 }
 0x890   :  { %v4100_v18 = vmul.f32 %v6777_v43, %v4093_v35 }
 0x892   :  { %v4101_v4 = vpack.c.bf16 %v4100_v18, %v4100_v18  ;;  %v7882_v18 = vld [vmem:[#allocation27_spill] sm:$0xff] }
 0x894   :  { %4116 = vmatmul.bf16.vlgmr.msra.gmra.mxu0 %v4101_v4  ;;  %4129 = vmatmul.bf16.vlgmr.msra.gmra.mxu1 %v4101_v4 }
 0x895   :  { %4142 = vmatmul.bf16.vlgmr.msra.gmra.mxu2 %v4101_v4  ;;  %4155 = vmatmul.bf16.vlgmr.msra.gmra.mxu3 %v4101_v4  ;;  %v3365_v4 = vadd.f32 %v7882_v18, %v7869_v9 }
 0x896   :  { %4360 = vmatpush.bf16.msra.mxu0 %v7264_v59  ;;  %4373 = vmatpush.bf16.msra.mxu1 %v7266_v60 }
 0x897   :  { %4386 = vmatpush.bf16.msra.mxu2 %v7274_v61  ;;  %4399 = vmatpush.bf16.msra.mxu3 %v7277_v24 }
 0x89a   :  { %4361 = vmatpush.bf16.msra.mxu0 %v7284_v38  ;;  %4374 = vmatpush.bf16.msra.mxu1 %v7286_v12 }
 0x89b   :  { %4387 = vmatpush.bf16.msra.mxu2 %v7288_v44  ;;  %4400 = vmatpush.bf16.msra.mxu3 %v7303_v27 }
 0x89e   :  { %4362 = vmatpush.bf16.msra.mxu0 %v7293_v39  ;;  %4375 = vmatpush.bf16.msra.mxu1 %v7297_v17 }
 0x89f   :  { %4388 = vmatpush.bf16.msra.mxu2 %v7299_v10  ;;  %4401 = vmatpush.bf16.msra.mxu3 %v7315_v7 }
 0x8a2   :  { %4363 = vmatpush.bf16.msra.mxu0 %v7306_v20  ;;  %4376 = vmatpush.bf16.msra.mxu1 %v7310_v15 }
 0x8a3   :  { %4389 = vmatpush.bf16.msra.mxu2 %v7312_v2  ;;  %4402 = vmatpush.bf16.msra.mxu3 %v7332_v1 }
 0x8a6   :  { %4364 = vmatpush.bf16.msra.mxu0 %v7320_v54  ;;  %4377 = vmatpush.bf16.msra.mxu1 %v7326_v63 }
 0x8a7   :  { %4390 = vmatpush.bf16.msra.mxu2 %v7328_v0  ;;  %4403 = vmatpush.bf16.msra.mxu3 %v7347_v32 }
 0x8aa   :  { %4365 = vmatpush.bf16.msra.mxu0 %v7336_v62  ;;  %4378 = vmatpush.bf16.msra.mxu1 %v7340_v50 }
 0x8ab   :  { %4391 = vmatpush.bf16.msra.mxu2 %v7342_v11  ;;  %4404 = vmatpush.bf16.msra.mxu3 %v7373_v55 }
 0x8ae   :  { %4366 = vmatpush.bf16.msra.mxu0 %v7355_v36  ;;  %4379 = vmatpush.bf16.msra.mxu1 %v7364_v33 }
 0x8af   :  { %4392 = vmatpush.bf16.msra.mxu2 %v7366_v31  ;;  %4405 = vmatpush.bf16.msra.mxu3 %v7389_v19 }
 0x8b2   :  { %4367 = vmatpush.bf16.msra.mxu0 %v7385_v13  ;;  %4380 = vmatpush.bf16.msra.mxu1 %v7387_v41 }
 0x8b3   :  { %4393 = vmatpush.bf16.msra.mxu2 %v7393_v23  ;;  %4406 = vmatpush.bf16.msra.mxu3 %v7408_v49 }
 0x911   :  { %v4117_v37 = vpop.f32.mrf.mxu0  ;;  %v4130_v3 = vpop.f32.mrf.mxu1 }
 0x912   :  { %v4160_v25 = vadd.f32 %v4117_v37, %v3278_v30  ;;  %v4161_v29 = vadd.f32 %v4130_v3, %v3307_v6 }
 0x914   :  { %v6170_v51 = vmul.f32 -1.442695, %v4160_v25  ;;  %v6171_v8 = vmul.f32 -1.442695, %v4161_v29 }
 0x916   :  { %6778 = vpow2.f32 %v6170_v51 }
 0x917   :  { %6780 = vpow2.f32 %v6171_v8 }
 0x918   :  { %v4143_v40 = vpop.f32.mrf.mxu2  ;;  %v4156_v46 = vpop.f32.mrf.mxu3 }
 0x919   :  { %v4162_v16 = vadd.f32 %v4143_v40, %v3336_v14  ;;  %v4119_v48 = vpop.f32.mrf.mxu0  ;;  %v4132_v34 = vpop.f32.mrf.mxu1  ;;  %v4163_v57 = vadd.f32 %v4156_v46, %v3365_v4 }
 0x91b   :  { %v6172_v21 = vmul.f32 -1.442695, %v4162_v16 }
 0x91c   :  { %v6779_v56 = vpop.eup %6778 }
 0x91d   :  { %v6781_v52 = vpop.eup %6780  ;;  %v4173_v28 = vadd.f32 1.0, %v6779_v56  ;;  %6782 = vpow2.f32 %v6172_v21 }
 0x91e   :  { %v4174_v47 = vadd.f32 1.0, %v6781_v52 }
 0x91f   :  { %6784 = vrcp.f32 %v4173_v28  ;;  %v4187_v51 = vand.u32 2147483648, %v4173_v28  ;;  %v4185_v14 = vand.u32 2147483647, %v4173_v28  ;;  %vm4181_vm2 = vweird.f32 %v4173_v28 }
 0x920   :  { %6786 = vrcp.f32 %v4174_v47  ;;  %v4145_v22 = vpop.f32.mrf.mxu2  ;;  %v4158_v43 = vpop.f32.mrf.mxu3  ;;  %v4202_v8 = vand.u32 2147483648, %v4174_v47  ;;  %v4200_v16 = vand.u32 2147483647, %v4174_v47  ;;  %vm4196_vm3 = vweird.f32 %v4174_v47 }
 0x921   :  { %v4188_v21 = vor.u32 1.1754944e-38, %v4187_v51  ;;  %vm4186_vm6 = vcmp.eq.f32.partialorder %v4185_v14, 8.507059e+37 }
 0x922   :  { %v4203_v52 = vor.u32 1.1754944e-38, %v4202_v8  ;;  %vm4201_vm7 = vcmp.eq.f32.partialorder %v4200_v16, 8.507059e+37 }
 0x923   :  { %v6783_v35 = vpop.eup %6782 }
 0x924   :  { %v4175_v5 = vadd.f32 1.0, %v6783_v35 }
 0x925   :  { %v6785_v30 = vpop.eup %6784 }
 0x926   :  { %v6787_v6 = vpop.eup %6786  ;;  %v4177_v37 = vmul.f32 %v6785_v30, %v4173_v28  ;;  %6788 = vrcp.f32 %v4175_v5  ;;  %vm4182_vm0 = vweird.f32 %v6785_v30  ;;  %vm4211_vm9 = vweird.f32 %v4175_v5 }
 0x927   :  { %v4192_v3 = vmul.f32 %v6787_v6, %v4174_v47  ;;  %6790 = vtanh.f32 %v4163_v57  ;;  %vm4197_vm1 = vweird.f32 %v6787_v6  ;;  %vm4183_vm4 = vmor %vm4181_vm2, %vm4182_vm0 }
 0x928   :  { %v4178_v25 = vsub.f32 1.0, %v4177_v37  ;;  %vm4198_vm5 = vmor %vm4196_vm3, %vm4197_vm1 }
 0x929   :  { %v4193_v29 = vsub.f32 1.0, %v4192_v3 }
 0x92a   :  { %v4179_v58 = vmul.f32 %v6785_v30, %v4178_v25 }
 0x92b   :  { %v4194_v40 = vmul.f32 %v6787_v6, %v4193_v29  ;;  %v4217_v29 = vand.u32 2147483648, %v4175_v5 }
 0x92c   :  { %v6789_v48 = vpop.eup %6788  ;;  %v4180_v34 = vadd.f32 %v6785_v30, %v4179_v58 }
 0x92d   :  { %v4207_v46 = vmul.f32 %v6789_v48, %v4175_v5  ;;  %v4195_v56 = vadd.f32 %v6787_v6, %v4194_v40  ;;  %v6791_v43 = vpop.eup %6790  ;;  %vm4212_vm8 = vweird.f32 %v6789_v48  ;;  %v4218_v8 = vor.u32 1.1754944e-38, %v4217_v29 }
 0x92e   :  { %v4184_v22 = vsel %vm4183_vm4, %v6785_v30, %v4180_v34  ;;  %v4215_v30 = vand.u32 2147483647, %v4175_v5  ;;  %vm4213_vm10 = vmor %vm4211_vm9, %vm4212_vm8 }
 0x92f   :  { %v4208_v35 = vsub.f32 1.0, %v4207_v46  ;;  %v4189_v18 = vsel %vm4186_vm6, %v4188_v21, %v4184_v22  ;;  %v4199_v4 = vsel %vm4198_vm5, %v6787_v6, %v4195_v56 }
 0x930   :  { %v4204_v57 = vsel %vm4201_vm7, %v4203_v52, %v4199_v4  ;;  %v4223_v37 = vmul.f32 %v6791_v43, %v4189_v18  ;;  %vm4216_vm11 = vcmp.eq.f32.partialorder %v4215_v30, 8.507059e+37 }
 0x931   :  { %v4209_v3 = vmul.f32 %v6789_v48, %v4208_v35  ;;  %v4222_v25 = vmul.f32 %v4204_v57, %v7687_v26 }
 0x933   :  { %v7731_v28 = vadd.f32 %v4223_v37, %v4222_v25  ;;  %v4210_v47 = vadd.f32 %v6789_v48, %v4209_v3 }
 0x935   :  { %6792 = vtanh.f32 %v7731_v28  ;;  %v4214_v51 = vsel %vm4213_vm10, %v6789_v48, %v4210_v47 }
 0x936   :  { %v4219_v58 = vsel %vm4216_vm11, %v4218_v8, %v4214_v51 }
 0x93b   :  { %v6793_v6 = vpop.eup %6792 }
 0x93c   :  { %v4226_v14 = vmul.f32 %v6793_v6, %v4219_v58 }
 0x93e   :  { %v4227_v40 = vpack.c.bf16 %v4226_v14, %v4226_v14 }
 0x940   :  { %4242 = vmatmul.bf16.vlgmr.msrb.gmra.mxu0 %v4227_v40  ;;  %4255 = vmatmul.bf16.vlgmr.msrb.gmra.mxu1 %v4227_v40 }
 0x941   :  { %4268 = vmatmul.bf16.vlgmr.msrb.gmra.mxu2 %v4227_v40  ;;  %4281 = vmatmul.bf16.vlgmr.msrb.gmra.mxu3 %v4227_v40 }
 0x942   :  { %4486 = vmatpush.bf16.msrb.mxu0 %v7264_v59  ;;  %4499 = vmatpush.bf16.msrb.mxu1 %v7266_v60  ;;  %v7883_v59 = vld [vmem:[#allocation28_spill] sm:$0xff] }
 0x943   :  { %4512 = vmatpush.bf16.msrb.mxu2 %v7274_v61  ;;  %4525 = vmatpush.bf16.msrb.mxu3 %v7277_v24  ;;  %v3280_v60 = vadd.f32 %v7883_v59, %v7539_v45  ;;  %v7884_v61 = vld [vmem:[#allocation29_spill] sm:$0xff] }
 0x944   :  { %v3309_v24 = vadd.f32 %v7884_v61, %v7541_v53 }
 0x946   :  { %4487 = vmatpush.bf16.msrb.mxu0 %v7284_v38  ;;  %4500 = vmatpush.bf16.msrb.mxu1 %v7286_v12 }
 0x947   :  { %4513 = vmatpush.bf16.msrb.mxu2 %v7288_v44  ;;  %4526 = vmatpush.bf16.msrb.mxu3 %v7303_v27  ;;  %v7885_v27 = vld [vmem:[#allocation30_spill] sm:$0xff] }
 0x94a   :  { %4488 = vmatpush.bf16.msrb.mxu0 %v7293_v39  ;;  %4501 = vmatpush.bf16.msrb.mxu1 %v7297_v17 }
 0x94b   :  { %4514 = vmatpush.bf16.msrb.mxu2 %v7299_v10  ;;  %4527 = vmatpush.bf16.msrb.mxu3 %v7315_v7 }
 0x94e   :  { %4489 = vmatpush.bf16.msrb.mxu0 %v7306_v20  ;;  %4502 = vmatpush.bf16.msrb.mxu1 %v7310_v15  ;;  %v3338_v20 = vadd.f32 %v7885_v27, %v7549_v42 }
 0x94f   :  { %4515 = vmatpush.bf16.msrb.mxu2 %v7312_v2  ;;  %4528 = vmatpush.bf16.msrb.mxu3 %v7332_v1 }
 0x952   :  { %4490 = vmatpush.bf16.msrb.mxu0 %v7320_v54  ;;  %4503 = vmatpush.bf16.msrb.mxu1 %v7326_v63 }
 0x953   :  { %4516 = vmatpush.bf16.msrb.mxu2 %v7328_v0  ;;  %4529 = vmatpush.bf16.msrb.mxu3 %v7347_v32 }
 0x956   :  { %4491 = vmatpush.bf16.msrb.mxu0 %v7336_v62  ;;  %4504 = vmatpush.bf16.msrb.mxu1 %v7340_v50 }
 0x957   :  { %4517 = vmatpush.bf16.msrb.mxu2 %v7342_v11  ;;  %4530 = vmatpush.bf16.msrb.mxu3 %v7373_v55 }
 0x95a   :  { %4492 = vmatpush.bf16.msrb.mxu0 %v7355_v36  ;;  %4505 = vmatpush.bf16.msrb.mxu1 %v7364_v33 }
 0x95b   :  { %4518 = vmatpush.bf16.msrb.mxu2 %v7366_v31  ;;  %4531 = vmatpush.bf16.msrb.mxu3 %v7389_v19  ;;  %v7886_v31 = vld [vmem:[#allocation31_spill] sm:$0xff] }
 0x95c   :  { %v3367_v55 = vadd.f32 %v7886_v31, %v7869_v9 }
 0x95e   :  { %4493 = vmatpush.bf16.msrb.mxu0 %v7385_v13  ;;  %4506 = vmatpush.bf16.msrb.mxu1 %v7387_v41 }
 0x95f   :  { %4519 = vmatpush.bf16.msrb.mxu2 %v7393_v23  ;;  %4532 = vmatpush.bf16.msrb.mxu3 %v7408_v49 }
 0x9bd   :  { %v4243_v38 = vpop.f32.mrf.mxu0  ;;  %v4256_v12 = vpop.f32.mrf.mxu1 }
 0x9be   :  { %v4286_v44 = vadd.f32 %v4243_v38, %v3280_v60  ;;  %v4287_v39 = vadd.f32 %v4256_v12, %v3309_v24 }
 0x9c0   :  { %v6173_v17 = vmul.f32 -1.442695, %v4286_v44  ;;  %v6174_v10 = vmul.f32 -1.442695, %v4287_v39 }
 0x9c2   :  { %6794 = vpow2.f32 %v6173_v17  ;;  %v7888_v17 = vld [vmem:[#allocation33_spill] sm:$0xff] }
 0x9c3   :  { %6796 = vpow2.f32 %v6174_v10  ;;  %v3312_v10 = vadd.f32 %v7888_v17, %v7541_v53 }
 0x9c4   :  { %v4269_v15 = vpop.f32.mrf.mxu2  ;;  %v4282_v2 = vpop.f32.mrf.mxu3 }
 0x9c5   :  { %v4288_v7 = vadd.f32 %v4269_v15, %v3338_v20  ;;  %v4245_v54 = vpop.f32.mrf.mxu0  ;;  %v4258_v63 = vpop.f32.mrf.mxu1  ;;  %v4289_v19 = vadd.f32 %v4282_v2, %v3367_v55 }
 0x9c6   :  { %v7889_v63 = vld [vmem:[#allocation34_spill] sm:$0xff] }
 0x9c7   :  { %v6175_v0 = vmul.f32 -1.442695, %v4288_v7 }
 0x9c8   :  { %v6795_v1 = vpop.eup %6794 }
 0x9c9   :  { %v6797_v62 = vpop.eup %6796  ;;  %v4299_v50 = vadd.f32 1.0, %v6795_v1  ;;  %6798 = vpow2.f32 %v6175_v0  ;;  %v3341_v0 = vadd.f32 %v7889_v63, %v7549_v42  ;;  %v7891_v63 = vld [vmem:[#allocation36_spill] sm:$0xff] }
 0x9ca   :  { %v4300_v11 = vadd.f32 1.0, %v6797_v62 }
 0x9cb   :  { %6800 = vrcp.f32 %v4299_v50  ;;  %v4313_v48 = vand.u32 2147483648, %v4299_v50  ;;  %v4311_v21 = vand.u32 2147483647, %v4299_v50  ;;  %vm4307_vm14 = vweird.f32 %v4299_v50 }
 0x9cc   :  { %6802 = vrcp.f32 %v4300_v11  ;;  %v4271_v32 = vpop.f32.mrf.mxu2  ;;  %v4284_v36 = vpop.f32.mrf.mxu3  ;;  %v4328_v34 = vand.u32 2147483648, %v4300_v11  ;;  %v4326_v52 = vand.u32 2147483647, %v4300_v11  ;;  %vm4322_vm15 = vweird.f32 %v4300_v11 }
 0x9cd   :  { %v4314_v18 = vor.u32 1.1754944e-38, %v4313_v48  ;;  %vm4312_vm2 = vcmp.eq.f32.partialorder %v4311_v21, 8.507059e+37 }
 0x9ce   :  { %v4329_v57 = vor.u32 1.1754944e-38, %v4328_v34  ;;  %vm4327_vm3 = vcmp.eq.f32.partialorder %v4326_v52, 8.507059e+37 }
 0x9cf   :  { %v6799_v33 = vpop.eup %6798 }
 0x9d0   :  { %v4301_v13 = vadd.f32 1.0, %v6799_v33 }
 0x9d1   :  { %v6801_v41 = vpop.eup %6800 }
 0x9d2   :  { %v6803_v23 = vpop.eup %6802  ;;  %v4303_v49 = vmul.f32 %v6801_v41, %v4299_v50  ;;  %6804 = vrcp.f32 %v4301_v13  ;;  %vm4308_vm12 = vweird.f32 %v6801_v41  ;;  %v4343_v40 = vand.u32 2147483648, %v4301_v13 }
 0x9d3   :  { %v4318_v26 = vmul.f32 %v6803_v23, %v4300_v11  ;;  %6806 = vtanh.f32 %v4289_v19  ;;  %vm4323_vm13 = vweird.f32 %v6803_v23  ;;  %vm4309_vm0 = vmor %vm4307_vm14, %vm4308_vm12  ;;  %vm4337_vm5 = vweird.f32 %v4301_v13 }
 0x9d4   :  { %v4304_v5 = vsub.f32 1.0, %v4303_v49  ;;  %vm4324_vm1 = vmor %vm4322_vm15, %vm4323_vm13  ;;  %v4341_v59 = vand.u32 2147483647, %v4301_v13  ;;  %v4344_v61 = vor.u32 1.1754944e-38, %v4343_v40  ;;  %v7890_v49 = vld [vmem:[#allocation35_spill] sm:$0xff] }
 0x9d5   :  { %v4319_v16 = vsub.f32 1.0, %v4318_v26  ;;  %v3370_v26 = vadd.f32 %v7890_v49, %v7869_v9 }
 0x9d6   :  { %v4305_v46 = vmul.f32 %v6801_v41, %v4304_v5  ;;  %vm4342_vm7 = vcmp.eq.f32.partialorder %v4341_v59, 8.507059e+37 }
 0x9d7   :  { %v4320_v56 = vmul.f32 %v6803_v23, %v4319_v16 }
 0x9d8   :  { %v6805_v22 = vpop.eup %6804  ;;  %v4306_v43 = vadd.f32 %v6801_v41, %v4305_v46 }
 0x9d9   :  { %v4333_v35 = vmul.f32 %v6805_v22, %v4301_v13  ;;  %v4321_v4 = vadd.f32 %v6803_v23, %v4320_v56  ;;  %v6807_v3 = vpop.eup %6806  ;;  %vm4338_vm4 = vweird.f32 %v6805_v22 }
 0x9da   :  { %v4310_v37 = vsel %vm4309_vm0, %v6801_v41, %v4306_v43  ;;  %vm4339_vm6 = vmor %vm4337_vm5, %vm4338_vm4 }
 0x9db   :  { %v4334_v25 = vsub.f32 1.0, %v4333_v35  ;;  %v4315_v47 = vsel %vm4312_vm2, %v4314_v18, %v4310_v37  ;;  %v4325_v29 = vsel %vm4324_vm1, %v6803_v23, %v4321_v4 }
 0x9dc   :  { %v4330_v30 = vsel %vm4327_vm3, %v4329_v57, %v4325_v29  ;;  %v4349_v51 = vmul.f32 %v6807_v3, %v4315_v47 }
 0x9dd   :  { %v4335_v8 = vmul.f32 %v6805_v22, %v4334_v25  ;;  %v4348_v6 = vmul.f32 %v4330_v30, %v7731_v28  ;;  %v7887_v28 = vld [vmem:[#allocation32_spill] sm:$0xff] }
 0x9de   :  { %v3283_v39 = vadd.f32 %v7887_v28, %v7539_v45 }
 0x9df   :  { %v7775_v58 = vadd.f32 %v4349_v51, %v4348_v6  ;;  %v4336_v14 = vadd.f32 %v6805_v22, %v4335_v8 }
 0x9e1   :  { %6808 = vtanh.f32 %v7775_v58  ;;  %v4340_v60 = vsel %vm4339_vm6, %v6805_v22, %v4336_v14 }
 0x9e2   :  { %v4345_v38 = vsel %vm4342_vm7, %v4344_v61, %v4340_v60 }
 0x9e7   :  { %v6809_v24 = vpop.eup %6808 }
 0x9e8   :  { %v4352_v12 = vmul.f32 %v6809_v24, %v4345_v38 }
 0x9ea   :  { %v4353_v44 = vpack.c.bf16 %v4352_v12, %v4352_v12 }
 0x9ec   :  { %4368 = vmatmul.bf16.vlgmr.msra.gmra.mxu0 %v4353_v44  ;;  %4381 = vmatmul.bf16.vlgmr.msra.gmra.mxu1 %v4353_v44 }
 0x9ed   :  { %4394 = vmatmul.bf16.vlgmr.msra.gmra.mxu2 %v4353_v44  ;;  %4407 = vmatmul.bf16.vlgmr.msra.gmra.mxu3 %v4353_v44 }
 0xa69   :  { %v4369_v27 = vpop.f32.mrf.mxu0  ;;  %v4382_v20 = vpop.f32.mrf.mxu1 }
 0xa6a   :  { %v4412_v15 = vadd.f32 %v4369_v27, %v3283_v39  ;;  %v4413_v2 = vadd.f32 %v4382_v20, %v3312_v10 }
 0xa6c   :  { %v6176_v7 = vmul.f32 -1.442695, %v4412_v15  ;;  %v6177_v54 = vmul.f32 -1.442695, %v4413_v2  ;;  %v6576_v2 = vld [vmem:[%s7836_s7 + $0x30] sm:$0xff] }
 0xa6e   :  { %6810 = vpow2.f32 %v6176_v7  ;;  %v6575_v7 = vld [vmem:[%s7836_s7 + $0x28] sm:$0xff] }
 0xa6f   :  { %6812 = vpow2.f32 %v6177_v54  ;;  %v6574_v54 = vld [vmem:[%s7836_s7 + $0x20] sm:$0xff] }
 0xa70   :  { %v4395_v1 = vpop.f32.mrf.mxu2  ;;  %v4408_v62 = vpop.f32.mrf.mxu3 }
 0xa71   :  { %v4414_v50 = vadd.f32 %v4395_v1, %v3341_v0  ;;  %v4371_v11 = vpop.f32.mrf.mxu0  ;;  %v4384_v32 = vpop.f32.mrf.mxu1  ;;  %v4415_v48 = vadd.f32 %v4408_v62, %v3370_v26  ;;  %v3285_v0 = vadd.f32 %v7891_v63, %v7539_v45  ;;  %v7892_v1 = vld [vmem:[#allocation37_spill] sm:$0xff]  ;;  %v7893_v45 = vld [vmem:[#allocation38_spill] sm:$0xff] }
 0xa72   :  { %v3314_v62 = vadd.f32 %v7892_v1, %v7541_v53  ;;  %v6571_v53 = vld [vmem:[%s7836_s7 + $0x8] sm:$0xff] }
 0xa73   :  { %v6178_v36 = vmul.f32 -1.442695, %v4414_v50  ;;  %v6573_v50 = vld [vmem:[%s7836_s7 + $0x18] sm:$0xff] }
 0xa74   :  { %v6811_v33 = vpop.eup %6810 }
 0xa75   :  { %v6813_v31 = vpop.eup %6812  ;;  %v4425_v55 = vadd.f32 1.0, %v6811_v33  ;;  %6814 = vpow2.f32 %v6178_v36 }
 0xa76   :  { %v4426_v13 = vadd.f32 1.0, %v6813_v31 }
 0xa77   :  { %6816 = vrcp.f32 %v4425_v55  ;;  %v4439_v22 = vand.u32 2147483648, %v4425_v55  ;;  %v4437_v18 = vand.u32 2147483647, %v4425_v55  ;;  %vm4433_vm10 = vweird.f32 %v4425_v55 }
 0xa78   :  { %6818 = vrcp.f32 %v4426_v13  ;;  %v4397_v41 = vpop.f32.mrf.mxu2  ;;  %v4410_v19 = vpop.f32.mrf.mxu3  ;;  %v4454_v43 = vand.u32 2147483648, %v4426_v13  ;;  %v4452_v57 = vand.u32 2147483647, %v4426_v13  ;;  %vm4448_vm11 = vweird.f32 %v4426_v13 }
 0xa79   :  { %v4440_v47 = vor.u32 1.1754944e-38, %v4439_v22  ;;  %vm4438_vm14 = vcmp.eq.f32.partialorder %v4437_v18, 8.507059e+37  ;;  %v3343_v41 = vadd.f32 %v7893_v45, %v7549_v42 }
 0xa7a   :  { %v4455_v30 = vor.u32 1.1754944e-38, %v4454_v43  ;;  %vm4453_vm15 = vcmp.eq.f32.partialorder %v4452_v57, 8.507059e+37  ;;  %v7894_v43 = vld [vmem:[#allocation39_spill] sm:$0xff] }
 0xa7b   :  { %v6815_v23 = vpop.eup %6814 }
 0xa7c   :  { %v4427_v5 = vadd.f32 1.0, %v6815_v23 }
 0xa7d   :  { %v6817_v16 = vpop.eup %6816 }
 0xa7e   :  { %v6819_v34 = vpop.eup %6818  ;;  %v4429_v46 = vmul.f32 %v6817_v16, %v4425_v55  ;;  %6820 = vrcp.f32 %v4427_v5  ;;  %vm4434_vm8 = vweird.f32 %v6817_v16  ;;  %v4469_v44 = vand.u32 2147483648, %v4427_v5 }
 0xa7f   :  { %v4444_v21 = vmul.f32 %v6819_v34, %v4426_v13  ;;  %6822 = vtanh.f32 %v4415_v48  ;;  %vm4449_vm9 = vweird.f32 %v6819_v34  ;;  %vm4435_vm12 = vmor %vm4433_vm10, %vm4434_vm8  ;;  %vm4463_vm1 = vweird.f32 %v4427_v5  ;;  %v6572_v13 = vld [vmem:[%s7836_s7 + $0x10] sm:$0xff] }
 0xa80   :  { %v4430_v56 = vsub.f32 1.0, %v4429_v46  ;;  %vm4450_vm13 = vmor %vm4448_vm11, %vm4449_vm9  ;;  %v4467_v28 = vand.u32 2147483647, %v4427_v5  ;;  %v4470_v17 = vor.u32 1.1754944e-38, %v4469_v44 }
 0xa81   :  { %v4445_v52 = vsub.f32 1.0, %v4444_v21 }
 0xa82   :  { %v4431_v35 = vmul.f32 %v6817_v16, %v4430_v56  ;;  %vm4468_vm3 = vcmp.eq.f32.partialorder %v4467_v28, 8.507059e+37 }
 0xa83   :  { %v4446_v4 = vmul.f32 %v6819_v34, %v4445_v52 }
 0xa84   :  { %v6821_v37 = vpop.eup %6820  ;;  %v4432_v3 = vadd.f32 %v6817_v16, %v4431_v35  ;;  %v3372_v35 = vadd.f32 %v7894_v43, %v7869_v9 }
 0xa85   :  { %v4459_v25 = vmul.f32 %v6821_v37, %v4427_v5  ;;  %v4447_v29 = vadd.f32 %v6819_v34, %v4446_v4  ;;  %v6823_v8 = vpop.eup %6822  ;;  %vm4464_vm0 = vweird.f32 %v6821_v37 }
 0xa86   :  { %v4436_v51 = vsel %vm4435_vm12, %v6817_v16, %v4432_v3  ;;  %vm4465_vm2 = vmor %vm4463_vm1, %vm4464_vm0  ;;  %v6570_v16 = vld [vmem:[%s7836_s7] sm:$0xff]  ;;  %vm4687_vm0 = vcmask 15360  }
 0xa87   :  { %v4460_v6 = vsub.f32 1.0, %v4459_v25  ;;  %v4441_v14 = vsel %vm4438_vm14, %v4440_v47, %v4436_v51  ;;  %v4451_v40 = vsel %vm4450_vm13, %v6819_v34, %v4447_v29 }
 0xa88   :  { %v4456_v59 = vsel %vm4453_vm15, %v4455_v30, %v4451_v40  ;;  %v4475_v60 = vmul.f32 %v6823_v8, %v4441_v14 }
 0xa89   :  { %v4461_v61 = vmul.f32 %v6821_v37, %v4460_v6  ;;  %v4474_v24 = vmul.f32 %v4456_v59, %v7775_v58  ;;  %v6577_v58 = vld [vmem:[%s7836_s7 + $0x38] sm:$0xff] }
 0xa8a   :  { %4674 = vmatpush.bf16.msra.mxu0 %v6577_v58 }
 0xa8b   :  { %v7787_v38 = vadd.f32 %v4475_v60, %v4474_v24  ;;  %v4462_v12 = vadd.f32 %v6821_v37, %v4461_v61 }
 0xa8d   :  { %6824 = vtanh.f32 %v7787_v38  ;;  %v4466_v39 = vsel %vm4465_vm2, %v6821_v37, %v4462_v12 }
 0xa8e   :  { %v4471_v27 = vsel %vm4468_vm3, %v4470_v17, %v4466_v39  ;;  %4675 = vmatpush.bf16.msra.mxu0 %v6576_v2 }
 0xa92   :  { %4676 = vmatpush.bf16.msra.mxu0 %v6575_v7 }
 0xa93   :  { %v6825_v10 = vpop.eup %6824 }
 0xa94   :  { %v4478_v20 = vmul.f32 %v6825_v10, %v4471_v27 }
 0xa96   :  { %v4479_v15 = vpack.c.bf16 %v4478_v20, %v4478_v20  ;;  %4677 = vmatpush.bf16.msra.mxu0 %v6574_v54 }
 0xa98   :  { %4494 = vmatmul.bf16.vlgmr.msrb.gmra.mxu0 %v4479_v15  ;;  %4507 = vmatmul.bf16.vlgmr.msrb.gmra.mxu1 %v4479_v15 }
 0xa99   :  { %4520 = vmatmul.bf16.vlgmr.msrb.gmra.mxu2 %v4479_v15  ;;  %4533 = vmatmul.bf16.vlgmr.msrb.gmra.mxu3 %v4479_v15 }
 0xa9a   :  { %4678 = vmatpush.bf16.msra.mxu0 %v6573_v50 }
 0xa9e   :  { %4679 = vmatpush.bf16.msra.mxu0 %v6572_v13 }
 0xaa2   :  { %4680 = vmatpush.bf16.msra.mxu0 %v6571_v53 }
 0xaa6   :  { %4681 = vmatpush.bf16.msra.mxu0 %v6570_v16 }
 0xb15   :  { %v4495_v11 = vpop.f32.mrf.mxu0  ;;  %v4508_v32 = vpop.f32.mrf.mxu1 }
 0xb16   :  { %v4538_v36 = vadd.f32 %v4495_v11, %v3285_v0  ;;  %v4539_v33 = vadd.f32 %v4508_v32, %v3314_v62 }
 0xb18   :  { %v6179_v31 = vmul.f32 -1.442695, %v4538_v36  ;;  %v6180_v55 = vmul.f32 -1.442695, %v4539_v33 }
 0xb1a   :  { %6826 = vpow2.f32 %v6179_v31 }
 0xb1b   :  { %6828 = vpow2.f32 %v6180_v55 }
 0xb1c   :  { %v4521_v19 = vpop.f32.mrf.mxu2  ;;  %v4534_v23 = vpop.f32.mrf.mxu3 }
 0xb1d   :  { %v4540_v49 = vadd.f32 %v4521_v19, %v3343_v41  ;;  %v4497_v26 = vpop.f32.mrf.mxu0  ;;  %v4510_v5 = vpop.f32.mrf.mxu1  ;;  %v4541_v57 = vadd.f32 %v4534_v23, %v3372_v35 }
 0xb1f   :  { %v6181_v48 = vmul.f32 -1.442695, %v4540_v49 }
 0xb20   :  { %v6827_v34 = vpop.eup %6826 }
 0xb21   :  { %v6829_v46 = vpop.eup %6828  ;;  %v4551_v21 = vadd.f32 1.0, %v6827_v34  ;;  %6830 = vpow2.f32 %v6181_v48 }
 0xb22   :  { %v4552_v56 = vadd.f32 1.0, %v6829_v46 }
 0xb23   :  { %6832 = vrcp.f32 %v4551_v21  ;;  %v4565_v30 = vand.u32 2147483648, %v4551_v21  ;;  %v4563_v6 = vand.u32 2147483647, %v4551_v21  ;;  %vm4559_vm6 = vweird.f32 %v4551_v21 }
 0xb24   :  { %6834 = vrcp.f32 %v4552_v56  ;;  %v4523_v42 = vpop.f32.mrf.mxu2  ;;  %v4536_v52 = vpop.f32.mrf.mxu3  ;;  %v4580_v51 = vand.u32 2147483648, %v4552_v56  ;;  %v4578_v40 = vand.u32 2147483647, %v4552_v56  ;;  %vm4574_vm7 = vweird.f32 %v4552_v56 }
 0xb25   :  { %v4566_v61 = vor.u32 1.1754944e-38, %v4565_v30  ;;  %vm4564_vm10 = vcmp.eq.f32.partialorder %v4563_v6, 8.507059e+37 }
 0xb26   :  { %v4581_v12 = vor.u32 1.1754944e-38, %v4580_v51  ;;  %vm4579_vm11 = vcmp.eq.f32.partialorder %v4578_v40, 8.507059e+37 }
 0xb27   :  { %v6831_v22 = vpop.eup %6830 }
 0xb28   :  { %v4553_v18 = vadd.f32 1.0, %v6831_v22 }
 0xb29   :  { %v6833_v4 = vpop.eup %6832 }
 0xb2a   :  { %v6835_v37 = vpop.eup %6834  ;;  %v4555_v3 = vmul.f32 %v6833_v4, %v4551_v21  ;;  %6836 = vrcp.f32 %v4553_v18  ;;  %vm4560_vm4 = vweird.f32 %v6833_v4  ;;  %v4595_v54 = vand.u32 2147483648, %v4553_v18 }
 0xb2b   :  { %v4570_v25 = vmul.f32 %v6835_v37, %v4552_v56  ;;  %6838 = vtanh.f32 %v4541_v57  ;;  %vm4575_vm5 = vweird.f32 %v6835_v37  ;;  %vm4561_vm8 = vmor %vm4559_vm6, %vm4560_vm4  ;;  %vm4589_vm13 = vweird.f32 %v4553_v18 }
 0xb2c   :  { %v4556_v47 = vsub.f32 1.0, %v4555_v3  ;;  %vm4576_vm9 = vmor %vm4574_vm7, %vm4575_vm5  ;;  %v4593_v63 = vand.u32 2147483647, %v4553_v18  ;;  %v4596_v1 = vor.u32 1.1754944e-38, %v4595_v54 }
 0xb2d   :  { %v4571_v29 = vsub.f32 1.0, %v4570_v25 }
 0xb2e   :  { %v4557_v8 = vmul.f32 %v6833_v4, %v4556_v47  ;;  %vm4594_vm15 = vcmp.eq.f32.partialorder %v4593_v63, 8.507059e+37 }
 0xb2f   :  { %v4572_v14 = vmul.f32 %v6835_v37, %v4571_v29 }
 0xb30   :  { %v6837_v59 = vpop.eup %6836  ;;  %v4558_v9 = vadd.f32 %v6833_v4, %v4557_v8 }
 0xb31   :  { %v4585_v60 = vmul.f32 %v6837_v59, %v4553_v18  ;;  %v4573_v24 = vadd.f32 %v6835_v37, %v4572_v14  ;;  %v6839_v28 = vpop.eup %6838  ;;  %vm4590_vm12 = vweird.f32 %v6837_v59 }
 0xb32   :  { %v4562_v44 = vsel %vm4561_vm8, %v6833_v4, %v4558_v9  ;;  %vm4591_vm14 = vmor %vm4589_vm13, %vm4590_vm12 }
 0xb33   :  { %v4586_v39 = vsub.f32 1.0, %v4585_v60  ;;  %v4567_v17 = vsel %vm4564_vm10, %v4566_v61, %v4562_v44  ;;  %v4577_v10 = vsel %vm4576_vm9, %v6835_v37, %v4573_v24 }
 0xb34   :  { %v4582_v27 = vsel %vm4579_vm11, %v4581_v12, %v4577_v10  ;;  %v4601_v20 = vmul.f32 %v6839_v28, %v4567_v17 }
 0xb35   :  { %v4587_v15 = vmul.f32 %v6837_v59, %v4586_v39  ;;  %v4600_v58 = vmul.f32 %v4582_v27, %v7787_v38  ;;  %v6585_v38 = vld [vmem:[%s7837_s8] ss:$0 sm:$0xff] }
 0xb37   :  { %v4602_v2 = vadd.f32 %v4601_v20, %v4600_v58  ;;  %v4588_v7 = vadd.f32 %v6837_v59, %v4587_v15 }
 0xb39   :  { %6840 = vtanh.f32 %v4602_v2  ;;  %v4592_v0 = vsel %vm4591_vm14, %v6837_v59, %v4588_v7 }
 0xb3a   :  { %v4597_v50 = vsel %vm4594_vm15, %v4596_v1, %v4592_v0 }
 0xb3f   :  { %v6841_v62 = vpop.eup %6840 }
 0xb40   :  { %v4604_v11 = vmul.f32 %v6841_v62, %v4597_v50 }
 0xb42   :  { %v4605_v32 = vpack.c.bf16 %v4604_v11, %v4604_v11 }
 0xb44   :  { %4682 = vmatmul.bf16.vlgmr.msra.gmra.mxu0 %v4605_v32 }
 0xbc1   :  { %v4683_v36 = vpop.f32.mrf.mxu0 }
 0xbc2   :  { %v4684_v33 = vadd.f32 %v6585_v38, %v4683_v36 }
 0xbc4   :  { %4688 = vst.msk [vmem:[%s7838_s9] sm:$0xff] %vm4687_vm0, %v4684_v33 }
 0xbc9   :  { %v4685_v31 = vpop.f32.mrf.mxu0 }
 0xbca   :  { %4693 = vsyncpa [#allocation6], 1 }
 0xbcb   :  { %4694 = vsyncpa [#allocation8], 1 }
 0xbcc   :  { %4695 = vsyncpa [#allocation11], 1 }

</bundles_post_ra>
